<compile_context>
chip_gen: v7x
topology: tpu7x:2x2x1
jax: 0.10.0
libtpu: 0.0.40
codegen_flags: <defaults>
</compile_context>

<pallas_src>
import functools

import jax
import jax.numpy as jnp
from jax import lax
from jax.experimental import pallas as pl
from jax.experimental.pallas import tpu as pltpu

REP_SIZE = 32 * 3 * 3   # 288 — implies 42x42 spatial input (42->21->11->6->3)
BETA = 0.2


def _vmem_spec():
    # Full-array block, explicitly pinned to VMEM (no grid, no index_map).
    return pl.BlockSpec(memory_space=pltpu.MemorySpace.VMEM)


def _elu(y):
    # ELU(alpha=1): y if y > 0 else exp(y) - 1   (clamp arg to avoid inf)
    return jnp.where(y > 0.0, y, jnp.exp(jnp.minimum(y, 0.0)) - 1.0)


# ---------------------------------------------------------------------------
# Pallas kernel 1: conv layer as im2col matmul (+bias+ELU), both states
# batched along M.
# ---------------------------------------------------------------------------
def _conv_dense_kernel(x_ref, w_ref, b_ref, o_ref):
    y = jnp.dot(x_ref[...], w_ref[...], preferred_element_type=jnp.float32)
    o_ref[...] = _elu(y + b_ref[...])


def conv_dense(x, w, b):
    M, K = x.shape
    N = w.shape[1]
    return pl.pallas_call(
        _conv_dense_kernel,
        in_specs=[_vmem_spec(), _vmem_spec(), _vmem_spec()],
        out_specs=_vmem_spec(),
        out_shape=jax.ShapeDtypeStruct((M, N), jnp.float32),
        cost_estimate=pl.CostEstimate(
            flops=2 * M * K * N,
            transcendentals=M * N,
            bytes_accessed=4 * (M * K + K * N + N + M * N)),
    )(x, w, b.reshape(1, N))


# ---------------------------------------------------------------------------
# Pallas kernel 2: fused MLP heads (inverse + forward model) and losses.
#   out lanes: [0] forward (MSE) loss, [1] blended total, [2] inverse CE loss
# ---------------------------------------------------------------------------
def _head_loss_kernel(x_inv_ref, x_fwd_ref, rep_new_ref, onehot_ref,
                      wa1_ref, ba1_ref, wa2_ref, ba2_ref,
                      ws1_ref, bs1_ref, ws2_ref, bs2_ref,
                      o_ref):
    # inverse model: logits = Linear(ELU(Linear([rep_old, rep_new])))
    h = jnp.dot(x_inv_ref[...], wa1_ref[...],
                preferred_element_type=jnp.float32)
    h = _elu(h + ba1_ref[...])
    logits = jnp.dot(h, wa2_ref[...],
                     preferred_element_type=jnp.float32) + ba2_ref[...]

    # forward model: state_pred = Linear(ELU(Linear([rep_old_detached, onehot])))
    hf = jnp.dot(x_fwd_ref[...], ws1_ref[...],
                 preferred_element_type=jnp.float32)
    hf = _elu(hf + bs1_ref[...])
    state_pred = jnp.dot(hf, ws2_ref[...],
                         preferred_element_type=jnp.float32) + bs2_ref[...]

    # forward loss: mean-squared error over the 288-dim rep (batch 1)
    diff = rep_new_ref[...] - state_pred
    fwd = jnp.sum(diff * diff, axis=-1, keepdims=True) * (1.0 / REP_SIZE)

    # inverse loss: cross-entropy of logits vs the taken action (one-hot)
    m = jnp.max(logits, axis=-1, keepdims=True)
    lse = jnp.log(jnp.sum(jnp.exp(logits - m), axis=-1, keepdims=True)) + m
    inv = jnp.sum(onehot_ref[...] * (lse - logits), axis=-1, keepdims=True)

    total = (1.0 - BETA) * inv + BETA * fwd

    # single lane-dense (1, 128) output: lanes 0/1/2 hold fwd/total/inv
    lane = lax.broadcasted_iota(jnp.int32, (1, 128), 1)
    o_ref[...] = (jnp.where(lane == 0, fwd, 0.0)
                  + jnp.where(lane == 1, total, 0.0)
                  + jnp.where(lane == 2, inv, 0.0))


def head_losses(rep_old, rep_new, onehot, act_pred_params, state_pred_params):
    (wa1, ba1), (wa2, ba2) = act_pred_params
    (ws1, bs1), (ws2, bs2) = state_pred_params
    A = onehot.shape[1]

    # cheap XLA glue: concatenated MLP inputs (few hundred bytes)
    x_inv = jnp.concatenate([rep_old, rep_new], axis=1)                  # (1, 576)
    x_fwd = jnp.concatenate([lax.stop_gradient(rep_old), onehot], axis=1)  # (1, 288+A)

    flops = 2 * (x_inv.shape[1] * 256 + 256 * A
                 + x_fwd.shape[1] * 256 + 256 * REP_SIZE)
    bytes_accessed = 4 * (wa1.size + wa2.size + ws1.size + ws2.size
                          + x_inv.size + x_fwd.size + rep_new.size
                          + onehot.size + 256 + A + 256 + REP_SIZE + 128)

    out = pl.pallas_call(
        _head_loss_kernel,
        in_specs=[_vmem_spec() for _ in range(12)],
        out_specs=_vmem_spec(),
        out_shape=jax.ShapeDtypeStruct((1, 128), jnp.float32),
        cost_estimate=pl.CostEstimate(
            flops=flops,
            transcendentals=2 * 256 + A + 1,
            bytes_accessed=bytes_accessed),
    )(x_inv, x_fwd, lax.stop_gradient(rep_new), onehot,
      wa1, ba1.reshape(1, -1), wa2, ba2.reshape(1, -1),
      ws1, bs1.reshape(1, -1), ws2, bs2.reshape(1, -1))
    return out[0, 0], out[0, 1], out[0, 2]   # (fwd, total, inv)


# ---------------------------------------------------------------------------
# JAX glue: batched im2col, batched encoder, parameter init, full forward
# ---------------------------------------------------------------------------
def _im2col(x, k=3, stride=2, pad=1):
    """x: (B, H, W, C) -> patches (B*Ho*Wo, k*k*C), K order (kh, kw, cin)."""
    B, H, W, C = x.shape
    xp = jnp.pad(x, ((0, 0), (pad, pad), (pad, pad), (0, 0)))
    Ho = (H + 2 * pad - k) // stride + 1
    Wo = (W + 2 * pad - k) // stride + 1
    cols = []
    for dh in range(k):
        for dw in range(k):
            patch = lax.slice(
                xp,
                (0, dh, dw, 0),
                (B, dh + stride * (Ho - 1) + 1, dw + stride * (Wo - 1) + 1, C),
                (1, stride, stride, 1),
            )
            cols.append(patch.reshape(B * Ho * Wo, C))
    return jnp.concatenate(cols, axis=1), Ho, Wo


def encode_pair(state_old_chw, state_new_chw, conv_params):
    """Runs the shared 4x [Conv2d(3x3,s2,p1)+ELU] encoder on BOTH states at
    once (batched along M), returning (rep_old, rep_new), each (1, 288)."""
    x = jnp.stack([state_old_chw, state_new_chw], axis=0).astype(jnp.float32)
    x = jnp.transpose(x, (0, 2, 3, 1))                     # (2, H, W, Cin)
    for w, b in conv_params:                               # w: (3, 3, Cin, Cout)
        cols, Ho, Wo = _im2col(x)                          # (2*Ho*Wo, 9*Cin)
        cout = w.shape[-1]
        y = conv_dense(cols, w.reshape(-1, cout), b)       # Pallas matmul+ELU
        x = y.reshape(2, Ho, Wo, cout)
    # CHW-major flatten per batch element, matching torch .view(-1, 32*3*3)
    rep = jnp.transpose(x, (0, 3, 1, 2)).reshape(2, REP_SIZE)
    return rep[0:1], rep[1:2]


def init_params(key, num_inputs, num_actions, scale=0.05):
    keys = jax.random.split(key, 16)

    def w(k, shape):
        return scale * jax.random.normal(k, shape, dtype=jnp.float32)

    conv = []
    cin = num_inputs
    for i in range(4):
        conv.append((w(keys[2 * i], (3, 3, cin, 32)), w(keys[2 * i + 1], (32,))))
        cin = 32
    act_pred = (
        (w(keys[8], (2 * REP_SIZE, 256)), w(keys[9], (256,))),
        (w(keys[10], (256, num_actions)), w(keys[11], (num_actions,))),
    )
    state_pred = (
        (w(keys[12], (REP_SIZE + num_actions, 256)), w(keys[13], (256,))),
        (w(keys[14], (256, REP_SIZE)), w(keys[15], (REP_SIZE,))),
    )
    return {"enc": conv, "act_pred": act_pred, "state_pred": state_pred}


@functools.partial(jax.jit, static_argnums=4)
def icm_forward(params, state_old, act, state_new, num_actions):
    # shared encoder, both states in one batched pass
    rep_old, rep_new = encode_pair(state_old, state_new, params["enc"])

    # one-hot of the taken action (torch: zeros().scatter_(1, act, 1))
    act_onehot = (jnp.arange(num_actions, dtype=jnp.int32)[None, :]
                  == act).astype(jnp.float32)                    # (1, A)

    # fused inverse model + forward model + losses (single pallas_call)
    fwd, total, inv = head_losses(rep_old, rep_new, act_onehot,
                                  params["act_pred"], params["state_pred"])
    # (forward_loss.data, (1-beta)*inverse + beta*forward, inverse_loss.data)
    return fwd, total, inv


# ---------------------------------------------------------------------------
if __name__ == "__main__":
    num_inputs = 4      # input channels (e.g. stacked frames)
    num_actions = 6     # action_space
    H = W = 42          # required so the encoder output is 3x3 (rep_size=288)

    key = jax.random.PRNGKey(0)
    kp, ko, kn = jax.random.split(key, 3)
    params = init_params(kp, num_inputs, num_actions)
    state_old = jax.random.normal(ko, (num_inputs, H, W), dtype=jnp.float32)
    state_new = jax.random.normal(kn, (num_inputs, H, W), dtype=jnp.float32)
    act = jnp.array([[2]], dtype=jnp.int32)   # (batch=1, 1) action index

    fwd_loss, total_loss, inv_loss = icm_forward(
        params, state_old, act, state_new, num_actions)
    jax.block_until_ready((fwd_loss, total_loss, inv_loss))
    print("KERNEL_OK")
</pallas_src>

<mosaic_0001>
module attributes {stable_mosaic.version = 11 : i64} {
  func.func @_conv_dense_kernel(%arg0: memref<882x36xf32, #tpu.memory_space<vmem>>, %arg1: memref<36x32xf32, #tpu.memory_space<vmem>>, %arg2: memref<1x32xf32, #tpu.memory_space<vmem>>, %arg3: memref<882x32xf32, #tpu.memory_space<vmem>>) attributes {dimension_semantics = [], scalar_prefetch = 0 : i64, scratch_operands = 0 : i64, tpu.core_type = #tpu.core_type<tc>} {
    %c0 = arith.constant 0 : index
    %c0_0 = arith.constant 0 : index
    %0 = vector.load %arg0[%c0, %c0_0] : memref<882x36xf32, #tpu.memory_space<vmem>>, vector<882x36xf32>
    %c0_1 = arith.constant 0 : index
    %c0_2 = arith.constant 0 : index
    %1 = vector.load %arg1[%c0_1, %c0_2] : memref<36x32xf32, #tpu.memory_space<vmem>>, vector<36x32xf32>
    %cst = arith.constant dense<0.000000e+00> : vector<882x32xf32>
    %2 = tpu.matmul %0, %1, %cst {dimension_numbers = #tpu.dot_dimension_numbers<[1], [0], [0], [1], [0, 0, 1, 1], [], []>} : vector<882x36xf32>, vector<36x32xf32>, vector<882x32xf32> -> vector<882x32xf32>
    %c0_3 = arith.constant 0 : index
    %c0_4 = arith.constant 0 : index
    %3 = vector.load %arg2[%c0_3, %c0_4] : memref<1x32xf32, #tpu.memory_space<vmem>>, vector<1x32xf32>
    %4 = vector.broadcast %3 : vector<1x32xf32> to vector<882x32xf32>
    %5 = arith.addf %2, %4 : vector<882x32xf32>
    %cst_5 = arith.constant 0.000000e+00 : f32
    %6 = vector.broadcast %cst_5 : f32 to vector<882x32xf32>
    %7 = arith.cmpf ogt, %5, %6 : vector<882x32xf32>
    %cst_6 = arith.constant 0.000000e+00 : f32
    %8 = vector.broadcast %cst_6 : f32 to vector<882x32xf32>
    %9 = arith.minimumf %5, %8 : vector<882x32xf32>
    %10 = math.exp %9 : vector<882x32xf32>
    %cst_7 = arith.constant 1.000000e+00 : f32
    %11 = vector.broadcast %cst_7 : f32 to vector<882x32xf32>
    %12 = arith.subf %10, %11 : vector<882x32xf32>
    %13 = arith.select %7, %5, %12 : vector<882x32xi1>, vector<882x32xf32>
    %c0_8 = arith.constant 0 : index
    %c0_9 = arith.constant 0 : index
    %14 = vector.load %arg3[%c0_8, %c0_9] : memref<882x32xf32, #tpu.memory_space<vmem>>, vector<882x32xf32>
    tpu.vector_store %arg3[%c0_8, %c0_9], %13 {strides = array<i32>} : memref<882x32xf32, #tpu.memory_space<vmem>>, vector<882x32xf32>,
    return
  }
}

module attributes {stable_mosaic.version = 11 : i64} {
  func.func @_conv_dense_kernel(%arg0: memref<242x288xf32, #tpu.memory_space<vmem>>, %arg1: memref<288x32xf32, #tpu.memory_space<vmem>>, %arg2: memref<1x32xf32, #tpu.memory_space<vmem>>, %arg3: memref<242x32xf32, #tpu.memory_space<vmem>>) attributes {dimension_semantics = [], scalar_prefetch = 0 : i64, scratch_operands = 0 : i64, tpu.core_type = #tpu.core_type<tc>} {
    %c0 = arith.constant 0 : index
    %c0_0 = arith.constant 0 : index
    %0 = vector.load %arg0[%c0, %c0_0] : memref<242x288xf32, #tpu.memory_space<vmem>>, vector<242x288xf32>
    %c0_1 = arith.constant 0 : index
    %c0_2 = arith.constant 0 : index
    %1 = vector.load %arg1[%c0_1, %c0_2] : memref<288x32xf32, #tpu.memory_space<vmem>>, vector<288x32xf32>
    %cst = arith.constant dense<0.000000e+00> : vector<242x32xf32>
    %2 = tpu.matmul %0, %1, %cst {dimension_numbers = #tpu.dot_dimension_numbers<[1], [0], [0], [1], [0, 0, 1, 1], [], []>} : vector<242x288xf32>, vector<288x32xf32>, vector<242x32xf32> -> vector<242x32xf32>
    %c0_3 = arith.constant 0 : index
    %c0_4 = arith.constant 0 : index
    %3 = vector.load %arg2[%c0_3, %c0_4] : memref<1x32xf32, #tpu.memory_space<vmem>>, vector<1x32xf32>
    %4 = vector.broadcast %3 : vector<1x32xf32> to vector<242x32xf32>
    %5 = arith.addf %2, %4 : vector<242x32xf32>
    %cst_5 = arith.constant 0.000000e+00 : f32
    %6 = vector.broadcast %cst_5 : f32 to vector<242x32xf32>
    %7 = arith.cmpf ogt, %5, %6 : vector<242x32xf32>
    %cst_6 = arith.constant 0.000000e+00 : f32
    %8 = vector.broadcast %cst_6 : f32 to vector<242x32xf32>
    %9 = arith.minimumf %5, %8 : vector<242x32xf32>
    %10 = math.exp %9 : vector<242x32xf32>
    %cst_7 = arith.constant 1.000000e+00 : f32
    %11 = vector.broadcast %cst_7 : f32 to vector<242x32xf32>
    %12 = arith.subf %10, %11 : vector<242x32xf32>
    %13 = arith.select %7, %5, %12 : vector<242x32xi1>, vector<242x32xf32>
    %c0_8 = arith.constant 0 : index
    %c0_9 = arith.constant 0 : index
    %14 = vector.load %arg3[%c0_8, %c0_9] : memref<242x32xf32, #tpu.memory_space<vmem>>, vector<242x32xf32>
    tpu.vector_store %arg3[%c0_8, %c0_9], %13 {strides = array<i32>} : memref<242x32xf32, #tpu.memory_space<vmem>>, vector<242x32xf32>,
    return
  }
}

module attributes {stable_mosaic.version = 11 : i64} {
  func.func @_conv_dense_kernel(%arg0: memref<72x288xf32, #tpu.memory_space<vmem>>, %arg1: memref<288x32xf32, #tpu.memory_space<vmem>>, %arg2: memref<1x32xf32, #tpu.memory_space<vmem>>, %arg3: memref<72x32xf32, #tpu.memory_space<vmem>>) attributes {dimension_semantics = [], scalar_prefetch = 0 : i64, scratch_operands = 0 : i64, tpu.core_type = #tpu.core_type<tc>} {
    %c0 = arith.constant 0 : index
    %c0_0 = arith.constant 0 : index
    %0 = vector.load %arg0[%c0, %c0_0] : memref<72x288xf32, #tpu.memory_space<vmem>>, vector<72x288xf32>
    %c0_1 = arith.constant 0 : index
    %c0_2 = arith.constant 0 : index
    %1 = vector.load %arg1[%c0_1, %c0_2] : memref<288x32xf32, #tpu.memory_space<vmem>>, vector<288x32xf32>
    %cst = arith.constant dense<0.000000e+00> : vector<72x32xf32>
    %2 = tpu.matmul %0, %1, %cst {dimension_numbers = #tpu.dot_dimension_numbers<[1], [0], [0], [1], [0, 0, 1, 1], [], []>} : vector<72x288xf32>, vector<288x32xf32>, vector<72x32xf32> -> vector<72x32xf32>
    %c0_3 = arith.constant 0 : index
    %c0_4 = arith.constant 0 : index
    %3 = vector.load %arg2[%c0_3, %c0_4] : memref<1x32xf32, #tpu.memory_space<vmem>>, vector<1x32xf32>
    %4 = vector.broadcast %3 : vector<1x32xf32> to vector<72x32xf32>
    %5 = arith.addf %2, %4 : vector<72x32xf32>
    %cst_5 = arith.constant 0.000000e+00 : f32
    %6 = vector.broadcast %cst_5 : f32 to vector<72x32xf32>
    %7 = arith.cmpf ogt, %5, %6 : vector<72x32xf32>
    %cst_6 = arith.constant 0.000000e+00 : f32
    %8 = vector.broadcast %cst_6 : f32 to vector<72x32xf32>
    %9 = arith.minimumf %5, %8 : vector<72x32xf32>
    %10 = math.exp %9 : vector<72x32xf32>
    %cst_7 = arith.constant 1.000000e+00 : f32
    %11 = vector.broadcast %cst_7 : f32 to vector<72x32xf32>
    %12 = arith.subf %10, %11 : vector<72x32xf32>
    %13 = arith.select %7, %5, %12 : vector<72x32xi1>, vector<72x32xf32>
    %c0_8 = arith.constant 0 : index
    %c0_9 = arith.constant 0 : index
    %14 = vector.load %arg3[%c0_8, %c0_9] : memref<72x32xf32, #tpu.memory_space<vmem>>, vector<72x32xf32>
    tpu.vector_store %arg3[%c0_8, %c0_9], %13 {strides = array<i32>} : memref<72x32xf32, #tpu.memory_space<vmem>>, vector<72x32xf32>,
    return
  }
}

module attributes {stable_mosaic.version = 11 : i64} {
  func.func @_conv_dense_kernel(%arg0: memref<18x288xf32, #tpu.memory_space<vmem>>, %arg1: memref<288x32xf32, #tpu.memory_space<vmem>>, %arg2: memref<1x32xf32, #tpu.memory_space<vmem>>, %arg3: memref<18x32xf32, #tpu.memory_space<vmem>>) attributes {dimension_semantics = [], scalar_prefetch = 0 : i64, scratch_operands = 0 : i64, tpu.core_type = #tpu.core_type<tc>} {
    %c0 = arith.constant 0 : index
    %c0_0 = arith.constant 0 : index
    %0 = vector.load %arg0[%c0, %c0_0] : memref<18x288xf32, #tpu.memory_space<vmem>>, vector<18x288xf32>
    %c0_1 = arith.constant 0 : index
    %c0_2 = arith.constant 0 : index
    %1 = vector.load %arg1[%c0_1, %c0_2] : memref<288x32xf32, #tpu.memory_space<vmem>>, vector<288x32xf32>
    %cst = arith.constant dense<0.000000e+00> : vector<18x32xf32>
    %2 = tpu.matmul %0, %1, %cst {dimension_numbers = #tpu.dot_dimension_numbers<[1], [0], [0], [1], [0, 0, 1, 1], [], []>} : vector<18x288xf32>, vector<288x32xf32>, vector<18x32xf32> -> vector<18x32xf32>
    %c0_3 = arith.constant 0 : index
    %c0_4 = arith.constant 0 : index
    %3 = vector.load %arg2[%c0_3, %c0_4] : memref<1x32xf32, #tpu.memory_space<vmem>>, vector<1x32xf32>
    %4 = vector.broadcast %3 : vector<1x32xf32> to vector<18x32xf32>
    %5 = arith.addf %2, %4 : vector<18x32xf32>
    %cst_5 = arith.constant 0.000000e+00 : f32
    %6 = vector.broadcast %cst_5 : f32 to vector<18x32xf32>
    %7 = arith.cmpf ogt, %5, %6 : vector<18x32xf32>
    %cst_6 = arith.constant 0.000000e+00 : f32
    %8 = vector.broadcast %cst_6 : f32 to vector<18x32xf32>
    %9 = arith.minimumf %5, %8 : vector<18x32xf32>
    %10 = math.exp %9 : vector<18x32xf32>
    %cst_7 = arith.constant 1.000000e+00 : f32
    %11 = vector.broadcast %cst_7 : f32 to vector<18x32xf32>
    %12 = arith.subf %10, %11 : vector<18x32xf32>
    %13 = arith.select %7, %5, %12 : vector<18x32xi1>, vector<18x32xf32>
    %c0_8 = arith.constant 0 : index
    %c0_9 = arith.constant 0 : index
    %14 = vector.load %arg3[%c0_8, %c0_9] : memref<18x32xf32, #tpu.memory_space<vmem>>, vector<18x32xf32>
    tpu.vector_store %arg3[%c0_8, %c0_9], %13 {strides = array<i32>} : memref<18x32xf32, #tpu.memory_space<vmem>>, vector<18x32xf32>,
    return
  }
}

module attributes {stable_mosaic.version = 11 : i64} {
  func.func @_head_loss_kernel(%arg0: memref<1x576xf32, #tpu.memory_space<vmem>>, %arg1: memref<1x294xf32, #tpu.memory_space<vmem>>, %arg2: memref<1x288xf32, #tpu.memory_space<vmem>>, %arg3: memref<1x6xf32, #tpu.memory_space<vmem>>, %arg4: memref<576x256xf32, #tpu.memory_space<vmem>>, %arg5: memref<1x256xf32, #tpu.memory_space<vmem>>, %arg6: memref<256x6xf32, #tpu.memory_space<vmem>>, %arg7: memref<1x6xf32, #tpu.memory_space<vmem>>, %arg8: memref<294x256xf32, #tpu.memory_space<vmem>>, %arg9: memref<1x256xf32, #tpu.memory_space<vmem>>, %arg10: memref<256x288xf32, #tpu.memory_space<vmem>>, %arg11: memref<1x288xf32, #tpu.memory_space<vmem>>, %arg12: memref<1x128xf32, #tpu.memory_space<vmem>>) attributes {dimension_semantics = [], scalar_prefetch = 0 : i64, scratch_operands = 0 : i64, tpu.core_type = #tpu.core_type<tc>} {
    %c0 = arith.constant 0 : index
    %c0_0 = arith.constant 0 : index
    %0 = vector.load %arg0[%c0, %c0_0] : memref<1x576xf32, #tpu.memory_space<vmem>>, vector<1x576xf32>
    %c0_1 = arith.constant 0 : index
    %c0_2 = arith.constant 0 : index
    %1 = vector.load %arg4[%c0_1, %c0_2] : memref<576x256xf32, #tpu.memory_space<vmem>>, vector<576x256xf32>
    %cst = arith.constant dense<0.000000e+00> : vector<1x256xf32>
    %2 = tpu.matmul %0, %1, %cst {dimension_numbers = #tpu.dot_dimension_numbers<[1], [0], [0], [1], [0, 0, 1, 1], [], []>} : vector<1x576xf32>, vector<576x256xf32>, vector<1x256xf32> -> vector<1x256xf32>
    %c0_3 = arith.constant 0 : index
    %c0_4 = arith.constant 0 : index
    %3 = vector.load %arg5[%c0_3, %c0_4] : memref<1x256xf32, #tpu.memory_space<vmem>>, vector<1x256xf32>
    %4 = arith.addf %2, %3 : vector<1x256xf32>
    %cst_5 = arith.constant 0.000000e+00 : f32
    %5 = vector.broadcast %cst_5 : f32 to vector<1x256xf32>
    %6 = arith.cmpf ogt, %4, %5 : vector<1x256xf32>
    %cst_6 = arith.constant 0.000000e+00 : f32
    %7 = vector.broadcast %cst_6 : f32 to vector<1x256xf32>
    %8 = arith.minimumf %4, %7 : vector<1x256xf32>
    %9 = math.exp %8 : vector<1x256xf32>
    %cst_7 = arith.constant 1.000000e+00 : f32
    %10 = vector.broadcast %cst_7 : f32 to vector<1x256xf32>
    %11 = arith.subf %9, %10 : vector<1x256xf32>
    %12 = arith.select %6, %4, %11 : vector<1x256xi1>, vector<1x256xf32>
    %c0_8 = arith.constant 0 : index
    %c0_9 = arith.constant 0 : index
    %13 = vector.load %arg6[%c0_8, %c0_9] : memref<256x6xf32, #tpu.memory_space<vmem>>, vector<256x6xf32>
    %cst_10 = arith.constant dense<0.000000e+00> : vector<1x6xf32>
    %14 = tpu.matmul %12, %13, %cst_10 {dimension_numbers = #tpu.dot_dimension_numbers<[1], [0], [0], [1], [0, 0, 1, 1], [], []>} : vector<1x256xf32>, vector<256x6xf32>, vector<1x6xf32> -> vector<1x6xf32>
    %c0_11 = arith.constant 0 : index
    %c0_12 = arith.constant 0 : index
    %15 = vector.load %arg7[%c0_11, %c0_12] : memref<1x6xf32, #tpu.memory_space<vmem>>, vector<1x6xf32>
    %16 = arith.addf %14, %15 : vector<1x6xf32>
    %c0_13 = arith.constant 0 : index
    %c0_14 = arith.constant 0 : index
    %17 = vector.load %arg1[%c0_13, %c0_14] : memref<1x294xf32, #tpu.memory_space<vmem>>, vector<1x294xf32>
    %c0_15 = arith.constant 0 : index
    %c0_16 = arith.constant 0 : index
    %18 = vector.load %arg8[%c0_15, %c0_16] : memref<294x256xf32, #tpu.memory_space<vmem>>, vector<294x256xf32>
    %cst_17 = arith.constant dense<0.000000e+00> : vector<1x256xf32>
    %19 = tpu.matmul %17, %18, %cst_17 {dimension_numbers = #tpu.dot_dimension_numbers<[1], [0], [0], [1], [0, 0, 1, 1], [], []>} : vector<1x294xf32>, vector<294x256xf32>, vector<1x256xf32> -> vector<1x256xf32>
    %c0_18 = arith.constant 0 : index
    %c0_19 = arith.constant 0 : index
    %20 = vector.load %arg9[%c0_18, %c0_19] : memref<1x256xf32, #tpu.memory_space<vmem>>, vector<1x256xf32>
    %21 = arith.addf %19, %20 : vector<1x256xf32>
    %cst_20 = arith.constant 0.000000e+00 : f32
    %22 = vector.broadcast %cst_20 : f32 to vector<1x256xf32>
    %23 = arith.cmpf ogt, %21, %22 : vector<1x256xf32>
    %cst_21 = arith.constant 0.000000e+00 : f32
    %24 = vector.broadcast %cst_21 : f32 to vector<1x256xf32>
    %25 = arith.minimumf %21, %24 : vector<1x256xf32>
    %26 = math.exp %25 : vector<1x256xf32>
    %cst_22 = arith.constant 1.000000e+00 : f32
    %27 = vector.broadcast %cst_22 : f32 to vector<1x256xf32>
    %28 = arith.subf %26, %27 : vector<1x256xf32>
    %29 = arith.select %23, %21, %28 : vector<1x256xi1>, vector<1x256xf32>
    %c0_23 = arith.constant 0 : index
    %c0_24 = arith.constant 0 : index
    %30 = vector.load %arg10[%c0_23, %c0_24] : memref<256x288xf32, #tpu.memory_space<vmem>>, vector<256x288xf32>
    %cst_25 = arith.constant dense<0.000000e+00> : vector<1x288xf32>
    %31 = tpu.matmul %29, %30, %cst_25 {dimension_numbers = #tpu.dot_dimension_numbers<[1], [0], [0], [1], [0, 0, 1, 1], [], []>} : vector<1x256xf32>, vector<256x288xf32>, vector<1x288xf32> -> vector<1x288xf32>
    %c0_26 = arith.constant 0 : index
    %c0_27 = arith.constant 0 : index
    %32 = vector.load %arg11[%c0_26, %c0_27] : memref<1x288xf32, #tpu.memory_space<vmem>>, vector<1x288xf32>
    %33 = arith.addf %31, %32 : vector<1x288xf32>
    %c0_28 = arith.constant 0 : index
    %c0_29 = arith.constant 0 : index
    %34 = vector.load %arg2[%c0_28, %c0_29] : memref<1x288xf32, #tpu.memory_space<vmem>>, vector<1x288xf32>
    %35 = arith.subf %34, %33 : vector<1x288xf32>
    %36 = arith.mulf %35, %35 : vector<1x288xf32>
    %cst_30 = arith.constant dense<0.000000e+00> : vector<1xf32>
    %37 = vector.multi_reduction <add>, %36, %cst_30 [1] : vector<1x288xf32> to vector<1xf32>
    %38 = vector.shape_cast %37 : vector<1xf32> to vector<1x1xf32>
    %cst_31 = arith.constant 0.00347222225 : f32
    %39 = vector.broadcast %cst_31 : f32 to vector<1x1xf32>
    %40 = arith.mulf %38, %39 : vector<1x1xf32>
    %cst_32 = arith.constant dense<0xFF800000> : vector<1xf32>
    %41 = vector.multi_reduction <maximumf>, %16, %cst_32 [1] : vector<1x6xf32> to vector<1xf32>
    %42 = vector.shape_cast %41 : vector<1xf32> to vector<1x1xf32>
    %43 = vector.broadcast %42 : vector<1x1xf32> to vector<1x6xf32>
    %44 = arith.subf %16, %43 : vector<1x6xf32>
    %45 = math.exp %44 : vector<1x6xf32>
    %cst_33 = arith.constant dense<0.000000e+00> : vector<1xf32>
    %46 = vector.multi_reduction <add>, %45, %cst_33 [1] : vector<1x6xf32> to vector<1xf32>
    %47 = vector.shape_cast %46 : vector<1xf32> to vector<1x1xf32>
    %48 = math.log %47 : vector<1x1xf32>
    %49 = arith.addf %48, %42 : vector<1x1xf32>
    %c0_34 = arith.constant 0 : index
    %c0_35 = arith.constant 0 : index
    %50 = vector.load %arg3[%c0_34, %c0_35] : memref<1x6xf32, #tpu.memory_space<vmem>>, vector<1x6xf32>
    %51 = vector.broadcast %49 : vector<1x1xf32> to vector<1x6xf32>
    %52 = arith.subf %51, %16 : vector<1x6xf32>
    %53 = arith.mulf %50, %52 : vector<1x6xf32>
    %cst_36 = arith.constant dense<0.000000e+00> : vector<1xf32>
    %54 = vector.multi_reduction <add>, %53, %cst_36 [1] : vector<1x6xf32> to vector<1xf32>
    %55 = vector.shape_cast %54 : vector<1xf32> to vector<1x1xf32>
    %cst_37 = arith.constant 8.000000e-01 : f32
    %56 = vector.broadcast %cst_37 : f32 to vector<1x1xf32>
    %57 = arith.mulf %56, %55 : vector<1x1xf32>
    %cst_38 = arith.constant 2.000000e-01 : f32
    %58 = vector.broadcast %cst_38 : f32 to vector<1x1xf32>
    %59 = arith.mulf %58, %40 : vector<1x1xf32>
    %60 = arith.addf %57, %59 : vector<1x1xf32>
    %61 = tpu.iota {dimensions = array<i32: 1>} : vector<1x128xi32>
    %c0_i32 = arith.constant 0 : i32
    %62 = vector.broadcast %c0_i32 : i32 to vector<1x128xi32>
    %63 = arith.cmpi eq, %61, %62 : vector<1x128xi32>
    %cst_39 = arith.constant 0.000000e+00 : f32
    %64 = vector.shape_cast %40 : vector<1x1xf32> to vector<1x1xf32>
    %65 = vector.broadcast %64 : vector<1x1xf32> to vector<1x128xf32>
    %66 = vector.broadcast %cst_39 : f32 to vector<1x128xf32>
    %67 = arith.select %63, %65, %66 : vector<1x128xi1>, vector<1x128xf32>
    %c1_i32 = arith.constant 1 : i32
    %68 = vector.broadcast %c1_i32 : i32 to vector<1x128xi32>
    %69 = arith.cmpi eq, %61, %68 : vector<1x128xi32>
    %cst_40 = arith.constant 0.000000e+00 : f32
    %70 = vector.shape_cast %60 : vector<1x1xf32> to vector<1x1xf32>
    %71 = vector.broadcast %70 : vector<1x1xf32> to vector<1x128xf32>
    %72 = vector.broadcast %cst_40 : f32 to vector<1x128xf32>
    %73 = arith.select %69, %71, %72 : vector<1x128xi1>, vector<1x128xf32>
    %74 = arith.addf %67, %73 : vector<1x128xf32>
    %c2_i32 = arith.constant 2 : i32
    %75 = vector.broadcast %c2_i32 : i32 to vector<1x128xi32>
    %76 = arith.cmpi eq, %61, %75 : vector<1x128xi32>
    %cst_41 = arith.constant 0.000000e+00 : f32
    %77 = vector.shape_cast %55 : vector<1x1xf32> to vector<1x1xf32>
    %78 = vector.broadcast %77 : vector<1x1xf32> to vector<1x128xf32>
    %79 = vector.broadcast %cst_41 : f32 to vector<1x128xf32>
    %80 = arith.select %76, %78, %79 : vector<1x128xi1>, vector<1x128xf32>
    %81 = arith.addf %74, %80 : vector<1x128xf32>
    %c0_42 = arith.constant 0 : index
    %c0_43 = arith.constant 0 : index
    %82 = vector.load %arg12[%c0_42, %c0_43] : memref<1x128xf32, #tpu.memory_space<vmem>>, vector<1x128xf32>
    tpu.vector_store %arg12[%c0_42, %c0_43], %81 {strides = array<i32>} : memref<1x128xf32, #tpu.memory_space<vmem>>, vector<1x128xf32>,
    return
  }
}

</mosaic_0001>

<bundles_post_ra>
// kernel: icm_forward.5
= control target key start
LH: loop header
LB: loop body
LE: loop exit
PB: predicated region body
PF: predicated region fallthrough
CT: control target
= control target key end

     0   :  { %v2800_v0 = vmov 0.0|0.0   ;;  %vm2801_vm0 = vmmov 0   ;;  %v2802_v6 = vmov 0.0   ;;  %vm471_vm1 = vcmask 1043456   ;;  %s4625_s1 = inlined_call_operand.vmem [shape: f32[36,32], index: 1, kind: input, shape index: {}]   ;;  %s4626_s0 = inlined_call_operand.vmem [shape: f32[882,36], index: 0, kind: input, shape index: {}]   ;;  %s4627_s2 = inlined_call_operand.vmem [shape: f32[1,32], index: 2, kind: input, shape index: {}]   ;;  %s4628_s3 = inlined_call_operand.vmem [shape: f32[882,32], index: 3, kind: output, shape index: {}]  }
   0x1   :  { %2561 = vmatprep.subr.bf16.mxu0 %v2800_v0  ;;  %2567 = vmatprep.subr.bf16.mxu1 %v2800_v0  ;;  %v125_v1 = vld [vmem:[%s4625_s1] sm:$0xff]  ;;  %v126_v2 = vld [vmem:[%s4625_s1 + $0x8] sm:$0xff]  ;;  %v127_v3 = vld [vmem:[%s4625_s1 + $0x10] sm:$0xff]  ;;  %vm137_vm2 = vcmask 293888   ;;  %vm1761_vm3 = vcmask 261120  }
   0x2   :  { %v2562_v4 = vpack.c.bf16 %v126_v2, %v125_v1  ;;  %v128_v5 = vld [vmem:[%s4625_s1 + $0x18] sm:$0xff]  ;;  %2228 = vmatprep.mubr.msk.f32.mxu0 %vm2801_vm0, %v2802_v6  ;;  %2396 = vmatprep.mubr.msk.f32.mxu1 %vm2801_vm0, %v2802_v6  ;;  %v129_v8 = vld [vmem:[%s4625_s1 + $0x20] sm:$0xf]  ;;  %v15_v11 = vld [vmem:[%s4626_s0 + $0x8] sm:$0xff] }
   0x3   :  { %v2565_v7 = vpack.c.bf16 %v128_v5, %v127_v3  ;;  %v14_v9 = vld [vmem:[%s4626_s0] sm:$0xff]  ;;  %v71_v12 = vld [vmem:[%s4626_s0 + $0x1c8] sm:$0xff]  ;;  %v16_v13 = vld [vmem:[%s4626_s0 + $0x10] sm:$0xff] }
   0x4   :  { %2563 = vmatpush3.bf16.msra.mxu0 %v2562_v4  ;;  %2570 = vmatpush3.bf16.msra.mxu1 %v2562_v4  ;;  %v70_v10 = vld [vmem:[%s4626_s0 + $0x1c0] sm:$0xff]  ;;  %v72_v14 = vld [vmem:[%s4626_s0 + $0x1d0] sm:$0xff]  ;;  %v17_v15 = vld [vmem:[%s4626_s0 + $0x18] sm:$0xff] }
   0x5   :  { %2564 = vmatprep.subr.bf16.mxu0 %v2800_v0  ;;  %2568 = vmatprep.subr.bf16.mxu1 %v2800_v0  ;;  %v73_v16 = vld [vmem:[%s4626_s0 + $0x1d8] sm:$0xff]  ;;  %v18_v17 = vld [vmem:[%s4626_s0 + $0x20] sm:$0xff]  ;;  %v19_v19 = vld [vmem:[%s4626_s0 + $0x28] sm:$0xff] }
   0x6   :  { %v74_v18 = vld [vmem:[%s4626_s0 + $0x1e0] sm:$0xff]  ;;  %v75_v20 = vld [vmem:[%s4626_s0 + $0x1e8] sm:$0xff]  ;;  %v20_v21 = vld [vmem:[%s4626_s0 + $0x30] sm:$0xff] }
   0x7   :  { %v76_v22 = vld [vmem:[%s4626_s0 + $0x1f0] sm:$0xff]  ;;  %v21_v23 = vld [vmem:[%s4626_s0 + $0x38] sm:$0xff]  ;;  %v22_v25 = vld [vmem:[%s4626_s0 + $0x40] sm:$0xff] }
   0x8   :  { %2566 = vmatpush3.bf16.msra.mxu0 %v2565_v7  ;;  %2571 = vmatpush3.bf16.msra.mxu1 %v2565_v7  ;;  %v77_v24 = vld [vmem:[%s4626_s0 + $0x1f8] sm:$0xff]  ;;  %v78_v26 = vld [vmem:[%s4626_s0 + $0x200] sm:$0xff]  ;;  %v23_v27 = vld [vmem:[%s4626_s0 + $0x48] sm:$0xff] }
   0x9   :  { %2226 = vmatprep.subr.mxu0 %v2802_v6  ;;  %2569 = vmatprep.subr.mxu1 %v2802_v6  ;;  %v79_v28 = vld [vmem:[%s4626_s0 + $0x208] sm:$0xff]  ;;  %v24_v29 = vld [vmem:[%s4626_s0 + $0x50] sm:$0xff]  ;;  %v25_v31 = vld [vmem:[%s4626_s0 + $0x58] sm:$0xff] }
   0xa   :  { %v80_v30 = vld [vmem:[%s4626_s0 + $0x210] sm:$0xff]  ;;  %v81_v32 = vld [vmem:[%s4626_s0 + $0x218] sm:$0xff]  ;;  %v26_v33 = vld [vmem:[%s4626_s0 + $0x60] sm:$0xff] }
   0xb   :  { %v82_v34 = vld [vmem:[%s4626_s0 + $0x220] sm:$0xff]  ;;  %v27_v35 = vld [vmem:[%s4626_s0 + $0x68] sm:$0xff]  ;;  %v28_v37 = vld [vmem:[%s4626_s0 + $0x70] sm:$0xff] }
   0xc   :  { %2227 = vmatpush3.msk.msra.mxu0 %vm471_vm1, %v129_v8  ;;  %2572 = vmatpush3.msk.msra.mxu1 %vm471_vm1, %v129_v8  ;;  %v83_v36 = vld [vmem:[%s4626_s0 + $0x228] sm:$0xff]  ;;  %v84_v38 = vld [vmem:[%s4626_s0 + $0x230] sm:$0xff]  ;;  %v29_v39 = vld [vmem:[%s4626_s0 + $0x78] sm:$0xff] }
   0xd   :  { %2229 = vmatmul.mubr.msk.f32.vlgmr.msra.gmra.mrb[0].mxu0 %vm137_vm2, %v14_v9  ;;  %2397 = vmatmul.mubr.msk.f32.vlgmr.msra.gmra.mrb[0].mxu1 %vm137_vm2, %v70_v10  ;;  %v85_v40 = vld [vmem:[%s4626_s0 + $0x238] sm:$0xff]  ;;  %v30_v41 = vld [vmem:[%s4626_s0 + $0x80] sm:$0xff]  ;;  %v31_v43 = vld [vmem:[%s4626_s0 + $0x88] sm:$0xff] }
   0xe   :  { %2231 = vmatprep.mubr.msk.f32.mxu0 %vm2801_vm0, %v2802_v6  ;;  %2399 = vmatprep.mubr.msk.f32.mxu1 %vm2801_vm0, %v2802_v6  ;;  %v86_v42 = vld [vmem:[%s4626_s0 + $0x240] sm:$0xff]  ;;  %v87_v44 = vld [vmem:[%s4626_s0 + $0x248] sm:$0xff]  ;;  %v32_v45 = vld [vmem:[%s4626_s0 + $0x90] sm:$0xff] }
   0xf   :  { %v88_v46 = vld [vmem:[%s4626_s0 + $0x250] sm:$0xff]  ;;  %v33_v47 = vld [vmem:[%s4626_s0 + $0x98] sm:$0xff]  ;;  %v34_v49 = vld [vmem:[%s4626_s0 + $0xa0] sm:$0xff] }
  0x10   :  { %v89_v48 = vld [vmem:[%s4626_s0 + $0x258] sm:$0xff]  ;;  %v90_v50 = vld [vmem:[%s4626_s0 + $0x260] sm:$0xff]  ;;  %v35_v51 = vld [vmem:[%s4626_s0 + $0xa8] sm:$0xff] }
  0x11   :  { %2232 = vmatmul.mubr.msk.f32.gmra.mrb[2].mxu0 %vm137_vm2, %v15_v11  ;;  %2400 = vmatmul.mubr.msk.f32.gmra.mrb[2].mxu1 %vm137_vm2, %v71_v12  ;;  %v91_v52 = vld [vmem:[%s4626_s0 + $0x268] sm:$0xff]  ;;  %v36_v53 = vld [vmem:[%s4626_s0 + $0xb0] sm:$0xff]  ;;  %v37_v55 = vld [vmem:[%s4626_s0 + $0xb8] sm:$0xff] }
  0x12   :  { %2234 = vmatprep.mubr.msk.f32.mxu0 %vm2801_vm0, %v2802_v6  ;;  %2402 = vmatprep.mubr.msk.f32.mxu1 %vm2801_vm0, %v2802_v6  ;;  %v92_v54 = vld [vmem:[%s4626_s0 + $0x270] sm:$0xff]  ;;  %v93_v56 = vld [vmem:[%s4626_s0 + $0x278] sm:$0xff]  ;;  %v38_v57 = vld [vmem:[%s4626_s0 + $0xc0] sm:$0xff] }
  0x13   :  { %v94_v58 = vld [vmem:[%s4626_s0 + $0x280] sm:$0xff]  ;;  %v39_v59 = vld [vmem:[%s4626_s0 + $0xc8] sm:$0xff]  ;;  %v40_v61 = vld [vmem:[%s4626_s0 + $0xd0] sm:$0xff] }
  0x14   :  { %v95_v60 = vld [vmem:[%s4626_s0 + $0x288] sm:$0xff]  ;;  %v96_v62 = vld [vmem:[%s4626_s0 + $0x290] sm:$0xff]  ;;  %v41_v63 = vld [vmem:[%s4626_s0 + $0xd8] sm:$0xff] }
  0x15   :  { %2235 = vmatmul.mubr.msk.f32.gmra.mrb[4].mxu0 %vm137_vm2, %v16_v13  ;;  %2403 = vmatmul.mubr.msk.f32.gmra.mrb[4].mxu1 %vm137_vm2, %v72_v14  ;;  %v97_v0 = vld [vmem:[%s4626_s0 + $0x298] sm:$0xff]  ;;  %v42_v1 = vld [vmem:[%s4626_s0 + $0xe0] sm:$0xff]  ;;  %v43_v3 = vld [vmem:[%s4626_s0 + $0xe8] sm:$0xff] }
  0x16   :  { %2237 = vmatprep.mubr.msk.f32.mxu0 %vm2801_vm0, %v2802_v6  ;;  %2405 = vmatprep.mubr.msk.f32.mxu1 %vm2801_vm0, %v2802_v6  ;;  %v98_v2 = vld [vmem:[%s4626_s0 + $0x2a0] sm:$0xff]  ;;  %v99_v4 = vld [vmem:[%s4626_s0 + $0x2a8] sm:$0xff]  ;;  %v44_v5 = vld [vmem:[%s4626_s0 + $0xf0] sm:$0xff] }
  0x17   :  { %v100_v7 = vld [vmem:[%s4626_s0 + $0x2b0] sm:$0xff]  ;;  %v45_v8 = vld [vmem:[%s4626_s0 + $0xf8] sm:$0xff]  ;;  %v46_v10 = vld [vmem:[%s4626_s0 + $0x100] sm:$0xff] }
  0x18   :  { %v101_v9 = vld [vmem:[%s4626_s0 + $0x2b8] sm:$0xff]  ;;  %v102_v11 = vld [vmem:[%s4626_s0 + $0x2c0] sm:$0xff]  ;;  %v47_v12 = vld [vmem:[%s4626_s0 + $0x108] sm:$0xff] }
  0x19   :  { %2238 = vmatmul.mubr.msk.f32.gmra.mrb[6].mxu0 %vm137_vm2, %v17_v15  ;;  %2406 = vmatmul.mubr.msk.f32.gmra.mrb[6].mxu1 %vm137_vm2, %v73_v16  ;;  %v103_v13 = vld [vmem:[%s4626_s0 + $0x2c8] sm:$0xff]  ;;  %v48_v14 = vld [vmem:[%s4626_s0 + $0x110] sm:$0xff]  ;;  %v49_v16 = vld [vmem:[%s4626_s0 + $0x118] sm:$0xff] }
  0x1a   :  { %2240 = vmatprep.mubr.msk.f32.mxu0 %vm2801_vm0, %v2802_v6  ;;  %2408 = vmatprep.mubr.msk.f32.mxu1 %vm2801_vm0, %v2802_v6  ;;  %v104_v15 = vld [vmem:[%s4626_s0 + $0x2d0] sm:$0xff] }
  0x1d   :  { %2241 = vmatmul.mubr.msk.f32.gmra.mrb[8].mxu0 %vm137_vm2, %v18_v17  ;;  %2409 = vmatmul.mubr.msk.f32.gmra.mrb[8].mxu1 %vm137_vm2, %v74_v18  ;;  %v105_v17 = vld [vmem:[%s4626_s0 + $0x2d8] sm:$0xff]  ;;  %v50_v18 = vld [vmem:[%s4626_s0 + $0x120] sm:$0xff] }
  0x1e   :  { %2243 = vmatprep.mubr.msk.f32.mxu0 %vm2801_vm0, %v2802_v6  ;;  %2411 = vmatprep.mubr.msk.f32.mxu1 %vm2801_vm0, %v2802_v6 }
  0x21   :  { %2244 = vmatmul.mubr.msk.f32.gmra.mrb[10].mxu0 %vm137_vm2, %v19_v19  ;;  %2412 = vmatmul.mubr.msk.f32.gmra.mrb[10].mxu1 %vm137_vm2, %v75_v20  ;;  %v106_v19 = vld [vmem:[%s4626_s0 + $0x2e0] sm:$0xff]  ;;  %v51_v20 = vld [vmem:[%s4626_s0 + $0x128] sm:$0xff] }
  0x22   :  { %2246 = vmatprep.mubr.msk.f32.mxu0 %vm2801_vm0, %v2802_v6  ;;  %2414 = vmatprep.mubr.msk.f32.mxu1 %vm2801_vm0, %v2802_v6 }
  0x25   :  { %2247 = vmatmul.mubr.msk.f32.gmra.mrb[12].mxu0 %vm137_vm2, %v20_v21  ;;  %2415 = vmatmul.mubr.msk.f32.gmra.mrb[12].mxu1 %vm137_vm2, %v76_v22  ;;  %v107_v21 = vld [vmem:[%s4626_s0 + $0x2e8] sm:$0xff]  ;;  %v52_v22 = vld [vmem:[%s4626_s0 + $0x130] sm:$0xff] }
  0x26   :  { %2249 = vmatprep.mubr.msk.f32.mxu0 %vm2801_vm0, %v2802_v6  ;;  %2417 = vmatprep.mubr.msk.f32.mxu1 %vm2801_vm0, %v2802_v6 }
  0x29   :  { %2250 = vmatmul.mubr.msk.f32.gmra.mrb[14].mxu0 %vm137_vm2, %v21_v23  ;;  %2418 = vmatmul.mubr.msk.f32.gmra.mrb[14].mxu1 %vm137_vm2, %v77_v24  ;;  %v108_v23 = vld [vmem:[%s4626_s0 + $0x2f0] sm:$0xff]  ;;  %v53_v24 = vld [vmem:[%s4626_s0 + $0x138] sm:$0xff] }
  0x2a   :  { %2252 = vmatprep.mubr.msk.f32.mxu0 %vm2801_vm0, %v2802_v6  ;;  %2420 = vmatprep.mubr.msk.f32.mxu1 %vm2801_vm0, %v2802_v6 }
  0x2d   :  { %2253 = vmatmul.mubr.msk.f32.gmra.mrb[16].mxu0 %vm137_vm2, %v22_v25  ;;  %2421 = vmatmul.mubr.msk.f32.gmra.mrb[16].mxu1 %vm137_vm2, %v78_v26  ;;  %v109_v25 = vld [vmem:[%s4626_s0 + $0x2f8] sm:$0xff]  ;;  %v54_v26 = vld [vmem:[%s4626_s0 + $0x140] sm:$0xff] }
  0x2e   :  { %2255 = vmatprep.mubr.msk.f32.mxu0 %vm2801_vm0, %v2802_v6  ;;  %2423 = vmatprep.mubr.msk.f32.mxu1 %vm2801_vm0, %v2802_v6 }
  0x31   :  { %2256 = vmatmul.mubr.msk.f32.gmra.mrb[18].mxu0 %vm137_vm2, %v23_v27  ;;  %2424 = vmatmul.mubr.msk.f32.gmra.mrb[18].mxu1 %vm137_vm2, %v79_v28  ;;  %v110_v27 = vld [vmem:[%s4626_s0 + $0x300] sm:$0xff]  ;;  %v55_v28 = vld [vmem:[%s4626_s0 + $0x148] sm:$0xff] }
  0x32   :  { %2258 = vmatprep.mubr.msk.f32.mxu0 %vm2801_vm0, %v2802_v6  ;;  %2426 = vmatprep.mubr.msk.f32.mxu1 %vm2801_vm0, %v2802_v6 }
  0x35   :  { %2259 = vmatmul.mubr.msk.f32.gmra.mrb[20].mxu0 %vm137_vm2, %v24_v29  ;;  %2427 = vmatmul.mubr.msk.f32.gmra.mrb[20].mxu1 %vm137_vm2, %v80_v30  ;;  %v111_v29 = vld [vmem:[%s4626_s0 + $0x308] sm:$0xff]  ;;  %v56_v30 = vld [vmem:[%s4626_s0 + $0x150] sm:$0xff] }
  0x36   :  { %2261 = vmatprep.mubr.msk.f32.mxu0 %vm2801_vm0, %v2802_v6  ;;  %2429 = vmatprep.mubr.msk.f32.mxu1 %vm2801_vm0, %v2802_v6 }
  0x39   :  { %2262 = vmatmul.mubr.msk.f32.gmra.mrb[22].mxu0 %vm137_vm2, %v25_v31  ;;  %2430 = vmatmul.mubr.msk.f32.gmra.mrb[22].mxu1 %vm137_vm2, %v81_v32  ;;  %v112_v31 = vld [vmem:[%s4626_s0 + $0x310] sm:$0xff]  ;;  %v57_v32 = vld [vmem:[%s4626_s0 + $0x158] sm:$0xff] }
  0x3a   :  { %2264 = vmatprep.mubr.msk.f32.mxu0 %vm2801_vm0, %v2802_v6  ;;  %2432 = vmatprep.mubr.msk.f32.mxu1 %vm2801_vm0, %v2802_v6 }
  0x3d   :  { %2265 = vmatmul.mubr.msk.f32.gmra.mrb[24].mxu0 %vm137_vm2, %v26_v33  ;;  %2433 = vmatmul.mubr.msk.f32.gmra.mrb[24].mxu1 %vm137_vm2, %v82_v34  ;;  %v113_v33 = vld [vmem:[%s4626_s0 + $0x318] sm:$0xff]  ;;  %v58_v34 = vld [vmem:[%s4626_s0 + $0x160] sm:$0xff] }
  0x3e   :  { %2267 = vmatprep.mubr.msk.f32.mxu0 %vm2801_vm0, %v2802_v6  ;;  %2435 = vmatprep.mubr.msk.f32.mxu1 %vm2801_vm0, %v2802_v6 }
  0x41   :  { %2268 = vmatmul.mubr.msk.f32.gmra.mrb[26].mxu0 %vm137_vm2, %v27_v35  ;;  %2436 = vmatmul.mubr.msk.f32.gmra.mrb[26].mxu1 %vm137_vm2, %v83_v36  ;;  %v114_v35 = vld [vmem:[%s4626_s0 + $0x320] sm:$0xff]  ;;  %v59_v36 = vld [vmem:[%s4626_s0 + $0x168] sm:$0xff] }
  0x42   :  { %2270 = vmatprep.mubr.msk.f32.mxu0 %vm2801_vm0, %v2802_v6  ;;  %2438 = vmatprep.mubr.msk.f32.mxu1 %vm2801_vm0, %v2802_v6 }
  0x45   :  { %2271 = vmatmul.mubr.msk.f32.gmra.mrb[28].mxu0 %vm137_vm2, %v28_v37  ;;  %2439 = vmatmul.mubr.msk.f32.gmra.mrb[28].mxu1 %vm137_vm2, %v84_v38  ;;  %v115_v37 = vld [vmem:[%s4626_s0 + $0x328] sm:$0xff]  ;;  %v60_v38 = vld [vmem:[%s4626_s0 + $0x170] sm:$0xff] }
  0x46   :  { %2273 = vmatprep.mubr.msk.f32.mxu0 %vm2801_vm0, %v2802_v6  ;;  %2441 = vmatprep.mubr.msk.f32.mxu1 %vm2801_vm0, %v2802_v6 }
  0x49   :  { %2274 = vmatmul.mubr.msk.f32.gmra.mrb[30].mxu0 %vm137_vm2, %v29_v39  ;;  %2442 = vmatmul.mubr.msk.f32.gmra.mrb[30].mxu1 %vm137_vm2, %v85_v40  ;;  %v116_v39 = vld [vmem:[%s4626_s0 + $0x330] sm:$0xff]  ;;  %v61_v40 = vld [vmem:[%s4626_s0 + $0x178] sm:$0xff] }
  0x4a   :  { %2276 = vmatprep.mubr.msk.f32.mxu0 %vm2801_vm0, %v2802_v6  ;;  %2444 = vmatprep.mubr.msk.f32.mxu1 %vm2801_vm0, %v2802_v6 }
  0x4d   :  { %2277 = vmatmul.mubr.msk.f32.gmra.mrb[32].mxu0 %vm137_vm2, %v30_v41  ;;  %2445 = vmatmul.mubr.msk.f32.gmra.mrb[32].mxu1 %vm137_vm2, %v86_v42  ;;  %v117_v41 = vld [vmem:[%s4626_s0 + $0x338] sm:$0xff]  ;;  %v62_v42 = vld [vmem:[%s4626_s0 + $0x180] sm:$0xff] }
  0x4e   :  { %2279 = vmatprep.mubr.msk.f32.mxu0 %vm2801_vm0, %v2802_v6  ;;  %2447 = vmatprep.mubr.msk.f32.mxu1 %vm2801_vm0, %v2802_v6 }
  0x51   :  { %2280 = vmatmul.mubr.msk.f32.gmra.mrb[34].mxu0 %vm137_vm2, %v31_v43  ;;  %2448 = vmatmul.mubr.msk.f32.gmra.mrb[34].mxu1 %vm137_vm2, %v87_v44  ;;  %v118_v43 = vld [vmem:[%s4626_s0 + $0x340] sm:$0xff]  ;;  %v63_v44 = vld [vmem:[%s4626_s0 + $0x188] sm:$0xff] }
  0x52   :  { %2282 = vmatprep.mubr.msk.f32.mxu0 %vm2801_vm0, %v2802_v6  ;;  %2450 = vmatprep.mubr.msk.f32.mxu1 %vm2801_vm0, %v2802_v6 }
  0x55   :  { %2283 = vmatmul.mubr.msk.f32.gmra.mrb[36].mxu0 %vm137_vm2, %v32_v45  ;;  %2451 = vmatmul.mubr.msk.f32.gmra.mrb[36].mxu1 %vm137_vm2, %v88_v46  ;;  %v119_v45 = vld [vmem:[%s4626_s0 + $0x348] sm:$0xff]  ;;  %v64_v46 = vld [vmem:[%s4626_s0 + $0x190] sm:$0xff] }
  0x56   :  { %2285 = vmatprep.mubr.msk.f32.mxu0 %vm2801_vm0, %v2802_v6  ;;  %2453 = vmatprep.mubr.msk.f32.mxu1 %vm2801_vm0, %v2802_v6 }
  0x59   :  { %2286 = vmatmul.mubr.msk.f32.gmra.mrb[38].mxu0 %vm137_vm2, %v33_v47  ;;  %2454 = vmatmul.mubr.msk.f32.gmra.mrb[38].mxu1 %vm137_vm2, %v89_v48  ;;  %v120_v47 = vld [vmem:[%s4626_s0 + $0x350] sm:$0xff]  ;;  %v65_v48 = vld [vmem:[%s4626_s0 + $0x198] sm:$0xff] }
  0x5a   :  { %2288 = vmatprep.mubr.msk.f32.mxu0 %vm2801_vm0, %v2802_v6  ;;  %2456 = vmatprep.mubr.msk.f32.mxu1 %vm2801_vm0, %v2802_v6 }
  0x5d   :  { %2289 = vmatmul.mubr.msk.f32.gmra.mrb[40].mxu0 %vm137_vm2, %v34_v49  ;;  %2457 = vmatmul.mubr.msk.f32.gmra.mrb[40].mxu1 %vm137_vm2, %v90_v50  ;;  %v121_v49 = vld [vmem:[%s4626_s0 + $0x358] sm:$0xff]  ;;  %v66_v50 = vld [vmem:[%s4626_s0 + $0x1a0] sm:$0xff] }
  0x5e   :  { %2291 = vmatprep.mubr.msk.f32.mxu0 %vm2801_vm0, %v2802_v6  ;;  %2459 = vmatprep.mubr.msk.f32.mxu1 %vm2801_vm0, %v2802_v6 }
  0x61   :  { %2292 = vmatmul.mubr.msk.f32.gmra.mrb[42].mxu0 %vm137_vm2, %v35_v51  ;;  %2460 = vmatmul.mubr.msk.f32.gmra.mrb[42].mxu1 %vm137_vm2, %v91_v52  ;;  %v122_v51 = vld [vmem:[%s4626_s0 + $0x360] sm:$0xff] }
  0x62   :  { %2294 = vmatprep.mubr.msk.f32.mxu0 %vm2801_vm0, %v2802_v6  ;;  %2462 = vmatprep.mubr.msk.f32.mxu1 %vm2801_vm0, %v2802_v6  ;;  %v3479_v52 = vld [vmem:[%s4627_s2] ss:$0 sm:$0xff] }
  0x65   :  { %2295 = vmatmul.mubr.msk.f32.gmra.mrb[44].mxu0 %vm137_vm2, %v36_v53  ;;  %2463 = vmatmul.mubr.msk.f32.gmra.mrb[44].mxu1 %vm137_vm2, %v92_v54  ;;  %v67_v53 = vld [vmem:[%s4626_s0 + $0x1a8] sm:$0xff] }
  0x66   :  { %2297 = vmatprep.mubr.msk.f32.mxu0 %vm2801_vm0, %v2802_v6  ;;  %2465 = vmatprep.mubr.msk.f32.mxu1 %vm2801_vm0, %v2802_v6  ;;  %v123_v54 = vld [vmem:[%s4626_s0 + $0x368] sm:$0xff] }
  0x69   :  { %2298 = vmatmul.mubr.msk.f32.gmra.mrb[46].mxu0 %vm137_vm2, %v37_v55  ;;  %2466 = vmatmul.mubr.msk.f32.gmra.mrb[46].mxu1 %vm137_vm2, %v93_v56 }
  0x6a   :  { %2300 = vmatprep.mubr.msk.f32.mxu0 %vm2801_vm0, %v2802_v6  ;;  %2468 = vmatprep.mubr.msk.f32.mxu1 %vm2801_vm0, %v2802_v6 }
  0x6d   :  { %2301 = vmatmul.mubr.msk.f32.gmra.mrb[48].mxu0 %vm137_vm2, %v38_v57  ;;  %2469 = vmatmul.mubr.msk.f32.gmra.mrb[48].mxu1 %vm137_vm2, %v94_v58 }
  0x6e   :  { %2303 = vmatprep.mubr.msk.f32.mxu0 %vm2801_vm0, %v2802_v6  ;;  %2471 = vmatprep.mubr.msk.f32.mxu1 %vm2801_vm0, %v2802_v6 }
  0x71   :  { %2304 = vmatmul.mubr.msk.f32.gmra.mrb[50].mxu0 %vm137_vm2, %v39_v59  ;;  %2472 = vmatmul.mubr.msk.f32.gmra.mrb[50].mxu1 %vm137_vm2, %v95_v60 }
  0x72   :  { %2306 = vmatprep.mubr.msk.f32.mxu0 %vm2801_vm0, %v2802_v6  ;;  %2474 = vmatprep.mubr.msk.f32.mxu1 %vm2801_vm0, %v2802_v6 }
  0x75   :  { %2307 = vmatmul.mubr.msk.f32.gmra.mrb[52].mxu0 %vm137_vm2, %v40_v61  ;;  %2475 = vmatmul.mubr.msk.f32.gmra.mrb[52].mxu1 %vm137_vm2, %v96_v62  ;;  %v68_v61 = vld [vmem:[%s4626_s0 + $0x1b0] sm:$0xff] }
  0x76   :  { %2309 = vmatprep.mubr.msk.f32.mxu0 %vm2801_vm0, %v2802_v6  ;;  %2477 = vmatprep.mubr.msk.f32.mxu1 %vm2801_vm0, %v2802_v6  ;;  %v124_v62 = vld [vmem:[%s4626_s0 + $0x370] sm:$0x3] }
  0x79   :  { %2310 = vmatmul.mubr.msk.f32.gmra.mrb[54].mxu0 %vm137_vm2, %v41_v63  ;;  %2478 = vmatmul.mubr.msk.f32.gmra.mrb[54].mxu1 %vm137_vm2, %v97_v0 }
  0x7a   :  { %2312 = vmatprep.mubr.msk.f32.mxu0 %vm2801_vm0, %v2802_v6  ;;  %2480 = vmatprep.mubr.msk.f32.mxu1 %vm2801_vm0, %v2802_v6 }
  0x7d   :  { %2313 = vmatmul.mubr.msk.f32.gmra.mrb[56].mxu0 %vm137_vm2, %v42_v1  ;;  %2481 = vmatmul.mubr.msk.f32.gmra.mrb[56].mxu1 %vm137_vm2, %v98_v2 }
  0x7e   :  { %2315 = vmatprep.mubr.msk.f32.mxu0 %vm2801_vm0, %v2802_v6  ;;  %2483 = vmatprep.mubr.msk.f32.mxu1 %vm2801_vm0, %v2802_v6 }
  0x81   :  { %2316 = vmatmul.mubr.msk.f32.gmra.mrb[58].mxu0 %vm137_vm2, %v43_v3  ;;  %2484 = vmatmul.mubr.msk.f32.gmra.mrb[58].mxu1 %vm137_vm2, %v99_v4 }
  0x82   :  { %2318 = vmatprep.mubr.msk.f32.mxu0 %vm2801_vm0, %v2802_v6  ;;  %2486 = vmatprep.mubr.msk.f32.mxu1 %vm2801_vm0, %v2802_v6 }
  0x85   :  { %2319 = vmatmul.mubr.msk.f32.gmra.mrb[60].mxu0 %vm137_vm2, %v44_v5  ;;  %2487 = vmatmul.mubr.msk.f32.gmra.mrb[60].mxu1 %vm137_vm2, %v100_v7 }
  0x86   :  { %2321 = vmatprep.mubr.msk.f32.mxu0 %vm2801_vm0, %v2802_v6  ;;  %2489 = vmatprep.mubr.msk.f32.mxu1 %vm2801_vm0, %v2802_v6 }
  0x89   :  { %2322 = vmatmul.mubr.msk.f32.gmra.mrb[62].mxu0 %vm137_vm2, %v45_v8  ;;  %2490 = vmatmul.mubr.msk.f32.gmra.mrb[62].mxu1 %vm137_vm2, %v101_v9 }
  0x8a   :  { %2324 = vmatprep.mubr.msk.f32.mxu0 %vm2801_vm0, %v2802_v6  ;;  %2492 = vmatprep.mubr.msk.f32.mxu1 %vm2801_vm0, %v2802_v6 }
  0x8d   :  { %2325 = vmatmul.mubr.msk.f32.gmra.mrb[64].mxu0 %vm137_vm2, %v46_v10  ;;  %2493 = vmatmul.mubr.msk.f32.gmra.mrb[64].mxu1 %vm137_vm2, %v102_v11  ;;  %v69_v10 = vld [vmem:[%s4626_s0 + $0x1b8] sm:$0xff] }
  0x8e   :  { %2327 = vmatprep.mubr.msk.f32.mxu0 %vm2801_vm0, %v2802_v6  ;;  %2495 = vmatprep.mubr.msk.f32.mxu1 %vm2801_vm0, %v2802_v6 }
  0x91   :  { %2328 = vmatmul.mubr.msk.f32.gmra.mrb[66].mxu0 %vm137_vm2, %v47_v12  ;;  %2496 = vmatmul.mubr.msk.f32.gmra.mrb[66].mxu1 %vm137_vm2, %v103_v13 }
  0x92   :  { %2330 = vmatprep.mubr.msk.f32.mxu0 %vm2801_vm0, %v2802_v6  ;;  %2498 = vmatprep.mubr.msk.f32.mxu1 %vm2801_vm0, %v2802_v6 }
  0x95   :  { %2331 = vmatmul.mubr.msk.f32.gmra.mrb[68].mxu0 %vm137_vm2, %v48_v14  ;;  %2499 = vmatmul.mubr.msk.f32.gmra.mrb[68].mxu1 %vm137_vm2, %v104_v15 }
  0x96   :  { %2333 = vmatprep.mubr.msk.f32.mxu0 %vm2801_vm0, %v2802_v6  ;;  %2501 = vmatprep.mubr.msk.f32.mxu1 %vm2801_vm0, %v2802_v6 }
  0x99   :  { %2334 = vmatmul.mubr.msk.f32.gmra.mrb[70].mxu0 %vm137_vm2, %v49_v16  ;;  %2502 = vmatmul.mubr.msk.f32.gmra.mrb[70].mxu1 %vm137_vm2, %v105_v17 }
  0x9a   :  { %2336 = vmatprep.mubr.msk.f32.mxu0 %vm2801_vm0, %v2802_v6  ;;  %2504 = vmatprep.mubr.msk.f32.mxu1 %vm2801_vm0, %v2802_v6 }
  0x9d   :  { %2337 = vmatmul.mubr.msk.f32.gmra.mrb[72].mxu0 %vm137_vm2, %v50_v18  ;;  %2505 = vmatmul.mubr.msk.f32.gmra.mrb[72].mxu1 %vm137_vm2, %v106_v19 }
  0x9e   :  { %2339 = vmatprep.mubr.msk.f32.mxu0 %vm2801_vm0, %v2802_v6  ;;  %2507 = vmatprep.mubr.msk.f32.mxu1 %vm2801_vm0, %v2802_v6 }
  0xa1   :  { %2340 = vmatmul.mubr.msk.f32.gmra.mrb[74].mxu0 %vm137_vm2, %v51_v20  ;;  %2508 = vmatmul.mubr.msk.f32.gmra.mrb[74].mxu1 %vm137_vm2, %v107_v21 }
  0xa2   :  { %2342 = vmatprep.mubr.msk.f32.mxu0 %vm2801_vm0, %v2802_v6  ;;  %2510 = vmatprep.mubr.msk.f32.mxu1 %vm2801_vm0, %v2802_v6 }
  0xa5   :  { %2343 = vmatmul.mubr.msk.f32.gmra.mrb[76].mxu0 %vm137_vm2, %v52_v22  ;;  %2511 = vmatmul.mubr.msk.f32.gmra.mrb[76].mxu1 %vm137_vm2, %v108_v23 }
  0xa6   :  { %2345 = vmatprep.mubr.msk.f32.mxu0 %vm2801_vm0, %v2802_v6  ;;  %2513 = vmatprep.mubr.msk.f32.mxu1 %vm2801_vm0, %v2802_v6 }
  0xa9   :  { %2346 = vmatmul.mubr.msk.f32.gmra.mrb[78].mxu0 %vm137_vm2, %v53_v24  ;;  %2514 = vmatmul.mubr.msk.f32.gmra.mrb[78].mxu1 %vm137_vm2, %v109_v25 }
  0xaa   :  { %2348 = vmatprep.mubr.msk.f32.mxu0 %vm2801_vm0, %v2802_v6  ;;  %2516 = vmatprep.mubr.msk.f32.mxu1 %vm2801_vm0, %v2802_v6 }
  0xad   :  { %2349 = vmatmul.mubr.msk.f32.gmra.mrb[80].mxu0 %vm137_vm2, %v54_v26  ;;  %2517 = vmatmul.mubr.msk.f32.gmra.mrb[80].mxu1 %vm137_vm2, %v110_v27 }
  0xae   :  { %2351 = vmatprep.mubr.msk.f32.mxu0 %vm2801_vm0, %v2802_v6  ;;  %2519 = vmatprep.mubr.msk.f32.mxu1 %vm2801_vm0, %v2802_v6 }
  0xb1   :  { %2352 = vmatmul.mubr.msk.f32.gmra.mrb[82].mxu0 %vm137_vm2, %v55_v28  ;;  %2520 = vmatmul.mubr.msk.f32.gmra.mrb[82].mxu1 %vm137_vm2, %v111_v29 }
  0xb2   :  { %2354 = vmatprep.mubr.msk.f32.mxu0 %vm2801_vm0, %v2802_v6  ;;  %2522 = vmatprep.mubr.msk.f32.mxu1 %vm2801_vm0, %v2802_v6 }
  0xb5   :  { %2355 = vmatmul.mubr.msk.f32.gmra.mrb[84].mxu0 %vm137_vm2, %v56_v30  ;;  %2523 = vmatmul.mubr.msk.f32.gmra.mrb[84].mxu1 %vm137_vm2, %v112_v31 }
  0xb6   :  { %2357 = vmatprep.mubr.msk.f32.mxu0 %vm2801_vm0, %v2802_v6  ;;  %2525 = vmatprep.mubr.msk.f32.mxu1 %vm2801_vm0, %v2802_v6 }
  0xb9   :  { %2358 = vmatmul.mubr.msk.f32.gmra.mrb[86].mxu0 %vm137_vm2, %v57_v32  ;;  %2526 = vmatmul.mubr.msk.f32.gmra.mrb[86].mxu1 %vm137_vm2, %v113_v33 }
  0xba   :  { %2360 = vmatprep.mubr.msk.f32.mxu0 %vm2801_vm0, %v2802_v6  ;;  %2528 = vmatprep.mubr.msk.f32.mxu1 %vm2801_vm0, %v2802_v6 }
  0xbd   :  { %2361 = vmatmul.mubr.msk.f32.gmra.mrb[88].mxu0 %vm137_vm2, %v58_v34  ;;  %2529 = vmatmul.mubr.msk.f32.gmra.mrb[88].mxu1 %vm137_vm2, %v114_v35 }
  0xbe   :  { %2363 = vmatprep.mubr.msk.f32.mxu0 %vm2801_vm0, %v2802_v6  ;;  %2531 = vmatprep.mubr.msk.f32.mxu1 %vm2801_vm0, %v2802_v6 }
  0xc1   :  { %2364 = vmatmul.mubr.msk.f32.gmra.mrb[90].mxu0 %vm137_vm2, %v59_v36  ;;  %2532 = vmatmul.mubr.msk.f32.gmra.mrb[90].mxu1 %vm137_vm2, %v115_v37 }
  0xc2   :  { %2366 = vmatprep.mubr.msk.f32.mxu0 %vm2801_vm0, %v2802_v6  ;;  %2534 = vmatprep.mubr.msk.f32.mxu1 %vm2801_vm0, %v2802_v6 }
  0xc5   :  { %2367 = vmatmul.mubr.msk.f32.gmra.mrb[92].mxu0 %vm137_vm2, %v60_v38  ;;  %2535 = vmatmul.mubr.msk.f32.gmra.mrb[92].mxu1 %vm137_vm2, %v116_v39 }
  0xc6   :  { %2369 = vmatprep.mubr.msk.f32.mxu0 %vm2801_vm0, %v2802_v6  ;;  %2537 = vmatprep.mubr.msk.f32.mxu1 %vm2801_vm0, %v2802_v6 }
  0xc9   :  { %2370 = vmatmul.mubr.msk.f32.gmra.mrb[94].mxu0 %vm137_vm2, %v61_v40  ;;  %2538 = vmatmul.mubr.msk.f32.gmra.mrb[94].mxu1 %vm137_vm2, %v117_v41 }
  0xca   :  { %2372 = vmatprep.mubr.msk.f32.mxu0 %vm2801_vm0, %v2802_v6  ;;  %2540 = vmatprep.mubr.msk.f32.mxu1 %vm2801_vm0, %v2802_v6 }
  0xcd   :  { %2373 = vmatmul.mubr.msk.f32.gmra.mrb[96].mxu0 %vm137_vm2, %v62_v42  ;;  %2541 = vmatmul.mubr.msk.f32.gmra.mrb[96].mxu1 %vm137_vm2, %v118_v43 }
  0xce   :  { %2375 = vmatprep.mubr.msk.f32.mxu0 %vm2801_vm0, %v2802_v6  ;;  %2543 = vmatprep.mubr.msk.f32.mxu1 %vm2801_vm0, %v2802_v6 }
  0xd1   :  { %2376 = vmatmul.mubr.msk.f32.gmra.mrb[98].mxu0 %vm137_vm2, %v63_v44  ;;  %2544 = vmatmul.mubr.msk.f32.gmra.mrb[98].mxu1 %vm137_vm2, %v119_v45 }
  0xd2   :  { %2378 = vmatprep.mubr.msk.f32.mxu0 %vm2801_vm0, %v2802_v6  ;;  %2546 = vmatprep.mubr.msk.f32.mxu1 %vm2801_vm0, %v2802_v6 }
  0xd5   :  { %2379 = vmatmul.mubr.msk.f32.gmra.mrb[100].mxu0 %vm137_vm2, %v64_v46  ;;  %2547 = vmatmul.mubr.msk.f32.gmra.mrb[100].mxu1 %vm137_vm2, %v120_v47 }
  0xd6   :  { %2381 = vmatprep.mubr.msk.f32.mxu0 %vm2801_vm0, %v2802_v6  ;;  %2549 = vmatprep.mubr.msk.f32.mxu1 %vm2801_vm0, %v2802_v6 }
  0xd9   :  { %2382 = vmatmul.mubr.msk.f32.gmra.mrb[102].mxu0 %vm137_vm2, %v65_v48  ;;  %2550 = vmatmul.mubr.msk.f32.gmra.mrb[102].mxu1 %vm137_vm2, %v121_v49 }
  0xda   :  { %2384 = vmatprep.mubr.msk.f32.mxu0 %vm2801_vm0, %v2802_v6  ;;  %2552 = vmatprep.mubr.msk.f32.mxu1 %vm2801_vm0, %v2802_v6 }
  0xdd   :  { %2385 = vmatmul.mubr.msk.f32.gmra.mrb[104].mxu0 %vm137_vm2, %v66_v50  ;;  %2553 = vmatmul.mubr.msk.f32.gmra.mrb[104].mxu1 %vm137_vm2, %v122_v51 }
  0xde   :  { %2387 = vmatprep.mubr.msk.f32.mxu0 %vm2801_vm0, %v2802_v6  ;;  %2555 = vmatprep.mubr.msk.f32.mxu1 %vm2801_vm0, %v2802_v6 }
  0xe0   :  { %v541_v55 = vpop.f32.mrb[0].mxu0  ;;  %v821_v56 = vpop.f32.mrb[0].mxu1 }
  0xe1   :  { %v3492_v57 = vadd.f32 %v3479_v52, %v541_v55  ;;  %v3495_v58 = vadd.f32 %v3479_v52, %v821_v56  ;;  %v2230_v59 = vpop.f32.mrb[1].mxu0  ;;  %2388 = vmatmul.mubr.msk.f32.gmra.mrb[106].mxu0 %vm137_vm2, %v67_v53  ;;  %2556 = vmatmul.mubr.msk.f32.gmra.mrb[106].mxu1 %vm137_vm2, %v123_v54  ;;  %v2398_v60 = vpop.f32.mrb[1].mxu1 }
  0xe2   :  { %2390 = vmatprep.mubr.msk.f32.mxu0 %vm2801_vm0, %v2802_v6  ;;  %2558 = vmatprep.mubr.msk.f32.mxu1 %vm2801_vm0, %v2802_v6 }
  0xe3   :  { %v1206_v63 = vmin.f32 %v3492_v57, 0.0  ;;  %v1262_v0 = vmin.f32 %v3495_v58, 0.0  ;;  %vm1095_vm4 = vcmp.gt.f32.partialorder %v3492_v57, 0.0  ;;  %vm1151_vm5 = vcmp.gt.f32.partialorder %v3495_v58, 0.0 }
  0xe4   :  { %v546_v1 = vpop.f32.mrb[2].mxu0  ;;  %v826_v2 = vpop.f32.mrb[2].mxu1 }
  0xe5   :  { %v1317_v3 = vmul.f32 1.442695, %v1206_v63  ;;  %v1429_v4 = vmul.f32 1.442695, %v1262_v0  ;;  %v3512_v5 = vadd.f32 %v3479_v52, %v546_v1  ;;  %v3515_v7 = vadd.f32 %v3479_v52, %v826_v2  ;;  %v2233_v8 = vpop.f32.mrb[3].mxu0  ;;  %2391 = vmatmul.mubr.msk.f32.gmra.mrb[108].mxu0 %vm137_vm2, %v68_v61  ;;  %2559 = vmatmul.mubr.msk.f32.gmra.mrb[108].mxu1 %vm137_vm2, %v124_v62  ;;  %v2401_v9 = vpop.f32.mrb[3].mxu1 }
  0xe6   :  { %2393 = vmatprep.mubr.msk.f32.mxu0 %vm2801_vm0, %v2802_v6 }
  0xe7   :  { %2576 = vpow2.f32 %v1317_v3  ;;  %v1207_v11 = vmin.f32 %v3512_v5, 0.0  ;;  %v1263_v12 = vmin.f32 %v3515_v7, 0.0  ;;  %vm1096_vm6 = vcmp.gt.f32.partialorder %v3512_v5, 0.0 }
  0xe8   :  { %2578 = vpow2.f32 %v1429_v4  ;;  %v551_v13 = vpop.f32.mrb[4].mxu0  ;;  %v831_v14 = vpop.f32.mrb[4].mxu1  ;;  %vm1152_vm7 = vcmp.gt.f32.partialorder %v3515_v7, 0.0 }
  0xe9   :  { %v1319_v15 = vmul.f32 1.442695, %v1207_v11  ;;  %v3527_v16 = vadd.f32 %v3479_v52, %v551_v13  ;;  %v3530_v17 = vadd.f32 %v3479_v52, %v831_v14  ;;  %v2236_v6 = vpop.f32.mrb[5].mxu0  ;;  %2394 = vmatmul.mubr.msk.f32.gmra.mrb[110].mxu0 %vm137_vm2, %v69_v10  ;;  %v2404_v18 = vpop.f32.mrb[5].mxu1  ;;  %v1431_v19 = vmul.f32 1.442695, %v1263_v12 }
  0xeb   :  { %2580 = vpow2.f32 %v1319_v15  ;;  %v1208_v20 = vmin.f32 %v3527_v16, 0.0  ;;  %v1264_v21 = vmin.f32 %v3530_v17, 0.0  ;;  %vm1097_vm8 = vcmp.gt.f32.partialorder %v3527_v16, 0.0 }
  0xec   :  { %2582 = vpow2.f32 %v1431_v19  ;;  %v556_v22 = vpop.f32.mrb[6].mxu0  ;;  %v836_v23 = vpop.f32.mrb[6].mxu1  ;;  %vm1153_vm9 = vcmp.gt.f32.partialorder %v3530_v17, 0.0 }
  0xed   :  { %v1321_v24 = vmul.f32 1.442695, %v1208_v20  ;;  %v3536_v25 = vadd.f32 %v3479_v52, %v556_v22  ;;  %v3539_v26 = vadd.f32 %v3479_v52, %v836_v23  ;;  %v2239_v27 = vpop.f32.mrb[7].mxu0  ;;  %v2407_v28 = vpop.f32.mrb[7].mxu1  ;;  %v1433_v29 = vmul.f32 1.442695, %v1264_v21 }
  0xef   :  { %2584 = vpow2.f32 %v1321_v24  ;;  %v1209_v30 = vmin.f32 %v3536_v25, 0.0  ;;  %v1265_v31 = vmin.f32 %v3539_v26, 0.0  ;;  %vm1098_vm10 = vcmp.gt.f32.partialorder %v3536_v25, 0.0 }
  0xf0   :  { %2586 = vpow2.f32 %v1433_v29  ;;  %v561_v32 = vpop.f32.mrb[8].mxu0  ;;  %v841_v33 = vpop.f32.mrb[8].mxu1  ;;  %vm1154_vm11 = vcmp.gt.f32.partialorder %v3539_v26, 0.0 }
  0xf1   :  { %v2577_v34 = vpop.eup %2576  ;;  %v1323_v35 = vmul.f32 1.442695, %v1209_v30  ;;  %v3544_v36 = vadd.f32 %v3479_v52, %v561_v32  ;;  %v3547_v37 = vadd.f32 %v3479_v52, %v841_v33  ;;  %v2242_v38 = vpop.f32.mrb[9].mxu0  ;;  %v1435_v42 = vmul.f32 1.442695, %v1265_v31 }
  0xf2   :  { %v2410_v39 = vpop.f32.mrb[9].mxu1  ;;  %v2579_v40 = vpop.eup %2578  ;;  %v1991_v41 = vadd.f32 -1.0, %v2577_v34 }
  0xf3   :  { %v2047_v43 = vadd.f32 -1.0, %v2579_v40  ;;  %2588 = vpow2.f32 %v1323_v35  ;;  %v1210_v44 = vmin.f32 %v3544_v36, 0.0  ;;  %v1266_v46 = vmin.f32 %v3547_v37, 0.0 }
  0xf4   :  { %v1650_v45 = vsel %vm1095_vm4, %v3492_v57, %v1991_v41  ;;  %2590 = vpow2.f32 %v1435_v42  ;;  %v566_v47 = vpop.f32.mrb[10].mxu0  ;;  %v846_v48 = vpop.f32.mrb[10].mxu1  ;;  %vm1099_vm12 = vcmp.gt.f32.partialorder %v3544_v36, 0.0  ;;  %vm1155_vm13 = vcmp.gt.f32.partialorder %v3547_v37, 0.0 }
  0xf5   :  { %v2581_v49 = vpop.eup %2580  ;;  %1762 = vst.msk [vmem:[%s4628_s3] sm:$0xff] %vm1761_vm3, %v1650_v45  ;;  %v1706_v50 = vsel %vm1151_vm5, %v3495_v58, %v2047_v43  ;;  %v1325_v51 = vmul.f32 1.442695, %v1210_v44  ;;  %v3560_v53 = vadd.f32 %v3479_v52, %v566_v47  ;;  %v3563_v54 = vadd.f32 %v3479_v52, %v846_v48  ;;  %v2245_v55 = vpop.f32.mrb[11].mxu0 }
  0xf6   :  { %v2413_v56 = vpop.f32.mrb[11].mxu1  ;;  %v2583_v57 = vpop.eup %2582  ;;  %1818 = vst.msk [vmem:[%s4628_s3 + $0x1c0] sm:$0xff] %vm1761_vm3, %v1706_v50  ;;  %v1992_v59 = vadd.f32 -1.0, %v2581_v49  ;;  %v1437_v60 = vmul.f32 1.442695, %v1266_v46 }
  0xf7   :  { %v2048_v58 = vadd.f32 -1.0, %v2583_v57  ;;  %2592 = vpow2.f32 %v1325_v51  ;;  %v1211_v61 = vmin.f32 %v3560_v53, 0.0  ;;  %v1267_v63 = vmin.f32 %v3563_v54, 0.0 }
  0xf8   :  { %v1651_v62 = vsel %vm1096_vm6, %v3512_v5, %v1992_v59  ;;  %2594 = vpow2.f32 %v1437_v60  ;;  %v571_v0 = vpop.f32.mrb[12].mxu0  ;;  %v851_v1 = vpop.f32.mrb[12].mxu1  ;;  %vm1100_vm14 = vcmp.gt.f32.partialorder %v3560_v53, 0.0  ;;  %vm1156_vm15 = vcmp.gt.f32.partialorder %v3563_v54, 0.0 }
  0xf9   :  { %v2585_v2 = vpop.eup %2584  ;;  %1763 = vst.msk [vmem:[%s4628_s3 + $0x8] sm:$0xff] %vm1761_vm3, %v1651_v62  ;;  %v1707_v3 = vsel %vm1152_vm7, %v3515_v7, %v2048_v58  ;;  %v1327_v4 = vmul.f32 1.442695, %v1211_v61  ;;  %v3580_v8 = vadd.f32 %v3479_v52, %v571_v0  ;;  %v3583_v5 = vadd.f32 %v3479_v52, %v851_v1  ;;  %v2248_v9 = vpop.f32.mrb[13].mxu0 }
  0xfa   :  { %v2416_v10 = vpop.f32.mrb[13].mxu1  ;;  %v2587_v11 = vpop.eup %2586  ;;  %1819 = vst.msk [vmem:[%s4628_s3 + $0x1c8] sm:$0xff] %vm1761_vm3, %v1707_v3  ;;  %v1993_v12 = vadd.f32 -1.0, %v2585_v2  ;;  %v1439_v13 = vmul.f32 1.442695, %v1267_v63 }
  0xfb   :  { %v2049_v7 = vadd.f32 -1.0, %v2587_v11  ;;  %2596 = vpow2.f32 %v1327_v4  ;;  %v1212_v14 = vmin.f32 %v3580_v8, 0.0  ;;  %v1268_v6 = vmin.f32 %v3583_v5, 0.0 }
  0xfc   :  { %v1652_v15 = vsel %vm1097_vm8, %v3527_v16, %v1993_v12  ;;  %2598 = vpow2.f32 %v1439_v13  ;;  %v576_v18 = vpop.f32.mrb[14].mxu0  ;;  %v856_v19 = vpop.f32.mrb[14].mxu1  ;;  %vm1101_vm0 = vcmp.gt.f32.partialorder %v3580_v8, 0.0  ;;  %vm1157_vm1 = vcmp.gt.f32.partialorder %v3583_v5, 0.0 }
  0xfd   :  { %v2589_v20 = vpop.eup %2588  ;;  %1764 = vst.msk [vmem:[%s4628_s3 + $0x10] sm:$0xff] %vm1761_vm3, %v1652_v15  ;;  %v1708_v21 = vsel %vm1153_vm9, %v3530_v17, %v2049_v7  ;;  %v1329_v22 = vmul.f32 1.442695, %v1212_v14  ;;  %v3600_v23 = vadd.f32 %v3479_v52, %v576_v18  ;;  %v3603_v16 = vadd.f32 %v3479_v52, %v856_v19  ;;  %v2251_v24 = vpop.f32.mrb[15].mxu0 }
  0xfe   :  { %v2419_v27 = vpop.f32.mrb[15].mxu1  ;;  %v2591_v28 = vpop.eup %2590  ;;  %1820 = vst.msk [vmem:[%s4628_s3 + $0x1d0] sm:$0xff] %vm1761_vm3, %v1708_v21  ;;  %v1994_v29 = vadd.f32 -1.0, %v2589_v20  ;;  %v1441_v30 = vmul.f32 1.442695, %v1268_v6 }
  0xff   :  { %v2050_v17 = vadd.f32 -1.0, %v2591_v28  ;;  %2600 = vpow2.f32 %v1329_v22  ;;  %v1213_v31 = vmin.f32 %v3600_v23, 0.0  ;;  %v1269_v33 = vmin.f32 %v3603_v16, 0.0 }
 0x100   :  { %v1653_v32 = vsel %vm1098_vm10, %v3536_v25, %v1994_v29  ;;  %2602 = vpow2.f32 %v1441_v30  ;;  %v581_v34 = vpop.f32.mrb[16].mxu0  ;;  %v861_v35 = vpop.f32.mrb[16].mxu1  ;;  %vm1102_vm2 = vcmp.gt.f32.partialorder %v3600_v23, 0.0  ;;  %vm1158_vm4 = vcmp.gt.f32.partialorder %v3603_v16, 0.0 }
 0x101   :  { %v2593_v38 = vpop.eup %2592  ;;  %1765 = vst.msk [vmem:[%s4628_s3 + $0x18] sm:$0xff] %vm1761_vm3, %v1653_v32  ;;  %v1709_v39 = vsel %vm1154_vm11, %v3539_v26, %v2050_v17  ;;  %v1331_v40 = vmul.f32 1.442695, %v1213_v31  ;;  %v3620_v41 = vadd.f32 %v3479_v52, %v581_v34  ;;  %v3623_v25 = vadd.f32 %v3479_v52, %v861_v35  ;;  %v2254_v42 = vpop.f32.mrb[17].mxu0 }
 0x102   :  { %v2422_v43 = vpop.f32.mrb[17].mxu1  ;;  %v2595_v44 = vpop.eup %2594  ;;  %1821 = vst.msk [vmem:[%s4628_s3 + $0x1d8] sm:$0xff] %vm1761_vm3, %v1709_v39  ;;  %v1995_v45 = vadd.f32 -1.0, %v2593_v38  ;;  %v1443_v46 = vmul.f32 1.442695, %v1269_v33 }
 0x103   :  { %v2051_v26 = vadd.f32 -1.0, %v2595_v44  ;;  %2604 = vpow2.f32 %v1331_v40  ;;  %v1214_v47 = vmin.f32 %v3620_v41, 0.0  ;;  %v1270_v49 = vmin.f32 %v3623_v25, 0.0 }
 0x104   :  { %v1654_v48 = vsel %vm1099_vm12, %v3544_v36, %v1995_v45  ;;  %2606 = vpow2.f32 %v1443_v46  ;;  %v586_v50 = vpop.f32.mrb[18].mxu0  ;;  %v866_v51 = vpop.f32.mrb[18].mxu1  ;;  %vm1103_vm5 = vcmp.gt.f32.partialorder %v3620_v41, 0.0  ;;  %vm1159_vm6 = vcmp.gt.f32.partialorder %v3623_v25, 0.0 }
 0x105   :  { %v2597_v55 = vpop.eup %2596  ;;  %1766 = vst.msk [vmem:[%s4628_s3 + $0x20] sm:$0xff] %vm1761_vm3, %v1654_v48  ;;  %v1710_v56 = vsel %vm1155_vm13, %v3547_v37, %v2051_v26  ;;  %v1333_v57 = vmul.f32 1.442695, %v1214_v47  ;;  %v3640_v59 = vadd.f32 %v3479_v52, %v586_v50  ;;  %v3643_v36 = vadd.f32 %v3479_v52, %v866_v51  ;;  %v2257_v60 = vpop.f32.mrb[19].mxu0 }
 0x106   :  { %v2425_v58 = vpop.f32.mrb[19].mxu1  ;;  %v2599_v61 = vpop.eup %2598  ;;  %1822 = vst.msk [vmem:[%s4628_s3 + $0x1e0] sm:$0xff] %vm1761_vm3, %v1710_v56  ;;  %v1996_v62 = vadd.f32 -1.0, %v2597_v55  ;;  %v1445_v63 = vmul.f32 1.442695, %v1270_v49 }
 0x107   :  { %v2052_v37 = vadd.f32 -1.0, %v2599_v61  ;;  %2608 = vpow2.f32 %v1333_v57  ;;  %v1215_v0 = vmin.f32 %v3640_v59, 0.0  ;;  %v1271_v2 = vmin.f32 %v3643_v36, 0.0 }
 0x108   :  { %v1655_v1 = vsel %vm1100_vm14, %v3560_v53, %v1996_v62  ;;  %2610 = vpow2.f32 %v1445_v63  ;;  %v591_v3 = vpop.f32.mrb[20].mxu0  ;;  %v871_v4 = vpop.f32.mrb[20].mxu1  ;;  %vm1104_vm7 = vcmp.gt.f32.partialorder %v3640_v59, 0.0  ;;  %vm1160_vm8 = vcmp.gt.f32.partialorder %v3643_v36, 0.0 }
 0x109   :  { %v2601_v9 = vpop.eup %2600  ;;  %1767 = vst.msk [vmem:[%s4628_s3 + $0x28] sm:$0xff] %vm1761_vm3, %v1655_v1  ;;  %v1711_v10 = vsel %vm1156_vm15, %v3563_v54, %v2052_v37  ;;  %v1335_v11 = vmul.f32 1.442695, %v1215_v0  ;;  %v3660_v12 = vadd.f32 %v3479_v52, %v591_v3  ;;  %v3663_v53 = vadd.f32 %v3479_v52, %v871_v4  ;;  %v2260_v13 = vpop.f32.mrb[21].mxu0 }
 0x10a   :  { %v2428_v7 = vpop.f32.mrb[21].mxu1  ;;  %v2603_v14 = vpop.eup %2602  ;;  %1823 = vst.msk [vmem:[%s4628_s3 + $0x1e8] sm:$0xff] %vm1761_vm3, %v1711_v10  ;;  %v1997_v15 = vadd.f32 -1.0, %v2601_v9  ;;  %v1447_v6 = vmul.f32 1.442695, %v1271_v2 }
 0x10b   :  { %v2053_v54 = vadd.f32 -1.0, %v2603_v14  ;;  %2612 = vpow2.f32 %v1335_v11  ;;  %v1216_v18 = vmin.f32 %v3660_v12, 0.0  ;;  %v1272_v20 = vmin.f32 %v3663_v53, 0.0 }
 0x10c   :  { %v1656_v19 = vsel %vm1101_vm0, %v3580_v8, %v1997_v15  ;;  %2614 = vpow2.f32 %v1447_v6  ;;  %v596_v21 = vpop.f32.mrb[22].mxu0  ;;  %v876_v22 = vpop.f32.mrb[22].mxu1  ;;  %vm1105_vm9 = vcmp.gt.f32.partialorder %v3660_v12, 0.0  ;;  %vm1161_vm10 = vcmp.gt.f32.partialorder %v3663_v53, 0.0 }
 0x10d   :  { %v2605_v24 = vpop.eup %2604  ;;  %1768 = vst.msk [vmem:[%s4628_s3 + $0x30] sm:$0xff] %vm1761_vm3, %v1656_v19  ;;  %v1712_v27 = vsel %vm1157_vm1, %v3583_v5, %v2053_v54  ;;  %v1337_v28 = vmul.f32 1.442695, %v1216_v18  ;;  %v3680_v29 = vadd.f32 %v3479_v52, %v596_v21  ;;  %v3683_v8 = vadd.f32 %v3479_v52, %v876_v22  ;;  %v2263_v30 = vpop.f32.mrb[23].mxu0 }
 0x10e   :  { %v2431_v17 = vpop.f32.mrb[23].mxu1  ;;  %v2607_v31 = vpop.eup %2606  ;;  %1824 = vst.msk [vmem:[%s4628_s3 + $0x1f0] sm:$0xff] %vm1761_vm3, %v1712_v27  ;;  %v1998_v32 = vadd.f32 -1.0, %v2605_v24  ;;  %v1449_v33 = vmul.f32 1.442695, %v1272_v20 }
 0x10f   :  { %v2054_v5 = vadd.f32 -1.0, %v2607_v31  ;;  %2616 = vpow2.f32 %v1337_v28  ;;  %v1217_v34 = vmin.f32 %v3680_v29, 0.0  ;;  %v1273_v38 = vmin.f32 %v3683_v8, 0.0 }
 0x110   :  { %v1657_v35 = vsel %vm1102_vm2, %v3600_v23, %v1998_v32  ;;  %2618 = vpow2.f32 %v1449_v33  ;;  %v601_v39 = vpop.f32.mrb[24].mxu0  ;;  %v881_v40 = vpop.f32.mrb[24].mxu1  ;;  %vm1106_vm11 = vcmp.gt.f32.partialorder %v3680_v29, 0.0  ;;  %vm1162_vm12 = vcmp.gt.f32.partialorder %v3683_v8, 0.0 }
 0x111   :  { %v2609_v42 = vpop.eup %2608  ;;  %1769 = vst.msk [vmem:[%s4628_s3 + $0x38] sm:$0xff] %vm1761_vm3, %v1657_v35  ;;  %v1713_v43 = vsel %vm1158_vm4, %v3603_v16, %v2054_v5  ;;  %v1339_v44 = vmul.f32 1.442695, %v1217_v34  ;;  %v3700_v45 = vadd.f32 %v3479_v52, %v601_v39  ;;  %v3703_v23 = vadd.f32 %v3479_v52, %v881_v40  ;;  %v2266_v46 = vpop.f32.mrb[25].mxu0 }
 0x112   :  { %v2434_v26 = vpop.f32.mrb[25].mxu1  ;;  %v2611_v47 = vpop.eup %2610  ;;  %1825 = vst.msk [vmem:[%s4628_s3 + $0x1f8] sm:$0xff] %vm1761_vm3, %v1713_v43  ;;  %v1999_v48 = vadd.f32 -1.0, %v2609_v42  ;;  %v1451_v49 = vmul.f32 1.442695, %v1273_v38 }
 0x113   :  { %v2055_v16 = vadd.f32 -1.0, %v2611_v47  ;;  %2620 = vpow2.f32 %v1339_v44  ;;  %v1218_v50 = vmin.f32 %v3700_v45, 0.0  ;;  %v1274_v55 = vmin.f32 %v3703_v23, 0.0 }
 0x114   :  { %v1658_v51 = vsel %vm1103_vm5, %v3620_v41, %v1999_v48  ;;  %2622 = vpow2.f32 %v1451_v49  ;;  %v606_v56 = vpop.f32.mrb[26].mxu0  ;;  %v886_v57 = vpop.f32.mrb[26].mxu1  ;;  %vm1107_vm13 = vcmp.gt.f32.partialorder %v3700_v45, 0.0  ;;  %vm1163_vm14 = vcmp.gt.f32.partialorder %v3703_v23, 0.0 }
 0x115   :  { %v2613_v60 = vpop.eup %2612  ;;  %1770 = vst.msk [vmem:[%s4628_s3 + $0x40] sm:$0xff] %vm1761_vm3, %v1658_v51  ;;  %v1714_v58 = vsel %vm1159_vm6, %v3623_v25, %v2055_v16  ;;  %v1341_v61 = vmul.f32 1.442695, %v1218_v50  ;;  %v3720_v62 = vadd.f32 %v3479_v52, %v606_v56  ;;  %v3723_v41 = vadd.f32 %v3479_v52, %v886_v57  ;;  %v2269_v63 = vpop.f32.mrb[27].mxu0 }
 0x116   :  { %v2437_v37 = vpop.f32.mrb[27].mxu1  ;;  %v2615_v0 = vpop.eup %2614  ;;  %1826 = vst.msk [vmem:[%s4628_s3 + $0x200] sm:$0xff] %vm1761_vm3, %v1714_v58  ;;  %v2000_v1 = vadd.f32 -1.0, %v2613_v60  ;;  %v1453_v2 = vmul.f32 1.442695, %v1274_v55 }
 0x117   :  { %v2056_v25 = vadd.f32 -1.0, %v2615_v0  ;;  %2624 = vpow2.f32 %v1341_v61  ;;  %v1219_v3 = vmin.f32 %v3720_v62, 0.0  ;;  %v1275_v9 = vmin.f32 %v3723_v41, 0.0 }
 0x118   :  { %v1659_v4 = vsel %vm1104_vm7, %v3640_v59, %v2000_v1  ;;  %2626 = vpow2.f32 %v1453_v2  ;;  %v611_v10 = vpop.f32.mrb[28].mxu0  ;;  %v891_v11 = vpop.f32.mrb[28].mxu1  ;;  %vm1108_vm15 = vcmp.gt.f32.partialorder %v3720_v62, 0.0  ;;  %vm1164_vm0 = vcmp.gt.f32.partialorder %v3723_v41, 0.0 }
 0x119   :  { %v2617_v13 = vpop.eup %2616  ;;  %1771 = vst.msk [vmem:[%s4628_s3 + $0x48] sm:$0xff] %vm1761_vm3, %v1659_v4  ;;  %v1715_v7 = vsel %vm1160_vm8, %v3643_v36, %v2056_v25  ;;  %v1343_v14 = vmul.f32 1.442695, %v1219_v3  ;;  %v3740_v15 = vadd.f32 %v3479_v52, %v611_v10  ;;  %v3743_v59 = vadd.f32 %v3479_v52, %v891_v11  ;;  %v2272_v6 = vpop.f32.mrb[29].mxu0 }
 0x11a   :  { %v2440_v54 = vpop.f32.mrb[29].mxu1  ;;  %v2619_v18 = vpop.eup %2618  ;;  %1827 = vst.msk [vmem:[%s4628_s3 + $0x208] sm:$0xff] %vm1761_vm3, %v1715_v7  ;;  %v2001_v19 = vadd.f32 -1.0, %v2617_v13  ;;  %v1455_v20 = vmul.f32 1.442695, %v1275_v9 }
 0x11b   :  { %v2057_v36 = vadd.f32 -1.0, %v2619_v18  ;;  %2628 = vpow2.f32 %v1343_v14  ;;  %v1220_v21 = vmin.f32 %v3740_v15, 0.0  ;;  %v1276_v24 = vmin.f32 %v3743_v59, 0.0 }
 0x11c   :  { %v1660_v22 = vsel %vm1105_vm9, %v3660_v12, %v2001_v19  ;;  %2630 = vpow2.f32 %v1455_v20  ;;  %v616_v27 = vpop.f32.mrb[30].mxu0  ;;  %v896_v28 = vpop.f32.mrb[30].mxu1  ;;  %vm1109_vm1 = vcmp.gt.f32.partialorder %v3740_v15, 0.0  ;;  %vm1165_vm2 = vcmp.gt.f32.partialorder %v3743_v59, 0.0 }
 0x11d   :  { %v2621_v30 = vpop.eup %2620  ;;  %1772 = vst.msk [vmem:[%s4628_s3 + $0x50] sm:$0xff] %vm1761_vm3, %v1660_v22  ;;  %v1716_v17 = vsel %vm1161_vm10, %v3663_v53, %v2057_v36  ;;  %v1345_v31 = vmul.f32 1.442695, %v1220_v21  ;;  %v3760_v32 = vadd.f32 %v3479_v52, %v616_v27  ;;  %v3763_v12 = vadd.f32 %v3479_v52, %v896_v28  ;;  %v2275_v33 = vpop.f32.mrb[31].mxu0 }
 0x11e   :  { %v2443_v5 = vpop.f32.mrb[31].mxu1  ;;  %v2623_v34 = vpop.eup %2622  ;;  %1828 = vst.msk [vmem:[%s4628_s3 + $0x210] sm:$0xff] %vm1761_vm3, %v1716_v17  ;;  %v2002_v35 = vadd.f32 -1.0, %v2621_v30  ;;  %v1457_v38 = vmul.f32 1.442695, %v1276_v24 }
 0x11f   :  { %v2058_v53 = vadd.f32 -1.0, %v2623_v34  ;;  %2632 = vpow2.f32 %v1345_v31  ;;  %v1221_v39 = vmin.f32 %v3760_v32, 0.0  ;;  %v1277_v42 = vmin.f32 %v3763_v12, 0.0 }
 0x120   :  { %v1661_v40 = vsel %vm1106_vm11, %v3680_v29, %v2002_v35  ;;  %2634 = vpow2.f32 %v1457_v38  ;;  %v621_v43 = vpop.f32.mrb[32].mxu0  ;;  %v901_v44 = vpop.f32.mrb[32].mxu1  ;;  %vm1110_vm4 = vcmp.gt.f32.partialorder %v3760_v32, 0.0  ;;  %vm1166_vm5 = vcmp.gt.f32.partialorder %v3763_v12, 0.0 }
 0x121   :  { %v2625_v46 = vpop.eup %2624  ;;  %1773 = vst.msk [vmem:[%s4628_s3 + $0x58] sm:$0xff] %vm1761_vm3, %v1661_v40  ;;  %v1717_v26 = vsel %vm1162_vm12, %v3683_v8, %v2058_v53  ;;  %v1347_v47 = vmul.f32 1.442695, %v1221_v39  ;;  %v3780_v48 = vadd.f32 %v3479_v52, %v621_v43  ;;  %v3783_v29 = vadd.f32 %v3479_v52, %v901_v44  ;;  %v2278_v49 = vpop.f32.mrb[33].mxu0 }
 0x122   :  { %v2446_v16 = vpop.f32.mrb[33].mxu1  ;;  %v2627_v50 = vpop.eup %2626  ;;  %1829 = vst.msk [vmem:[%s4628_s3 + $0x218] sm:$0xff] %vm1761_vm3, %v1717_v26  ;;  %v2003_v51 = vadd.f32 -1.0, %v2625_v46  ;;  %v1459_v55 = vmul.f32 1.442695, %v1277_v42 }
 0x123   :  { %v2059_v8 = vadd.f32 -1.0, %v2627_v50  ;;  %2636 = vpow2.f32 %v1347_v47  ;;  %v1222_v56 = vmin.f32 %v3780_v48, 0.0  ;;  %v1278_v60 = vmin.f32 %v3783_v29, 0.0 }
 0x124   :  { %v1662_v57 = vsel %vm1107_vm13, %v3700_v45, %v2003_v51  ;;  %2638 = vpow2.f32 %v1459_v55  ;;  %v626_v58 = vpop.f32.mrb[34].mxu0  ;;  %v906_v61 = vpop.f32.mrb[34].mxu1  ;;  %vm1111_vm6 = vcmp.gt.f32.partialorder %v3780_v48, 0.0  ;;  %vm1167_vm7 = vcmp.gt.f32.partialorder %v3783_v29, 0.0 }
 0x125   :  { %v2629_v63 = vpop.eup %2628  ;;  %1774 = vst.msk [vmem:[%s4628_s3 + $0x60] sm:$0xff] %vm1761_vm3, %v1662_v57  ;;  %v1718_v37 = vsel %vm1163_vm14, %v3703_v23, %v2059_v8  ;;  %v1349_v0 = vmul.f32 1.442695, %v1222_v56  ;;  %v3800_v1 = vadd.f32 %v3479_v52, %v626_v58  ;;  %v3803_v45 = vadd.f32 %v3479_v52, %v906_v61  ;;  %v2281_v2 = vpop.f32.mrb[35].mxu0 }
 0x126   :  { %v2449_v25 = vpop.f32.mrb[35].mxu1  ;;  %v2631_v3 = vpop.eup %2630  ;;  %1830 = vst.msk [vmem:[%s4628_s3 + $0x220] sm:$0xff] %vm1761_vm3, %v1718_v37  ;;  %v2004_v4 = vadd.f32 -1.0, %v2629_v63  ;;  %v1461_v9 = vmul.f32 1.442695, %v1278_v60 }
 0x127   :  { %v2060_v23 = vadd.f32 -1.0, %v2631_v3  ;;  %2640 = vpow2.f32 %v1349_v0  ;;  %v1223_v10 = vmin.f32 %v3800_v1, 0.0  ;;  %v1279_v13 = vmin.f32 %v3803_v45, 0.0 }
 0x128   :  { %v1663_v11 = vsel %vm1108_vm15, %v3720_v62, %v2004_v4  ;;  %2642 = vpow2.f32 %v1461_v9  ;;  %v631_v7 = vpop.f32.mrb[36].mxu0  ;;  %v911_v14 = vpop.f32.mrb[36].mxu1  ;;  %vm1112_vm8 = vcmp.gt.f32.partialorder %v3800_v1, 0.0  ;;  %vm1168_vm9 = vcmp.gt.f32.partialorder %v3803_v45, 0.0 }
 0x129   :  { %v2633_v6 = vpop.eup %2632  ;;  %1775 = vst.msk [vmem:[%s4628_s3 + $0x68] sm:$0xff] %vm1761_vm3, %v1663_v11  ;;  %v1719_v54 = vsel %vm1164_vm0, %v3723_v41, %v2060_v23  ;;  %v1351_v18 = vmul.f32 1.442695, %v1223_v10  ;;  %v3820_v19 = vadd.f32 %v3479_v52, %v631_v7  ;;  %v3823_v62 = vadd.f32 %v3479_v52, %v911_v14  ;;  %v2284_v20 = vpop.f32.mrb[37].mxu0 }
 0x12a   :  { %v2452_v36 = vpop.f32.mrb[37].mxu1  ;;  %v2635_v21 = vpop.eup %2634  ;;  %1831 = vst.msk [vmem:[%s4628_s3 + $0x228] sm:$0xff] %vm1761_vm3, %v1719_v54  ;;  %v2005_v22 = vadd.f32 -1.0, %v2633_v6  ;;  %v1463_v24 = vmul.f32 1.442695, %v1279_v13 }
 0x12b   :  { %v2061_v41 = vadd.f32 -1.0, %v2635_v21  ;;  %2644 = vpow2.f32 %v1351_v18  ;;  %v1224_v27 = vmin.f32 %v3820_v19, 0.0  ;;  %v1280_v30 = vmin.f32 %v3823_v62, 0.0 }
 0x12c   :  { %v1664_v28 = vsel %vm1109_vm1, %v3740_v15, %v2005_v22  ;;  %2646 = vpow2.f32 %v1463_v24  ;;  %v636_v17 = vpop.f32.mrb[38].mxu0  ;;  %v916_v31 = vpop.f32.mrb[38].mxu1  ;;  %vm1113_vm10 = vcmp.gt.f32.partialorder %v3820_v19, 0.0  ;;  %vm1169_vm11 = vcmp.gt.f32.partialorder %v3823_v62, 0.0 }
 0x12d   :  { %v2637_v33 = vpop.eup %2636  ;;  %1776 = vst.msk [vmem:[%s4628_s3 + $0x70] sm:$0xff] %vm1761_vm3, %v1664_v28  ;;  %v1720_v5 = vsel %vm1165_vm2, %v3743_v59, %v2061_v41  ;;  %v1353_v34 = vmul.f32 1.442695, %v1224_v27  ;;  %v3840_v35 = vadd.f32 %v3479_v52, %v636_v17  ;;  %v3843_v15 = vadd.f32 %v3479_v52, %v916_v31  ;;  %v2287_v38 = vpop.f32.mrb[39].mxu0 }
 0x12e   :  { %v2455_v53 = vpop.f32.mrb[39].mxu1  ;;  %v2639_v39 = vpop.eup %2638  ;;  %1832 = vst.msk [vmem:[%s4628_s3 + $0x230] sm:$0xff] %vm1761_vm3, %v1720_v5  ;;  %v2006_v40 = vadd.f32 -1.0, %v2637_v33  ;;  %v1465_v42 = vmul.f32 1.442695, %v1280_v30 }
 0x12f   :  { %v2062_v59 = vadd.f32 -1.0, %v2639_v39  ;;  %2648 = vpow2.f32 %v1353_v34  ;;  %v1225_v43 = vmin.f32 %v3840_v35, 0.0  ;;  %v1281_v46 = vmin.f32 %v3843_v15, 0.0 }
 0x130   :  { %v1665_v44 = vsel %vm1110_vm4, %v3760_v32, %v2006_v40  ;;  %2650 = vpow2.f32 %v1465_v42  ;;  %v641_v26 = vpop.f32.mrb[40].mxu0  ;;  %v921_v47 = vpop.f32.mrb[40].mxu1  ;;  %vm1114_vm12 = vcmp.gt.f32.partialorder %v3840_v35, 0.0  ;;  %vm1170_vm13 = vcmp.gt.f32.partialorder %v3843_v15, 0.0 }
 0x131   :  { %v2641_v49 = vpop.eup %2640  ;;  %1777 = vst.msk [vmem:[%s4628_s3 + $0x78] sm:$0xff] %vm1761_vm3, %v1665_v44  ;;  %v1721_v16 = vsel %vm1166_vm5, %v3763_v12, %v2062_v59  ;;  %v1355_v50 = vmul.f32 1.442695, %v1225_v43  ;;  %v3860_v51 = vadd.f32 %v3479_v52, %v641_v26  ;;  %v3863_v32 = vadd.f32 %v3479_v52, %v921_v47  ;;  %v2290_v55 = vpop.f32.mrb[41].mxu0 }
 0x132   :  { %v2458_v8 = vpop.f32.mrb[41].mxu1  ;;  %v2643_v56 = vpop.eup %2642  ;;  %1833 = vst.msk [vmem:[%s4628_s3 + $0x238] sm:$0xff] %vm1761_vm3, %v1721_v16  ;;  %v2007_v57 = vadd.f32 -1.0, %v2641_v49  ;;  %v1467_v60 = vmul.f32 1.442695, %v1281_v46 }
 0x133   :  { %v2063_v12 = vadd.f32 -1.0, %v2643_v56  ;;  %2652 = vpow2.f32 %v1355_v50  ;;  %v1226_v58 = vmin.f32 %v3860_v51, 0.0  ;;  %v1282_v63 = vmin.f32 %v3863_v32, 0.0 }
 0x134   :  { %v1666_v61 = vsel %vm1111_vm6, %v3780_v48, %v2007_v57  ;;  %2654 = vpow2.f32 %v1467_v60  ;;  %v646_v37 = vpop.f32.mrb[42].mxu0  ;;  %v926_v0 = vpop.f32.mrb[42].mxu1  ;;  %vm1115_vm14 = vcmp.gt.f32.partialorder %v3860_v51, 0.0  ;;  %vm1171_vm15 = vcmp.gt.f32.partialorder %v3863_v32, 0.0 }
 0x135   :  { %v2645_v2 = vpop.eup %2644  ;;  %1778 = vst.msk [vmem:[%s4628_s3 + $0x80] sm:$0xff] %vm1761_vm3, %v1666_v61  ;;  %v1722_v25 = vsel %vm1167_vm7, %v3783_v29, %v2063_v12  ;;  %v1357_v3 = vmul.f32 1.442695, %v1226_v58  ;;  %v3880_v4 = vadd.f32 %v3479_v52, %v646_v37  ;;  %v3883_v48 = vadd.f32 %v3479_v52, %v926_v0  ;;  %v2293_v9 = vpop.f32.mrb[43].mxu0 }
 0x136   :  { %v2461_v23 = vpop.f32.mrb[43].mxu1  ;;  %v2647_v10 = vpop.eup %2646  ;;  %1834 = vst.msk [vmem:[%s4628_s3 + $0x240] sm:$0xff] %vm1761_vm3, %v1722_v25  ;;  %v2008_v11 = vadd.f32 -1.0, %v2645_v2  ;;  %v1469_v13 = vmul.f32 1.442695, %v1282_v63 }
 0x137   :  { %v2064_v29 = vadd.f32 -1.0, %v2647_v10  ;;  %2656 = vpow2.f32 %v1357_v3  ;;  %v1227_v7 = vmin.f32 %v3880_v4, 0.0  ;;  %v1283_v6 = vmin.f32 %v3883_v48, 0.0 }
 0x138   :  { %v1667_v14 = vsel %vm1112_vm8, %v3800_v1, %v2008_v11  ;;  %2658 = vpow2.f32 %v1469_v13  ;;  %v651_v54 = vpop.f32.mrb[44].mxu0  ;;  %v931_v18 = vpop.f32.mrb[44].mxu1  ;;  %vm1116_vm0 = vcmp.gt.f32.partialorder %v3880_v4, 0.0  ;;  %vm1172_vm1 = vcmp.gt.f32.partialorder %v3883_v48, 0.0 }
 0x139   :  { %v2649_v20 = vpop.eup %2648  ;;  %1779 = vst.msk [vmem:[%s4628_s3 + $0x88] sm:$0xff] %vm1761_vm3, %v1667_v14  ;;  %v1723_v36 = vsel %vm1168_vm9, %v3803_v45, %v2064_v29  ;;  %v1359_v21 = vmul.f32 1.442695, %v1227_v7  ;;  %v3900_v22 = vadd.f32 %v3479_v52, %v651_v54  ;;  %v3903_v1 = vadd.f32 %v3479_v52, %v931_v18  ;;  %v2296_v24 = vpop.f32.mrb[45].mxu0 }
 0x13a   :  { %v2464_v41 = vpop.f32.mrb[45].mxu1  ;;  %v2651_v27 = vpop.eup %2650  ;;  %1835 = vst.msk [vmem:[%s4628_s3 + $0x248] sm:$0xff] %vm1761_vm3, %v1723_v36  ;;  %v2009_v28 = vadd.f32 -1.0, %v2649_v20  ;;  %v1471_v30 = vmul.f32 1.442695, %v1283_v6 }
 0x13b   :  { %v2065_v45 = vadd.f32 -1.0, %v2651_v27  ;;  %2660 = vpow2.f32 %v1359_v21  ;;  %v1228_v17 = vmin.f32 %v3900_v22, 0.0  ;;  %v1284_v33 = vmin.f32 %v3903_v1, 0.0 }
 0x13c   :  { %v1668_v31 = vsel %vm1113_vm10, %v3820_v19, %v2009_v28  ;;  %2662 = vpow2.f32 %v1471_v30  ;;  %v656_v5 = vpop.f32.mrb[46].mxu0  ;;  %v936_v34 = vpop.f32.mrb[46].mxu1  ;;  %vm1117_vm2 = vcmp.gt.f32.partialorder %v3900_v22, 0.0  ;;  %vm1173_vm4 = vcmp.gt.f32.partialorder %v3903_v1, 0.0 }
 0x13d   :  { %v2653_v38 = vpop.eup %2652  ;;  %1780 = vst.msk [vmem:[%s4628_s3 + $0x90] sm:$0xff] %vm1761_vm3, %v1668_v31  ;;  %v1724_v53 = vsel %vm1169_vm11, %v3823_v62, %v2065_v45  ;;  %v1361_v39 = vmul.f32 1.442695, %v1228_v17  ;;  %v3920_v40 = vadd.f32 %v3479_v52, %v656_v5  ;;  %v3923_v19 = vadd.f32 %v3479_v52, %v936_v34  ;;  %v2299_v42 = vpop.f32.mrb[47].mxu0 }
 0x13e   :  { %v2467_v59 = vpop.f32.mrb[47].mxu1  ;;  %v2655_v43 = vpop.eup %2654  ;;  %1836 = vst.msk [vmem:[%s4628_s3 + $0x250] sm:$0xff] %vm1761_vm3, %v1724_v53  ;;  %v2010_v44 = vadd.f32 -1.0, %v2653_v38  ;;  %v1473_v46 = vmul.f32 1.442695, %v1284_v33 }
 0x13f   :  { %v2066_v62 = vadd.f32 -1.0, %v2655_v43  ;;  %2664 = vpow2.f32 %v1361_v39  ;;  %v1229_v26 = vmin.f32 %v3920_v40, 0.0  ;;  %v1285_v49 = vmin.f32 %v3923_v19, 0.0 }
 0x140   :  { %v1669_v47 = vsel %vm1114_vm12, %v3840_v35, %v2010_v44  ;;  %2666 = vpow2.f32 %v1473_v46  ;;  %v661_v16 = vpop.f32.mrb[48].mxu0  ;;  %v941_v50 = vpop.f32.mrb[48].mxu1  ;;  %vm1118_vm5 = vcmp.gt.f32.partialorder %v3920_v40, 0.0  ;;  %vm1174_vm6 = vcmp.gt.f32.partialorder %v3923_v19, 0.0 }
 0x141   :  { %v2657_v55 = vpop.eup %2656  ;;  %1781 = vst.msk [vmem:[%s4628_s3 + $0x98] sm:$0xff] %vm1761_vm3, %v1669_v47  ;;  %v1725_v8 = vsel %vm1170_vm13, %v3843_v15, %v2066_v62  ;;  %v1363_v56 = vmul.f32 1.442695, %v1229_v26  ;;  %v3940_v57 = vadd.f32 %v3479_v52, %v661_v16  ;;  %v3943_v35 = vadd.f32 %v3479_v52, %v941_v50  ;;  %v2302_v60 = vpop.f32.mrb[49].mxu0 }
 0x142   :  { %v2470_v12 = vpop.f32.mrb[49].mxu1  ;;  %v2659_v58 = vpop.eup %2658  ;;  %1837 = vst.msk [vmem:[%s4628_s3 + $0x258] sm:$0xff] %vm1761_vm3, %v1725_v8  ;;  %v2011_v61 = vadd.f32 -1.0, %v2657_v55  ;;  %v1475_v63 = vmul.f32 1.442695, %v1285_v49 }
 0x143   :  { %v2067_v15 = vadd.f32 -1.0, %v2659_v58  ;;  %2668 = vpow2.f32 %v1363_v56  ;;  %v1230_v37 = vmin.f32 %v3940_v57, 0.0  ;;  %v1286_v52 = vmin.f32 %v3943_v35, 0.0 }
 0x144   :  { %v1670_v0 = vsel %vm1115_vm14, %v3860_v51, %v2011_v61  ;;  %2670 = vpow2.f32 %v1475_v63  ;;  %v666_v2 = vpop.f32.mrb[50].mxu0  ;;  %v946_v25 = vpop.f32.mrb[50].mxu1  ;;  %v3962_v51 = vld [vmem:[%s4627_s2] ss:$0 sm:$0xff]  ;;  %vm1119_vm7 = vcmp.gt.f32.partialorder %v3940_v57, 0.0  ;;  %vm1175_vm8 = vcmp.gt.f32.partialorder %v3943_v35, 0.0 }
 0x145   :  { %v2661_v3 = vpop.eup %2660  ;;  %1782 = vst.msk [vmem:[%s4628_s3 + $0xa0] sm:$0xff] %vm1761_vm3, %v1670_v0  ;;  %v1726_v9 = vsel %vm1171_vm15, %v3863_v32, %v2067_v15  ;;  %v1365_v23 = vmul.f32 1.442695, %v1230_v37  ;;  %v3965_v10 = vadd.f32 %v3962_v51, %v666_v2  ;;  %v3968_v11 = vadd.f32 %v3962_v51, %v946_v25  ;;  %v2305_v13 = vpop.f32.mrb[51].mxu0 }
 0x146   :  { %v2473_v29 = vpop.f32.mrb[51].mxu1  ;;  %v2663_v7 = vpop.eup %2662  ;;  %1838 = vst.msk [vmem:[%s4628_s3 + $0x260] sm:$0xff] %vm1761_vm3, %v1726_v9  ;;  %v2012_v32 = vadd.f32 -1.0, %v2661_v3  ;;  %v1477_v14 = vmul.f32 1.442695, %v1286_v52 }
 0x147   :  { %v2068_v6 = vadd.f32 -1.0, %v2663_v7  ;;  %2672 = vpow2.f32 %v1365_v23  ;;  %v1231_v54 = vmin.f32 %v3965_v10, 0.0  ;;  %v1287_v20 = vmin.f32 %v3968_v11, 0.0 }
 0x148   :  { %v1671_v18 = vsel %vm1116_vm0, %v3880_v4, %v2012_v32  ;;  %2674 = vpow2.f32 %v1477_v14  ;;  %v671_v36 = vpop.f32.mrb[52].mxu0  ;;  %v951_v21 = vpop.f32.mrb[52].mxu1  ;;  %vm1120_vm9 = vcmp.gt.f32.partialorder %v3965_v10, 0.0  ;;  %vm1176_vm10 = vcmp.gt.f32.partialorder %v3968_v11, 0.0 }
 0x149   :  { %v2665_v24 = vpop.eup %2664  ;;  %1783 = vst.msk [vmem:[%s4628_s3 + $0xa8] sm:$0xff] %vm1761_vm3, %v1671_v18  ;;  %v1727_v41 = vsel %vm1172_vm1, %v3883_v48, %v2068_v6  ;;  %v1367_v27 = vmul.f32 1.442695, %v1231_v54  ;;  %v3985_v28 = vadd.f32 %v3962_v51, %v671_v36  ;;  %v3988_v4 = vadd.f32 %v3962_v51, %v951_v21  ;;  %v2308_v30 = vpop.f32.mrb[53].mxu0 }
 0x14a   :  { %v2476_v45 = vpop.f32.mrb[53].mxu1  ;;  %v2667_v17 = vpop.eup %2666  ;;  %1839 = vst.msk [vmem:[%s4628_s3 + $0x268] sm:$0xff] %vm1761_vm3, %v1727_v41  ;;  %v2013_v31 = vadd.f32 -1.0, %v2665_v24  ;;  %v1479_v33 = vmul.f32 1.442695, %v1287_v20 }
 0x14b   :  { %v2069_v48 = vadd.f32 -1.0, %v2667_v17  ;;  %2676 = vpow2.f32 %v1367_v27  ;;  %v1232_v5 = vmin.f32 %v3985_v28, 0.0  ;;  %v1288_v38 = vmin.f32 %v3988_v4, 0.0 }
 0x14c   :  { %v1672_v34 = vsel %vm1117_vm2, %v3900_v22, %v2013_v31  ;;  %2678 = vpow2.f32 %v1479_v33  ;;  %v676_v53 = vpop.f32.mrb[54].mxu0  ;;  %v956_v39 = vpop.f32.mrb[54].mxu1  ;;  %vm1121_vm11 = vcmp.gt.f32.partialorder %v3985_v28, 0.0  ;;  %vm1177_vm12 = vcmp.gt.f32.partialorder %v3988_v4, 0.0 }
 0x14d   :  { %v2669_v42 = vpop.eup %2668  ;;  %1784 = vst.msk [vmem:[%s4628_s3 + $0xb0] sm:$0xff] %vm1761_vm3, %v1672_v34  ;;  %v1728_v59 = vsel %vm1173_vm4, %v3903_v1, %v2069_v48  ;;  %v1369_v43 = vmul.f32 1.442695, %v1232_v5  ;;  %v4005_v44 = vadd.f32 %v3962_v51, %v676_v53  ;;  %v4008_v22 = vadd.f32 %v3962_v51, %v956_v39  ;;  %v2311_v46 = vpop.f32.mrb[55].mxu0 }
 0x14e   :  { %v2479_v62 = vpop.f32.mrb[55].mxu1  ;;  %v2671_v26 = vpop.eup %2670  ;;  %1840 = vst.msk [vmem:[%s4628_s3 + $0x270] sm:$0xff] %vm1761_vm3, %v1728_v59  ;;  %v2014_v47 = vadd.f32 -1.0, %v2669_v42  ;;  %v1481_v49 = vmul.f32 1.442695, %v1288_v38 }
 0x14f   :  { %v2070_v1 = vadd.f32 -1.0, %v2671_v26  ;;  %2680 = vpow2.f32 %v1369_v43  ;;  %v1233_v16 = vmin.f32 %v4005_v44, 0.0  ;;  %v1289_v55 = vmin.f32 %v4008_v22, 0.0 }
 0x150   :  { %v1673_v50 = vsel %vm1118_vm5, %v3920_v40, %v2014_v47  ;;  %2682 = vpow2.f32 %v1481_v49  ;;  %v681_v8 = vpop.f32.mrb[56].mxu0  ;;  %v961_v56 = vpop.f32.mrb[56].mxu1  ;;  %vm1122_vm13 = vcmp.gt.f32.partialorder %v4005_v44, 0.0  ;;  %vm1178_vm14 = vcmp.gt.f32.partialorder %v4008_v22, 0.0 }
 0x151   :  { %v2673_v60 = vpop.eup %2672  ;;  %1785 = vst.msk [vmem:[%s4628_s3 + $0xb8] sm:$0xff] %vm1761_vm3, %v1673_v50  ;;  %v1729_v12 = vsel %vm1174_vm6, %v3923_v19, %v2070_v1  ;;  %v1371_v58 = vmul.f32 1.442695, %v1233_v16  ;;  %v4025_v61 = vadd.f32 %v3962_v51, %v681_v8  ;;  %v4028_v40 = vadd.f32 %v3962_v51, %v961_v56  ;;  %v2314_v63 = vpop.f32.mrb[57].mxu0 }
 0x152   :  { %v2482_v15 = vpop.f32.mrb[57].mxu1  ;;  %v2675_v37 = vpop.eup %2674  ;;  %1841 = vst.msk [vmem:[%s4628_s3 + $0x278] sm:$0xff] %vm1761_vm3, %v1729_v12  ;;  %v2015_v0 = vadd.f32 -1.0, %v2673_v60  ;;  %v1483_v52 = vmul.f32 1.442695, %v1289_v55 }
 0x153   :  { %v2071_v19 = vadd.f32 -1.0, %v2675_v37  ;;  %2684 = vpow2.f32 %v1371_v58  ;;  %v1234_v2 = vmin.f32 %v4025_v61, 0.0  ;;  %v1290_v3 = vmin.f32 %v4028_v40, 0.0 }
 0x154   :  { %v1674_v25 = vsel %vm1119_vm7, %v3940_v57, %v2015_v0  ;;  %2686 = vpow2.f32 %v1483_v52  ;;  %v686_v9 = vpop.f32.mrb[58].mxu0  ;;  %v966_v23 = vpop.f32.mrb[58].mxu1  ;;  %vm1123_vm15 = vcmp.gt.f32.partialorder %v4025_v61, 0.0  ;;  %vm1179_vm0 = vcmp.gt.f32.partialorder %v4028_v40, 0.0 }
 0x155   :  { %v2677_v13 = vpop.eup %2676  ;;  %1786 = vst.msk [vmem:[%s4628_s3 + $0xc0] sm:$0xff] %vm1761_vm3, %v1674_v25  ;;  %v1730_v29 = vsel %vm1175_vm8, %v3943_v35, %v2071_v19  ;;  %v1373_v7 = vmul.f32 1.442695, %v1234_v2  ;;  %v4045_v32 = vadd.f32 %v3962_v51, %v686_v9  ;;  %v4048_v57 = vadd.f32 %v3962_v51, %v966_v23  ;;  %v2317_v14 = vpop.f32.mrb[59].mxu0 }
 0x156   :  { %v2485_v6 = vpop.f32.mrb[59].mxu1  ;;  %v2679_v54 = vpop.eup %2678  ;;  %1842 = vst.msk [vmem:[%s4628_s3 + $0x280] sm:$0xff] %vm1761_vm3, %v1730_v29  ;;  %v2016_v18 = vadd.f32 -1.0, %v2677_v13  ;;  %v1485_v20 = vmul.f32 1.442695, %v1290_v3 }
 0x157   :  { %v2072_v35 = vadd.f32 -1.0, %v2679_v54  ;;  %2688 = vpow2.f32 %v1373_v7  ;;  %v1235_v36 = vmin.f32 %v4045_v32, 0.0  ;;  %v1291_v24 = vmin.f32 %v4048_v57, 0.0 }
 0x158   :  { %v1675_v21 = vsel %vm1120_vm9, %v3965_v10, %v2016_v18  ;;  %2690 = vpow2.f32 %v1485_v20  ;;  %v691_v41 = vpop.f32.mrb[60].mxu0  ;;  %v971_v27 = vpop.f32.mrb[60].mxu1  ;;  %vm1124_vm1 = vcmp.gt.f32.partialorder %v4045_v32, 0.0  ;;  %vm1180_vm2 = vcmp.gt.f32.partialorder %v4048_v57, 0.0 }
 0x159   :  { %v2681_v30 = vpop.eup %2680  ;;  %1787 = vst.msk [vmem:[%s4628_s3 + $0xc8] sm:$0xff] %vm1761_vm3, %v1675_v21  ;;  %v1731_v45 = vsel %vm1176_vm10, %v3968_v11, %v2072_v35  ;;  %v1375_v17 = vmul.f32 1.442695, %v1235_v36  ;;  %v4065_v31 = vadd.f32 %v3962_v51, %v691_v41  ;;  %v4068_v10 = vadd.f32 %v3962_v51, %v971_v27  ;;  %v2320_v33 = vpop.f32.mrb[61].mxu0 }
 0x15a   :  { %v2488_v48 = vpop.f32.mrb[61].mxu1  ;;  %v2683_v5 = vpop.eup %2682  ;;  %1843 = vst.msk [vmem:[%s4628_s3 + $0x288] sm:$0xff] %vm1761_vm3, %v1731_v45  ;;  %v2017_v34 = vadd.f32 -1.0, %v2681_v30  ;;  %v1487_v38 = vmul.f32 1.442695, %v1291_v24 }
 0x15b   :  { %v2073_v11 = vadd.f32 -1.0, %v2683_v5  ;;  %2692 = vpow2.f32 %v1375_v17  ;;  %v1236_v53 = vmin.f32 %v4065_v31, 0.0  ;;  %v1292_v42 = vmin.f32 %v4068_v10, 0.0 }
 0x15c   :  { %v1676_v39 = vsel %vm1121_vm11, %v3985_v28, %v2017_v34  ;;  %2694 = vpow2.f32 %v1487_v38  ;;  %v696_v59 = vpop.f32.mrb[62].mxu0  ;;  %v976_v43 = vpop.f32.mrb[62].mxu1  ;;  %vm1125_vm4 = vcmp.gt.f32.partialorder %v4065_v31, 0.0  ;;  %vm1181_vm5 = vcmp.gt.f32.partialorder %v4068_v10, 0.0 }
 0x15d   :  { %v2685_v46 = vpop.eup %2684  ;;  %1788 = vst.msk [vmem:[%s4628_s3 + $0xd0] sm:$0xff] %vm1761_vm3, %v1676_v39  ;;  %v1732_v62 = vsel %vm1177_vm12, %v3988_v4, %v2073_v11  ;;  %v1377_v26 = vmul.f32 1.442695, %v1236_v53  ;;  %v4085_v47 = vadd.f32 %v3962_v51, %v696_v59  ;;  %v4088_v28 = vadd.f32 %v3962_v51, %v976_v43  ;;  %v2323_v49 = vpop.f32.mrb[63].mxu0 }
 0x15e   :  { %v2491_v1 = vpop.f32.mrb[63].mxu1  ;;  %v2687_v16 = vpop.eup %2686  ;;  %1844 = vst.msk [vmem:[%s4628_s3 + $0x290] sm:$0xff] %vm1761_vm3, %v1732_v62  ;;  %v2018_v50 = vadd.f32 -1.0, %v2685_v46  ;;  %v1489_v55 = vmul.f32 1.442695, %v1292_v42 }
 0x15f   :  { %v2074_v4 = vadd.f32 -1.0, %v2687_v16  ;;  %2696 = vpow2.f32 %v1377_v26  ;;  %v1237_v8 = vmin.f32 %v4085_v47, 0.0  ;;  %v1293_v60 = vmin.f32 %v4088_v28, 0.0 }
 0x160   :  { %v1677_v56 = vsel %vm1122_vm13, %v4005_v44, %v2018_v50  ;;  %2698 = vpow2.f32 %v1489_v55  ;;  %v701_v12 = vpop.f32.mrb[64].mxu0  ;;  %v981_v58 = vpop.f32.mrb[64].mxu1  ;;  %vm1126_vm6 = vcmp.gt.f32.partialorder %v4085_v47, 0.0  ;;  %vm1182_vm7 = vcmp.gt.f32.partialorder %v4088_v28, 0.0 }
 0x161   :  { %v2689_v63 = vpop.eup %2688  ;;  %1789 = vst.msk [vmem:[%s4628_s3 + $0xd8] sm:$0xff] %vm1761_vm3, %v1677_v56  ;;  %v1733_v15 = vsel %vm1178_vm14, %v4008_v22, %v2074_v4  ;;  %v1379_v37 = vmul.f32 1.442695, %v1237_v8  ;;  %v4105_v0 = vadd.f32 %v3962_v51, %v701_v12  ;;  %v4108_v44 = vadd.f32 %v3962_v51, %v981_v58  ;;  %v2326_v52 = vpop.f32.mrb[65].mxu0 }
 0x162   :  { %v2494_v19 = vpop.f32.mrb[65].mxu1  ;;  %v2691_v2 = vpop.eup %2690  ;;  %1845 = vst.msk [vmem:[%s4628_s3 + $0x298] sm:$0xff] %vm1761_vm3, %v1733_v15  ;;  %v2019_v25 = vadd.f32 -1.0, %v2689_v63  ;;  %v1491_v3 = vmul.f32 1.442695, %v1293_v60 }
 0x163   :  { %v2075_v22 = vadd.f32 -1.0, %v2691_v2  ;;  %2700 = vpow2.f32 %v1379_v37  ;;  %v1238_v9 = vmin.f32 %v4105_v0, 0.0  ;;  %v1294_v13 = vmin.f32 %v4108_v44, 0.0 }
 0x164   :  { %v1678_v23 = vsel %vm1123_vm15, %v4025_v61, %v2019_v25  ;;  %2702 = vpow2.f32 %v1491_v3  ;;  %v706_v29 = vpop.f32.mrb[66].mxu0  ;;  %v986_v7 = vpop.f32.mrb[66].mxu1  ;;  %vm1127_vm8 = vcmp.gt.f32.partialorder %v4105_v0, 0.0  ;;  %vm1183_vm9 = vcmp.gt.f32.partialorder %v4108_v44, 0.0 }
 0x165   :  { %v2693_v14 = vpop.eup %2692  ;;  %1790 = vst.msk [vmem:[%s4628_s3 + $0xe0] sm:$0xff] %vm1761_vm3, %v1678_v23  ;;  %v1734_v6 = vsel %vm1179_vm0, %v4028_v40, %v2075_v22  ;;  %v1381_v54 = vmul.f32 1.442695, %v1238_v9  ;;  %v4125_v18 = vadd.f32 %v3962_v51, %v706_v29  ;;  %v4128_v61 = vadd.f32 %v3962_v51, %v986_v7  ;;  %v2329_v20 = vpop.f32.mrb[67].mxu0 }
 0x166   :  { %v2497_v35 = vpop.f32.mrb[67].mxu1  ;;  %v2695_v36 = vpop.eup %2694  ;;  %1846 = vst.msk [vmem:[%s4628_s3 + $0x2a0] sm:$0xff] %vm1761_vm3, %v1734_v6  ;;  %v2020_v21 = vadd.f32 -1.0, %v2693_v14  ;;  %v1493_v24 = vmul.f32 1.442695, %v1294_v13 }
 0x167   :  { %v2076_v40 = vadd.f32 -1.0, %v2695_v36  ;;  %2704 = vpow2.f32 %v1381_v54  ;;  %v1239_v41 = vmin.f32 %v4125_v18, 0.0  ;;  %v1295_v30 = vmin.f32 %v4128_v61, 0.0 }
 0x168   :  { %v1679_v27 = vsel %vm1124_vm1, %v4045_v32, %v2020_v21  ;;  %2706 = vpow2.f32 %v1493_v24  ;;  %v711_v45 = vpop.f32.mrb[68].mxu0  ;;  %v991_v17 = vpop.f32.mrb[68].mxu1  ;;  %vm1128_vm10 = vcmp.gt.f32.partialorder %v4125_v18, 0.0  ;;  %vm1184_vm11 = vcmp.gt.f32.partialorder %v4128_v61, 0.0 }
 0x169   :  { %v2697_v33 = vpop.eup %2696  ;;  %1791 = vst.msk [vmem:[%s4628_s3 + $0xe8] sm:$0xff] %vm1761_vm3, %v1679_v27  ;;  %v1735_v48 = vsel %vm1180_vm2, %v4048_v57, %v2076_v40  ;;  %v1383_v5 = vmul.f32 1.442695, %v1239_v41  ;;  %v4145_v34 = vadd.f32 %v3962_v51, %v711_v45  ;;  %v4148_v32 = vadd.f32 %v3962_v51, %v991_v17  ;;  %v2332_v38 = vpop.f32.mrb[69].mxu0 }
 0x16a   :  { %v2500_v11 = vpop.f32.mrb[69].mxu1  ;;  %v2699_v53 = vpop.eup %2698  ;;  %1847 = vst.msk [vmem:[%s4628_s3 + $0x2a8] sm:$0xff] %vm1761_vm3, %v1735_v48  ;;  %v2021_v39 = vadd.f32 -1.0, %v2697_v33  ;;  %v1495_v42 = vmul.f32 1.442695, %v1295_v30 }
 0x16b   :  { %v2077_v57 = vadd.f32 -1.0, %v2699_v53  ;;  %2708 = vpow2.f32 %v1383_v5  ;;  %v1240_v59 = vmin.f32 %v4145_v34, 0.0  ;;  %v1296_v46 = vmin.f32 %v4148_v32, 0.0 }
 0x16c   :  { %v1680_v43 = vsel %vm1125_vm4, %v4065_v31, %v2021_v39  ;;  %2710 = vpow2.f32 %v1495_v42  ;;  %v716_v62 = vpop.f32.mrb[70].mxu0  ;;  %v996_v26 = vpop.f32.mrb[70].mxu1  ;;  %vm1129_vm12 = vcmp.gt.f32.partialorder %v4145_v34, 0.0  ;;  %vm1185_vm13 = vcmp.gt.f32.partialorder %v4148_v32, 0.0 }
 0x16d   :  { %v2701_v49 = vpop.eup %2700  ;;  %1792 = vst.msk [vmem:[%s4628_s3 + $0xf0] sm:$0xff] %vm1761_vm3, %v1680_v43  ;;  %v1736_v1 = vsel %vm1181_vm5, %v4068_v10, %v2077_v57  ;;  %v1385_v16 = vmul.f32 1.442695, %v1240_v59  ;;  %v4165_v50 = vadd.f32 %v3962_v51, %v716_v62  ;;  %v4168_v31 = vadd.f32 %v3962_v51, %v996_v26  ;;  %v2335_v55 = vpop.f32.mrb[71].mxu0 }
 0x16e   :  { %v2503_v4 = vpop.f32.mrb[71].mxu1  ;;  %v2703_v8 = vpop.eup %2702  ;;  %1848 = vst.msk [vmem:[%s4628_s3 + $0x2b0] sm:$0xff] %vm1761_vm3, %v1736_v1  ;;  %v2022_v56 = vadd.f32 -1.0, %v2701_v49  ;;  %v1497_v60 = vmul.f32 1.442695, %v1296_v46 }
 0x16f   :  { %v2078_v10 = vadd.f32 -1.0, %v2703_v8  ;;  %2712 = vpow2.f32 %v1385_v16  ;;  %v1241_v12 = vmin.f32 %v4165_v50, 0.0  ;;  %v1297_v63 = vmin.f32 %v4168_v31, 0.0 }
 0x170   :  { %v1681_v58 = vsel %vm1126_vm6, %v4085_v47, %v2022_v56  ;;  %2714 = vpow2.f32 %v1497_v60  ;;  %v721_v15 = vpop.f32.mrb[72].mxu0  ;;  %v1001_v37 = vpop.f32.mrb[72].mxu1  ;;  %vm1130_vm14 = vcmp.gt.f32.partialorder %v4165_v50, 0.0  ;;  %vm1186_vm15 = vcmp.gt.f32.partialorder %v4168_v31, 0.0 }
 0x171   :  { %v2705_v52 = vpop.eup %2704  ;;  %1793 = vst.msk [vmem:[%s4628_s3 + $0xf8] sm:$0xff] %vm1761_vm3, %v1681_v58  ;;  %v1737_v19 = vsel %vm1182_vm7, %v4088_v28, %v2078_v10  ;;  %v1387_v2 = vmul.f32 1.442695, %v1241_v12  ;;  %v4185_v25 = vadd.f32 %v3962_v51, %v721_v15  ;;  %v4188_v47 = vadd.f32 %v3962_v51, %v1001_v37  ;;  %v2338_v3 = vpop.f32.mrb[73].mxu0 }
 0x172   :  { %v2506_v22 = vpop.f32.mrb[73].mxu1  ;;  %v2707_v9 = vpop.eup %2706  ;;  %1849 = vst.msk [vmem:[%s4628_s3 + $0x2b8] sm:$0xff] %vm1761_vm3, %v1737_v19  ;;  %v2023_v23 = vadd.f32 -1.0, %v2705_v52  ;;  %v1499_v13 = vmul.f32 1.442695, %v1297_v63 }
 0x173   :  { %v2079_v28 = vadd.f32 -1.0, %v2707_v9  ;;  %2716 = vpow2.f32 %v1387_v2  ;;  %v1242_v29 = vmin.f32 %v4185_v25, 0.0  ;;  %v1298_v14 = vmin.f32 %v4188_v47, 0.0 }
 0x174   :  { %v1682_v7 = vsel %vm1127_vm8, %v4105_v0, %v2023_v23  ;;  %2718 = vpow2.f32 %v1499_v13  ;;  %v726_v6 = vpop.f32.mrb[74].mxu0  ;;  %v1006_v54 = vpop.f32.mrb[74].mxu1  ;;  %vm1131_vm0 = vcmp.gt.f32.partialorder %v4185_v25, 0.0  ;;  %vm1187_vm1 = vcmp.gt.f32.partialorder %v4188_v47, 0.0 }
 0x175   :  { %v2709_v20 = vpop.eup %2708  ;;  %1794 = vst.msk [vmem:[%s4628_s3 + $0x100] sm:$0xff] %vm1761_vm3, %v1682_v7  ;;  %v1738_v35 = vsel %vm1183_vm9, %v4108_v44, %v2079_v28  ;;  %v1389_v36 = vmul.f32 1.442695, %v1242_v29  ;;  %v4205_v21 = vadd.f32 %v3962_v51, %v726_v6  ;;  %v4208_v0 = vadd.f32 %v3962_v51, %v1006_v54  ;;  %v2341_v24 = vpop.f32.mrb[75].mxu0 }
 0x176   :  { %v2509_v40 = vpop.f32.mrb[75].mxu1  ;;  %v2711_v41 = vpop.eup %2710  ;;  %1850 = vst.msk [vmem:[%s4628_s3 + $0x2c0] sm:$0xff] %vm1761_vm3, %v1738_v35  ;;  %v2024_v27 = vadd.f32 -1.0, %v2709_v20  ;;  %v1501_v30 = vmul.f32 1.442695, %v1298_v14 }
 0x177   :  { %v2080_v44 = vadd.f32 -1.0, %v2711_v41  ;;  %2720 = vpow2.f32 %v1389_v36  ;;  %v1243_v45 = vmin.f32 %v4205_v21, 0.0  ;;  %v1299_v33 = vmin.f32 %v4208_v0, 0.0 }
 0x178   :  { %v1683_v17 = vsel %vm1128_vm10, %v4125_v18, %v2024_v27  ;;  %2722 = vpow2.f32 %v1501_v30  ;;  %v731_v48 = vpop.f32.mrb[76].mxu0  ;;  %v1011_v5 = vpop.f32.mrb[76].mxu1  ;;  %vm1132_vm2 = vcmp.gt.f32.partialorder %v4205_v21, 0.0  ;;  %vm1188_vm4 = vcmp.gt.f32.partialorder %v4208_v0, 0.0 }
 0x179   :  { %v2713_v38 = vpop.eup %2712  ;;  %1795 = vst.msk [vmem:[%s4628_s3 + $0x108] sm:$0xff] %vm1761_vm3, %v1683_v17  ;;  %v1739_v11 = vsel %vm1184_vm11, %v4128_v61, %v2080_v44  ;;  %v1391_v53 = vmul.f32 1.442695, %v1243_v45  ;;  %v4225_v39 = vadd.f32 %v3962_v51, %v731_v48  ;;  %v4228_v18 = vadd.f32 %v3962_v51, %v1011_v5  ;;  %v2344_v42 = vpop.f32.mrb[77].mxu0 }
 0x17a   :  { %v2512_v57 = vpop.f32.mrb[77].mxu1  ;;  %v2715_v59 = vpop.eup %2714  ;;  %1851 = vst.msk [vmem:[%s4628_s3 + $0x2c8] sm:$0xff] %vm1761_vm3, %v1739_v11  ;;  %v2025_v43 = vadd.f32 -1.0, %v2713_v38  ;;  %v1503_v46 = vmul.f32 1.442695, %v1299_v33 }
 0x17b   :  { %v2081_v61 = vadd.f32 -1.0, %v2715_v59  ;;  %2724 = vpow2.f32 %v1391_v53  ;;  %v1244_v62 = vmin.f32 %v4225_v39, 0.0  ;;  %v1300_v49 = vmin.f32 %v4228_v18, 0.0 }
 0x17c   :  { %v1684_v26 = vsel %vm1129_vm12, %v4145_v34, %v2025_v43  ;;  %2726 = vpow2.f32 %v1503_v46  ;;  %v736_v1 = vpop.f32.mrb[78].mxu0  ;;  %v1016_v16 = vpop.f32.mrb[78].mxu1  ;;  %vm1133_vm5 = vcmp.gt.f32.partialorder %v4225_v39, 0.0  ;;  %vm1189_vm6 = vcmp.gt.f32.partialorder %v4228_v18, 0.0 }
 0x17d   :  { %v2717_v55 = vpop.eup %2716  ;;  %1796 = vst.msk [vmem:[%s4628_s3 + $0x110] sm:$0xff] %vm1761_vm3, %v1684_v26  ;;  %v1740_v4 = vsel %vm1185_vm13, %v4148_v32, %v2081_v61  ;;  %v1393_v8 = vmul.f32 1.442695, %v1244_v62  ;;  %v4245_v56 = vadd.f32 %v3962_v51, %v736_v1  ;;  %v4248_v34 = vadd.f32 %v3962_v51, %v1016_v16  ;;  %v2347_v60 = vpop.f32.mrb[79].mxu0 }
 0x17e   :  { %v2515_v10 = vpop.f32.mrb[79].mxu1  ;;  %v2719_v12 = vpop.eup %2718  ;;  %1852 = vst.msk [vmem:[%s4628_s3 + $0x2d0] sm:$0xff] %vm1761_vm3, %v1740_v4  ;;  %v2026_v58 = vadd.f32 -1.0, %v2717_v55  ;;  %v1505_v63 = vmul.f32 1.442695, %v1300_v49 }
 0x17f   :  { %v2082_v32 = vadd.f32 -1.0, %v2719_v12  ;;  %2728 = vpow2.f32 %v1393_v8  ;;  %v1245_v15 = vmin.f32 %v4245_v56, 0.0  ;;  %v1301_v52 = vmin.f32 %v4248_v34, 0.0 }
 0x180   :  { %v1685_v37 = vsel %vm1130_vm14, %v4165_v50, %v2026_v58  ;;  %2730 = vpow2.f32 %v1505_v63  ;;  %v741_v19 = vpop.f32.mrb[80].mxu0  ;;  %v1021_v2 = vpop.f32.mrb[80].mxu1  ;;  %vm1134_vm7 = vcmp.gt.f32.partialorder %v4245_v56, 0.0  ;;  %vm1190_vm8 = vcmp.gt.f32.partialorder %v4248_v34, 0.0 }
 0x181   :  { %v2721_v3 = vpop.eup %2720  ;;  %1797 = vst.msk [vmem:[%s4628_s3 + $0x118] sm:$0xff] %vm1761_vm3, %v1685_v37  ;;  %v1741_v22 = vsel %vm1186_vm15, %v4168_v31, %v2082_v32  ;;  %v1395_v9 = vmul.f32 1.442695, %v1245_v15  ;;  %v4265_v23 = vadd.f32 %v3962_v51, %v741_v19  ;;  %v4268_v50 = vadd.f32 %v3962_v51, %v1021_v2  ;;  %v2350_v13 = vpop.f32.mrb[81].mxu0 }
 0x182   :  { %v2518_v28 = vpop.f32.mrb[81].mxu1  ;;  %v2723_v29 = vpop.eup %2722  ;;  %1853 = vst.msk [vmem:[%s4628_s3 + $0x2d8] sm:$0xff] %vm1761_vm3, %v1741_v22  ;;  %v2027_v7 = vadd.f32 -1.0, %v2721_v3  ;;  %v1507_v14 = vmul.f32 1.442695, %v1301_v52 }
 0x183   :  { %v2083_v31 = vadd.f32 -1.0, %v2723_v29  ;;  %2732 = vpow2.f32 %v1395_v9  ;;  %v1246_v6 = vmin.f32 %v4265_v23, 0.0  ;;  %v1302_v20 = vmin.f32 %v4268_v50, 0.0 }
 0x184   :  { %v1686_v54 = vsel %vm1131_vm0, %v4185_v25, %v2027_v7  ;;  %2734 = vpow2.f32 %v1507_v14  ;;  %v746_v35 = vpop.f32.mrb[82].mxu0  ;;  %v1026_v36 = vpop.f32.mrb[82].mxu1  ;;  %vm1135_vm9 = vcmp.gt.f32.partialorder %v4265_v23, 0.0  ;;  %vm1191_vm10 = vcmp.gt.f32.partialorder %v4268_v50, 0.0 }
 0x185   :  { %v2725_v24 = vpop.eup %2724  ;;  %1798 = vst.msk [vmem:[%s4628_s3 + $0x120] sm:$0xff] %vm1761_vm3, %v1686_v54  ;;  %v1742_v40 = vsel %vm1187_vm1, %v4188_v47, %v2083_v31  ;;  %v1397_v41 = vmul.f32 1.442695, %v1246_v6  ;;  %v4285_v27 = vadd.f32 %v3962_v51, %v746_v35  ;;  %v4288_v25 = vadd.f32 %v3962_v51, %v1026_v36  ;;  %v2353_v30 = vpop.f32.mrb[83].mxu0 }
 0x186   :  { %v2521_v44 = vpop.f32.mrb[83].mxu1  ;;  %v2727_v45 = vpop.eup %2726  ;;  %1854 = vst.msk [vmem:[%s4628_s3 + $0x2e0] sm:$0xff] %vm1761_vm3, %v1742_v40  ;;  %v2028_v17 = vadd.f32 -1.0, %v2725_v24  ;;  %v1509_v33 = vmul.f32 1.442695, %v1302_v20 }
 0x187   :  { %v2084_v47 = vadd.f32 -1.0, %v2727_v45  ;;  %2736 = vpow2.f32 %v1397_v41  ;;  %v1247_v48 = vmin.f32 %v4285_v27, 0.0  ;;  %v1303_v38 = vmin.f32 %v4288_v25, 0.0 }
 0x188   :  { %v1687_v5 = vsel %vm1132_vm2, %v4205_v21, %v2028_v17  ;;  %2738 = vpow2.f32 %v1509_v33  ;;  %v751_v11 = vpop.f32.mrb[84].mxu0  ;;  %v1031_v53 = vpop.f32.mrb[84].mxu1  ;;  %vm1136_vm11 = vcmp.gt.f32.partialorder %v4285_v27, 0.0  ;;  %vm1192_vm12 = vcmp.gt.f32.partialorder %v4288_v25, 0.0 }
 0x189   :  { %v2729_v42 = vpop.eup %2728  ;;  %1799 = vst.msk [vmem:[%s4628_s3 + $0x128] sm:$0xff] %vm1761_vm3, %v1687_v5  ;;  %v1743_v57 = vsel %vm1188_vm4, %v4208_v0, %v2084_v47  ;;  %v1399_v59 = vmul.f32 1.442695, %v1247_v48  ;;  %v4305_v43 = vadd.f32 %v3962_v51, %v751_v11  ;;  %v4308_v21 = vadd.f32 %v3962_v51, %v1031_v53  ;;  %v2356_v46 = vpop.f32.mrb[85].mxu0 }
 0x18a   :  { %v2524_v61 = vpop.f32.mrb[85].mxu1  ;;  %v2731_v62 = vpop.eup %2730  ;;  %1855 = vst.msk [vmem:[%s4628_s3 + $0x2e8] sm:$0xff] %vm1761_vm3, %v1743_v57  ;;  %v2029_v26 = vadd.f32 -1.0, %v2729_v42  ;;  %v1511_v49 = vmul.f32 1.442695, %v1303_v38 }
 0x18b   :  { %v2085_v0 = vadd.f32 -1.0, %v2731_v62  ;;  %2740 = vpow2.f32 %v1399_v59  ;;  %v1248_v1 = vmin.f32 %v4305_v43, 0.0  ;;  %v1304_v55 = vmin.f32 %v4308_v21, 0.0 }
 0x18c   :  { %v1688_v16 = vsel %vm1133_vm5, %v4225_v39, %v2029_v26  ;;  %2742 = vpow2.f32 %v1511_v49  ;;  %v756_v4 = vpop.f32.mrb[86].mxu0  ;;  %v1036_v8 = vpop.f32.mrb[86].mxu1  ;;  %vm1137_vm13 = vcmp.gt.f32.partialorder %v4305_v43, 0.0  ;;  %vm1193_vm14 = vcmp.gt.f32.partialorder %v4308_v21, 0.0 }
 0x18d   :  { %v2733_v60 = vpop.eup %2732  ;;  %1800 = vst.msk [vmem:[%s4628_s3 + $0x130] sm:$0xff] %vm1761_vm3, %v1688_v16  ;;  %v1744_v10 = vsel %vm1189_vm6, %v4228_v18, %v2085_v0  ;;  %v1401_v12 = vmul.f32 1.442695, %v1248_v1  ;;  %v4325_v58 = vadd.f32 %v3962_v51, %v756_v4  ;;  %v4328_v39 = vadd.f32 %v3962_v51, %v1036_v8  ;;  %v2359_v63 = vpop.f32.mrb[87].mxu0 }
 0x18e   :  { %v2527_v32 = vpop.f32.mrb[87].mxu1  ;;  %v2735_v15 = vpop.eup %2734  ;;  %1856 = vst.msk [vmem:[%s4628_s3 + $0x2f0] sm:$0xff] %vm1761_vm3, %v1744_v10  ;;  %v2030_v37 = vadd.f32 -1.0, %v2733_v60  ;;  %v1513_v52 = vmul.f32 1.442695, %v1304_v55 }
 0x18f   :  { %v2086_v18 = vadd.f32 -1.0, %v2735_v15  ;;  %2744 = vpow2.f32 %v1401_v12  ;;  %v1249_v19 = vmin.f32 %v4325_v58, 0.0  ;;  %v1305_v3 = vmin.f32 %v4328_v39, 0.0 }
 0x190   :  { %v1689_v2 = vsel %vm1134_vm7, %v4245_v56, %v2030_v37  ;;  %2746 = vpow2.f32 %v1513_v52  ;;  %v761_v22 = vpop.f32.mrb[88].mxu0  ;;  %v1041_v9 = vpop.f32.mrb[88].mxu1  ;;  %vm1138_vm15 = vcmp.gt.f32.partialorder %v4325_v58, 0.0  ;;  %vm1194_vm0 = vcmp.gt.f32.partialorder %v4328_v39, 0.0 }
 0x191   :  { %v2737_v13 = vpop.eup %2736  ;;  %1801 = vst.msk [vmem:[%s4628_s3 + $0x138] sm:$0xff] %vm1761_vm3, %v1689_v2  ;;  %v1745_v28 = vsel %vm1190_vm8, %v4248_v34, %v2086_v18  ;;  %v1403_v29 = vmul.f32 1.442695, %v1249_v19  ;;  %v4345_v7 = vadd.f32 %v3962_v51, %v761_v22  ;;  %v4348_v56 = vadd.f32 %v3962_v51, %v1041_v9  ;;  %v2362_v14 = vpop.f32.mrb[89].mxu0 }
 0x192   :  { %v2530_v31 = vpop.f32.mrb[89].mxu1  ;;  %v2739_v6 = vpop.eup %2738  ;;  %1857 = vst.msk [vmem:[%s4628_s3 + $0x2f8] sm:$0xff] %vm1761_vm3, %v1745_v28  ;;  %v2031_v54 = vadd.f32 -1.0, %v2737_v13  ;;  %v1515_v20 = vmul.f32 1.442695, %v1305_v3 }
 0x193   :  { %v2087_v34 = vadd.f32 -1.0, %v2739_v6  ;;  %2748 = vpow2.f32 %v1403_v29  ;;  %v1250_v35 = vmin.f32 %v4345_v7, 0.0  ;;  %v1306_v24 = vmin.f32 %v4348_v56, 0.0 }
 0x194   :  { %v1690_v36 = vsel %vm1135_vm9, %v4265_v23, %v2031_v54  ;;  %2750 = vpow2.f32 %v1515_v20  ;;  %v766_v40 = vpop.f32.mrb[90].mxu0  ;;  %v1046_v41 = vpop.f32.mrb[90].mxu1  ;;  %vm1139_vm1 = vcmp.gt.f32.partialorder %v4345_v7, 0.0  ;;  %vm1195_vm2 = vcmp.gt.f32.partialorder %v4348_v56, 0.0 }
 0x195   :  { %v2741_v30 = vpop.eup %2740  ;;  %1802 = vst.msk [vmem:[%s4628_s3 + $0x140] sm:$0xff] %vm1761_vm3, %v1690_v36  ;;  %v1746_v44 = vsel %vm1191_vm10, %v4268_v50, %v2087_v34  ;;  %v1405_v45 = vmul.f32 1.442695, %v1250_v35  ;;  %v4365_v17 = vadd.f32 %v3962_v51, %v766_v40  ;;  %v4368_v23 = vadd.f32 %v3962_v51, %v1046_v41  ;;  %v2365_v33 = vpop.f32.mrb[91].mxu0 }
 0x196   :  { %v2533_v47 = vpop.f32.mrb[91].mxu1  ;;  %v2743_v48 = vpop.eup %2742  ;;  %1858 = vst.msk [vmem:[%s4628_s3 + $0x300] sm:$0xff] %vm1761_vm3, %v1746_v44  ;;  %v2032_v5 = vadd.f32 -1.0, %v2741_v30  ;;  %v1517_v38 = vmul.f32 1.442695, %v1306_v24 }
 0x197   :  { %v2088_v50 = vadd.f32 -1.0, %v2743_v48  ;;  %2752 = vpow2.f32 %v1405_v45  ;;  %v1251_v11 = vmin.f32 %v4365_v17, 0.0  ;;  %v1307_v42 = vmin.f32 %v4368_v23, 0.0 }
 0x198   :  { %v1691_v53 = vsel %vm1136_vm11, %v4285_v27, %v2032_v5  ;;  %2754 = vpow2.f32 %v1517_v38  ;;  %v771_v57 = vpop.f32.mrb[92].mxu0  ;;  %v1051_v59 = vpop.f32.mrb[92].mxu1  ;;  %vm1140_vm4 = vcmp.gt.f32.partialorder %v4365_v17, 0.0  ;;  %vm1196_vm5 = vcmp.gt.f32.partialorder %v4368_v23, 0.0 }
 0x199   :  { %v2745_v46 = vpop.eup %2744  ;;  %1803 = vst.msk [vmem:[%s4628_s3 + $0x148] sm:$0xff] %vm1761_vm3, %v1691_v53  ;;  %v1747_v61 = vsel %vm1192_vm12, %v4288_v25, %v2088_v50  ;;  %v1407_v62 = vmul.f32 1.442695, %v1251_v11  ;;  %v4385_v26 = vadd.f32 %v3962_v51, %v771_v57  ;;  %v4388_v27 = vadd.f32 %v3962_v51, %v1051_v59  ;;  %v2368_v49 = vpop.f32.mrb[93].mxu0 }
 0x19a   :  { %v2536_v0 = vpop.f32.mrb[93].mxu1  ;;  %v2747_v1 = vpop.eup %2746  ;;  %1859 = vst.msk [vmem:[%s4628_s3 + $0x308] sm:$0xff] %vm1761_vm3, %v1747_v61  ;;  %v2033_v16 = vadd.f32 -1.0, %v2745_v46  ;;  %v1519_v55 = vmul.f32 1.442695, %v1307_v42 }
 0x19b   :  { %v2089_v25 = vadd.f32 -1.0, %v2747_v1  ;;  %2756 = vpow2.f32 %v1407_v62  ;;  %v1252_v4 = vmin.f32 %v4385_v26, 0.0  ;;  %v1308_v60 = vmin.f32 %v4388_v27, 0.0 }
 0x19c   :  { %v1692_v8 = vsel %vm1137_vm13, %v4305_v43, %v2033_v16  ;;  %2758 = vpow2.f32 %v1519_v55  ;;  %v776_v10 = vpop.f32.mrb[94].mxu0  ;;  %v1056_v12 = vpop.f32.mrb[94].mxu1  ;;  %vm1141_vm6 = vcmp.gt.f32.partialorder %v4385_v26, 0.0  ;;  %vm1197_vm7 = vcmp.gt.f32.partialorder %v4388_v27, 0.0 }
 0x19d   :  { %v2749_v63 = vpop.eup %2748  ;;  %1804 = vst.msk [vmem:[%s4628_s3 + $0x150] sm:$0xff] %vm1761_vm3, %v1692_v8  ;;  %v1748_v32 = vsel %vm1193_vm14, %v4308_v21, %v2089_v25  ;;  %v1409_v15 = vmul.f32 1.442695, %v1252_v4  ;;  %v4405_v37 = vadd.f32 %v3962_v51, %v776_v10  ;;  %v4408_v43 = vadd.f32 %v3962_v51, %v1056_v12  ;;  %v2371_v52 = vpop.f32.mrb[95].mxu0 }
 0x19e   :  { %v2539_v18 = vpop.f32.mrb[95].mxu1  ;;  %v2751_v19 = vpop.eup %2750  ;;  %1860 = vst.msk [vmem:[%s4628_s3 + $0x310] sm:$0xff] %vm1761_vm3, %v1748_v32  ;;  %v2034_v2 = vadd.f32 -1.0, %v2749_v63  ;;  %v1521_v3 = vmul.f32 1.442695, %v1308_v60 }
 0x19f   :  { %v2090_v21 = vadd.f32 -1.0, %v2751_v19  ;;  %2760 = vpow2.f32 %v1409_v15  ;;  %v1253_v22 = vmin.f32 %v4405_v37, 0.0  ;;  %v1309_v13 = vmin.f32 %v4408_v43, 0.0 }
 0x1a0   :  { %v1693_v9 = vsel %vm1138_vm15, %v4325_v58, %v2034_v2  ;;  %2762 = vpow2.f32 %v1521_v3  ;;  %v781_v28 = vpop.f32.mrb[96].mxu0  ;;  %v1061_v29 = vpop.f32.mrb[96].mxu1  ;;  %vm1142_vm8 = vcmp.gt.f32.partialorder %v4405_v37, 0.0  ;;  %vm1198_vm9 = vcmp.gt.f32.partialorder %v4408_v43, 0.0 }
 0x1a1   :  { %v2753_v14 = vpop.eup %2752  ;;  %1805 = vst.msk [vmem:[%s4628_s3 + $0x158] sm:$0xff] %vm1761_vm3, %v1693_v9  ;;  %v1749_v31 = vsel %vm1194_vm0, %v4328_v39, %v2090_v21  ;;  %v1411_v6 = vmul.f32 1.442695, %v1253_v22  ;;  %v4425_v54 = vadd.f32 %v3962_v51, %v781_v28  ;;  %v4428_v58 = vadd.f32 %v3962_v51, %v1061_v29  ;;  %v2374_v20 = vpop.f32.mrb[97].mxu0 }
 0x1a2   :  { %v2542_v34 = vpop.f32.mrb[97].mxu1  ;;  %v2755_v35 = vpop.eup %2754  ;;  %1861 = vst.msk [vmem:[%s4628_s3 + $0x318] sm:$0xff] %vm1761_vm3, %v1749_v31  ;;  %v2035_v36 = vadd.f32 -1.0, %v2753_v14  ;;  %v1523_v24 = vmul.f32 1.442695, %v1309_v13 }
 0x1a3   :  { %v2091_v39 = vadd.f32 -1.0, %v2755_v35  ;;  %2764 = vpow2.f32 %v1411_v6  ;;  %v1254_v40 = vmin.f32 %v4425_v54, 0.0  ;;  %v1310_v51 = vmin.f32 %v4428_v58, 0.0 }
 0x1a4   :  { %v1694_v41 = vsel %vm1139_vm1, %v4345_v7, %v2035_v36  ;;  %2766 = vpow2.f32 %v1523_v24  ;;  %v786_v30 = vpop.f32.mrb[98].mxu0  ;;  %v1066_v44 = vpop.f32.mrb[98].mxu1  ;;  %v4447_v7 = vld [vmem:[%s4627_s2] ss:$0 sm:$0xff]  ;;  %vm1143_vm10 = vcmp.gt.f32.partialorder %v4425_v54, 0.0  ;;  %vm1199_vm11 = vcmp.gt.f32.partialorder %v4428_v58, 0.0 }
 0x1a5   :  { %v2757_v45 = vpop.eup %2756  ;;  %1806 = vst.msk [vmem:[%s4628_s3 + $0x160] sm:$0xff] %vm1761_vm3, %v1694_v41  ;;  %v1750_v33 = vsel %vm1195_vm2, %v4348_v56, %v2091_v39  ;;  %v1413_v47 = vmul.f32 1.442695, %v1254_v40  ;;  %v4450_v48 = vadd.f32 %v4447_v7, %v786_v30  ;;  %v4453_v5 = vadd.f32 %v4447_v7, %v1066_v44  ;;  %v2377_v38 = vpop.f32.mrb[99].mxu0 }
 0x1a6   :  { %v2545_v50 = vpop.f32.mrb[99].mxu1  ;;  %v2759_v11 = vpop.eup %2758  ;;  %1862 = vst.msk [vmem:[%s4628_s3 + $0x320] sm:$0xff] %vm1761_vm3, %v1750_v33  ;;  %v2036_v56 = vadd.f32 -1.0, %v2757_v45  ;;  %v1525_v53 = vmul.f32 1.442695, %v1310_v51 }
 0x1a7   :  { %v2092_v42 = vadd.f32 -1.0, %v2759_v11  ;;  %2768 = vpow2.f32 %v1413_v47  ;;  %v1255_v57 = vmin.f32 %v4450_v48, 0.0  ;;  %v1311_v46 = vmin.f32 %v4453_v5, 0.0 }
 0x1a8   :  { %v1695_v59 = vsel %vm1140_vm4, %v4365_v17, %v2036_v56  ;;  %2770 = vpow2.f32 %v1525_v53  ;;  %v791_v61 = vpop.f32.mrb[100].mxu0  ;;  %v1071_v62 = vpop.f32.mrb[100].mxu1  ;;  %vm1144_vm12 = vcmp.gt.f32.partialorder %v4450_v48, 0.0  ;;  %vm1200_vm13 = vcmp.gt.f32.partialorder %v4453_v5, 0.0 }
 0x1a9   :  { %v2761_v49 = vpop.eup %2760  ;;  %1807 = vst.msk [vmem:[%s4628_s3 + $0x168] sm:$0xff] %vm1761_vm3, %v1695_v59  ;;  %v1751_v0 = vsel %vm1196_vm5, %v4368_v23, %v2092_v42  ;;  %v1415_v1 = vmul.f32 1.442695, %v1255_v57  ;;  %v4470_v16 = vadd.f32 %v4447_v7, %v791_v61  ;;  %v4473_v17 = vadd.f32 %v4447_v7, %v1071_v62  ;;  %v2380_v55 = vpop.f32.mrb[101].mxu0 }
 0x1aa   :  { %v2548_v25 = vpop.f32.mrb[101].mxu1  ;;  %v2763_v4 = vpop.eup %2762  ;;  %1863 = vst.msk [vmem:[%s4628_s3 + $0x328] sm:$0xff] %vm1761_vm3, %v1751_v0  ;;  %v2037_v8 = vadd.f32 -1.0, %v2761_v49  ;;  %v1527_v60 = vmul.f32 1.442695, %v1311_v46 }
 0x1ab   :  { %v2093_v23 = vadd.f32 -1.0, %v2763_v4  ;;  %2772 = vpow2.f32 %v1415_v1  ;;  %v1256_v10 = vmin.f32 %v4470_v16, 0.0  ;;  %v1312_v63 = vmin.f32 %v4473_v17, 0.0 }
 0x1ac   :  { %v1696_v12 = vsel %vm1141_vm6, %v4385_v26, %v2037_v8  ;;  %2774 = vpow2.f32 %v1527_v60  ;;  %v796_v32 = vpop.f32.mrb[102].mxu0  ;;  %v1076_v15 = vpop.f32.mrb[102].mxu1  ;;  %vm1145_vm14 = vcmp.gt.f32.partialorder %v4470_v16, 0.0  ;;  %vm1201_vm15 = vcmp.gt.f32.partialorder %v4473_v17, 0.0 }
 0x1ad   :  { %v2765_v52 = vpop.eup %2764  ;;  %1808 = vst.msk [vmem:[%s4628_s3 + $0x170] sm:$0xff] %vm1761_vm3, %v1696_v12  ;;  %v1752_v18 = vsel %vm1197_vm7, %v4388_v27, %v2093_v23  ;;  %v1417_v19 = vmul.f32 1.442695, %v1256_v10  ;;  %v4490_v2 = vadd.f32 %v4447_v7, %v796_v32  ;;  %v4493_v26 = vadd.f32 %v4447_v7, %v1076_v15  ;;  %v2383_v3 = vpop.f32.mrb[103].mxu0 }
 0x1ae   :  { %v2551_v21 = vpop.f32.mrb[103].mxu1  ;;  %v2767_v22 = vpop.eup %2766  ;;  %1864 = vst.msk [vmem:[%s4628_s3 + $0x330] sm:$0xff] %vm1761_vm3, %v1752_v18  ;;  %v2038_v9 = vadd.f32 -1.0, %v2765_v52  ;;  %v1529_v13 = vmul.f32 1.442695, %v1312_v63 }
 0x1af   :  { %v2094_v27 = vadd.f32 -1.0, %v2767_v22  ;;  %2776 = vpow2.f32 %v1417_v19  ;;  %v1257_v28 = vmin.f32 %v4490_v2, 0.0  ;;  %v1313_v14 = vmin.f32 %v4493_v26, 0.0 }
 0x1b0   :  { %v1697_v29 = vsel %vm1142_vm8, %v4405_v37, %v2038_v9  ;;  %2778 = vpow2.f32 %v1529_v13  ;;  %v801_v31 = vpop.f32.mrb[104].mxu0  ;;  %v1081_v6 = vpop.f32.mrb[104].mxu1  ;;  %vm1146_vm0 = vcmp.gt.f32.partialorder %v4490_v2, 0.0  ;;  %vm1202_vm1 = vcmp.gt.f32.partialorder %v4493_v26, 0.0 }
 0x1b1   :  { %v2769_v20 = vpop.eup %2768  ;;  %1809 = vst.msk [vmem:[%s4628_s3 + $0x178] sm:$0xff] %vm1761_vm3, %v1697_v29  ;;  %v1753_v34 = vsel %vm1198_vm9, %v4408_v43, %v2094_v27  ;;  %v1419_v35 = vmul.f32 1.442695, %v1257_v28  ;;  %v4510_v36 = vadd.f32 %v4447_v7, %v801_v31  ;;  %v4513_v37 = vadd.f32 %v4447_v7, %v1081_v6  ;;  %v2386_v24 = vpop.f32.mrb[105].mxu0 }
 0x1b2   :  { %v2554_v39 = vpop.f32.mrb[105].mxu1  ;;  %v2771_v40 = vpop.eup %2770  ;;  %1865 = vst.msk [vmem:[%s4628_s3 + $0x338] sm:$0xff] %vm1761_vm3, %v1753_v34  ;;  %v2039_v41 = vadd.f32 -1.0, %v2769_v20  ;;  %v1531_v51 = vmul.f32 1.442695, %v1313_v14  ;;  %vm1872_vm8 = vcmask 254976  }
 0x1b3   :  { %v2095_v43 = vadd.f32 -1.0, %v2771_v40  ;;  %2780 = vpow2.f32 %v1419_v35  ;;  %v1258_v30 = vmin.f32 %v4510_v36, 0.0  ;;  %v1314_v45 = vmin.f32 %v4513_v37, 0.0 }
 0x1b4   :  { %v1698_v44 = vsel %vm1143_vm10, %v4425_v54, %v2039_v41  ;;  %2782 = vpow2.f32 %v1531_v51  ;;  %v806_v33 = vpop.f32.mrb[106].mxu0  ;;  %v1086_v47 = vpop.f32.mrb[106].mxu1  ;;  %vm1147_vm2 = vcmp.gt.f32.partialorder %v4510_v36, 0.0  ;;  %vm1203_vm4 = vcmp.gt.f32.partialorder %v4513_v37, 0.0 }
 0x1b5   :  { %v2773_v38 = vpop.eup %2772  ;;  %1810 = vst.msk [vmem:[%s4628_s3 + $0x180] sm:$0xff] %vm1761_vm3, %v1698_v44  ;;  %v1754_v50 = vsel %vm1199_vm11, %v4428_v58, %v2095_v43  ;;  %v1421_v11 = vmul.f32 1.442695, %v1258_v30  ;;  %v4530_v56 = vadd.f32 %v4447_v7, %v806_v33  ;;  %v4533_v54 = vadd.f32 %v4447_v7, %v1086_v47  ;;  %v2389_v53 = vpop.f32.mrb[107].mxu0 }
 0x1b6   :  { %v2557_v42 = vpop.f32.mrb[107].mxu1  ;;  %v2775_v57 = vpop.eup %2774  ;;  %1866 = vst.msk [vmem:[%s4628_s3 + $0x340] sm:$0xff] %vm1761_vm3, %v1754_v50  ;;  %v2040_v59 = vadd.f32 -1.0, %v2773_v38  ;;  %v1533_v46 = vmul.f32 1.442695, %v1314_v45 }
 0x1b7   :  { %v2096_v58 = vadd.f32 -1.0, %v2775_v57  ;;  %2784 = vpow2.f32 %v1421_v11  ;;  %v1259_v61 = vmin.f32 %v4530_v56, 0.0  ;;  %v1315_v49 = vmin.f32 %v4533_v54, 0.0 }
 0x1b8   :  { %v1699_v62 = vsel %vm1144_vm12, %v4450_v48, %v2040_v59  ;;  %2786 = vpow2.f32 %v1533_v46  ;;  %v811_v0 = vpop.f32.mrb[108].mxu0  ;;  %v1091_v1 = vpop.f32.mrb[108].mxu1  ;;  %vm1148_vm5 = vcmp.gt.f32.partialorder %v4530_v56, 0.0  ;;  %vm1204_vm6 = vcmp.gt.f32.partialorder %v4533_v54, 0.0 }
 0x1b9   :  { %v2777_v55 = vpop.eup %2776  ;;  %1811 = vst.msk [vmem:[%s4628_s3 + $0x188] sm:$0xff] %vm1761_vm3, %v1699_v62  ;;  %v1755_v25 = vsel %vm1200_vm13, %v4453_v5, %v2096_v58  ;;  %v1423_v4 = vmul.f32 1.442695, %v1259_v61  ;;  %v4550_v8 = vadd.f32 %v4447_v7, %v811_v0  ;;  %v4553_v48 = vadd.f32 %v4447_v7, %v1091_v1  ;;  %v2392_v60 = vpop.f32.mrb[109].mxu0 }
 0x1ba   :  { %v2560_v23 = vpop.f32.mrb[109].mxu1  ;;  %v2779_v10 = vpop.eup %2778  ;;  %1867 = vst.msk [vmem:[%s4628_s3 + $0x348] sm:$0xff] %vm1761_vm3, %v1755_v25  ;;  %v2041_v12 = vadd.f32 -1.0, %v2777_v55  ;;  %v1535_v63 = vmul.f32 1.442695, %v1315_v49 }
 0x1bb   :  { %v2097_v5 = vadd.f32 -1.0, %v2779_v10  ;;  %2788 = vpow2.f32 %v1423_v4  ;;  %v1260_v32 = vmin.f32 %v4550_v8, 0.0  ;;  %v1316_v52 = vmin.f32 %v4553_v48, 0.0 }
 0x1bc   :  { %v1700_v15 = vsel %vm1145_vm14, %v4470_v16, %v2041_v12  ;;  %2790 = vpow2.f32 %v1535_v63  ;;  %v816_v18 = vpop.f32.mrb[110].mxu0  ;;  %vm1149_vm7 = vcmp.gt.f32.partialorder %v4550_v8, 0.0  ;;  %vm1205_vm9 = vcmp.gt.f32.partialorder %v4553_v48, 0.0 }
 0x1bd   :  { %v2781_v19 = vpop.eup %2780  ;;  %1812 = vst.msk [vmem:[%s4628_s3 + $0x190] sm:$0xff] %vm1761_vm3, %v1700_v15  ;;  %v1756_v3 = vsel %vm1201_vm15, %v4473_v17, %v2097_v5  ;;  %v1425_v21 = vmul.f32 1.442695, %v1260_v32  ;;  %v817_v22 = vadd.f32 %v4447_v7, %v816_v18  ;;  %v2395_v9 = vpop.f32.mrb[111].mxu0  ;;  %v1537_v27 = vmul.f32 1.442695, %v1316_v52 }
 0x1be   :  { %v2783_v13 = vpop.eup %2782  ;;  %1868 = vst.msk [vmem:[%s4628_s3 + $0x350] sm:$0xff] %vm1761_vm3, %v1756_v3  ;;  %v2042_v16 = vadd.f32 -1.0, %v2781_v19 }
 0x1bf   :  { %v2098_v28 = vadd.f32 -1.0, %v2783_v13  ;;  %2792 = vpow2.f32 %v1425_v21  ;;  %v1261_v29 = vmin.f32 %v817_v22, 0.0  ;;  %vm1150_vm10 = vcmp.gt.f32.partialorder %v817_v22, 0.0 }
 0x1c0   :  { %v1701_v14 = vsel %vm1146_vm0, %v4490_v2, %v2042_v16  ;;  %2794 = vpow2.f32 %v1537_v27 }
 0x1c1   :  { %v2785_v7 = vpop.eup %2784  ;;  %1813 = vst.msk [vmem:[%s4628_s3 + $0x198] sm:$0xff] %vm1761_vm3, %v1701_v14  ;;  %v1757_v17 = vsel %vm1202_vm1, %v4493_v26, %v2098_v28  ;;  %v1427_v31 = vmul.f32 1.442695, %v1261_v29 }
 0x1c2   :  { %v2787_v6 = vpop.eup %2786  ;;  %1869 = vst.msk [vmem:[%s4628_s3 + $0x358] sm:$0xff] %vm1761_vm3, %v1757_v17  ;;  %v2043_v20 = vadd.f32 -1.0, %v2785_v7 }
 0x1c3   :  { %v2099_v2 = vadd.f32 -1.0, %v2787_v6  ;;  %2796 = vpow2.f32 %v1427_v31 }
 0x1c4   :  { %v1702_v34 = vsel %vm1147_vm2, %v4510_v36, %v2043_v20 }
 0x1c5   :  { %v2789_v35 = vpop.eup %2788  ;;  %1814 = vst.msk [vmem:[%s4628_s3 + $0x1a0] sm:$0xff] %vm1761_vm3, %v1702_v34  ;;  %v1758_v26 = vsel %vm1203_vm4, %v4513_v37, %v2099_v2 }
 0x1c6   :  { %v2791_v24 = vpop.eup %2790  ;;  %1870 = vst.msk [vmem:[%s4628_s3 + $0x360] sm:$0xff] %vm1761_vm3, %v1758_v26  ;;  %v2044_v39 = vadd.f32 -1.0, %v2789_v35 }
 0x1c7   :  { %v2100_v36 = vadd.f32 -1.0, %v2791_v24 }
 0x1c8   :  { %v1703_v40 = vsel %vm1148_vm5, %v4530_v56, %v2044_v39 }
 0x1c9   :  { %v2793_v41 = vpop.eup %2792  ;;  %1815 = vst.msk [vmem:[%s4628_s3 + $0x1a8] sm:$0xff] %vm1761_vm3, %v1703_v40  ;;  %v1759_v37 = vsel %vm1204_vm6, %v4533_v54, %v2100_v36 }
 0x1ca   :  { %v2795_v51 = vpop.eup %2794  ;;  %1871 = vst.msk [vmem:[%s4628_s3 + $0x368] sm:$0xff] %vm1761_vm3, %v1759_v37  ;;  %v2045_v43 = vadd.f32 -1.0, %v2793_v41 }
 0x1cb   :  { %v2101_v30 = vadd.f32 -1.0, %v2795_v51 }
 0x1cc   :  { %v1704_v44 = vsel %vm1149_vm7, %v4550_v8, %v2045_v43 }
 0x1cd   :  { %v2797_v45 = vpop.eup %2796  ;;  %1816 = vst.msk [vmem:[%s4628_s3 + $0x1b0] sm:$0xff] %vm1761_vm3, %v1704_v44  ;;  %v1760_v33 = vsel %vm1205_vm9, %v4553_v48, %v2101_v30 }
 0x1ce   :  { %1873 = vst.msk [vmem:[%s4628_s3 + $0x370] sm:$0x3] %vm1872_vm8, %v1760_v33  ;;  %v2046_v47 = vadd.f32 -1.0, %v2797_v45 }
 0x1d0   :  { %v1705_v38 = vsel %vm1150_vm10, %v817_v22, %v2046_v47 }
 0x1d1   :  { %1817 = vst.msk [vmem:[%s4628_s3 + $0x1b8] sm:$0xff] %vm1761_vm3, %v1705_v38 }

// kernel: icm_forward.6
= control target key start
LH: loop header
LB: loop body
LE: loop exit
PB: predicated region body
PF: predicated region fallthrough
CT: control target
= control target key end

     0   :  { %v1286_v0 = vmov 0.0|0.0   ;;  %vm1287_vm0 = vmmov 0   ;;  %v1288_v6 = vmov 0.0   ;;  %vm150_vm1 = vcmask 261120   ;;  %s2109_s1 = inlined_call_operand.vmem [shape: f32[288,32], index: 1, kind: input, shape index: {}]   ;;  %s2110_s0 = inlined_call_operand.vmem [shape: f32[242,288], index: 0, kind: input, shape index: {}]   ;;  %s2111_s2 = inlined_call_operand.vmem [shape: f32[1,32], index: 2, kind: input, shape index: {}]   ;;  %s2112_s3 = inlined_call_operand.vmem [shape: f32[242,32], index: 3, kind: output, shape index: {}]  }
   0x1   :  { %1105 = vmatprep.subr.bf16.mxu1 %v1286_v0  ;;  %v107_v1 = vld [vmem:[%s2109_s1] sm:$0xff]  ;;  %v108_v2 = vld [vmem:[%s2109_s1 + $0x8] sm:$0xff]  ;;  %v109_v3 = vld [vmem:[%s2109_s1 + $0x10] sm:$0xff]  ;;  %1153 = vmatprep.subr.bf16.mxu0 %v1286_v0 }
   0x2   :  { %v1106_v4 = vpack.c.bf16 %v108_v2, %v107_v1  ;;  %v110_v5 = vld [vmem:[%s2109_s1 + $0x18] sm:$0xff]  ;;  %1012 = vmatprep.mubr.msk.f32.mxu0 %vm1287_vm0, %v1288_v6  ;;  %v111_v8 = vld [vmem:[%s2109_s1 + $0x20] sm:$0xff]  ;;  %v112_v9 = vld [vmem:[%s2109_s1 + $0x28] sm:$0xff] }
   0x3   :  { %v1109_v7 = vpack.c.bf16 %v110_v5, %v109_v3  ;;  %v1112_v10 = vpack.c.bf16 %v112_v9, %v111_v8  ;;  %v113_v11 = vld [vmem:[%s2109_s1 + $0x30] sm:$0xff]  ;;  %v114_v12 = vld [vmem:[%s2109_s1 + $0x38] sm:$0xff]  ;;  %v139_v13 = vld [vmem:[%s2109_s1 + $0x100] sm:$0xff] }
   0x4   :  { %1107 = vmatpush1.bf16.msra.mxu1 %v1106_v4  ;;  %v140_v14 = vld [vmem:[%s2109_s1 + $0x108] sm:$0xff]  ;;  %v1115_v15 = vpack.c.bf16 %v114_v12, %v113_v11  ;;  %v141_v17 = vld [vmem:[%s2109_s1 + $0x110] sm:$0xff]  ;;  %v142_v18 = vld [vmem:[%s2109_s1 + $0x118] sm:$0xff] }
   0x5   :  { %1108 = vmatprep.subr.bf16.mxu1 %v1286_v0  ;;  %v1154_v16 = vpack.c.bf16 %v140_v14, %v139_v13  ;;  %v115_v19 = vld [vmem:[%s2109_s1 + $0x40] sm:$0xff]  ;;  %v116_v20 = vld [vmem:[%s2109_s1 + $0x48] sm:$0xff]  ;;  %v1157_v22 = vpack.c.bf16 %v142_v18, %v141_v17  ;;  %v117_v24 = vld [vmem:[%s2109_s1 + $0x50] sm:$0xff] }
   0x6   :  { %v15_v21 = vld [vmem:[%s2110_s0 + $0x8] sm:$0xff]  ;;  %v1118_v23 = vpack.c.bf16 %v116_v20, %v115_v19  ;;  %v118_v25 = vld [vmem:[%s2109_s1 + $0x58] sm:$0xff]  ;;  %v16_v26 = vld [vmem:[%s2110_s0 + $0x10] sm:$0xff] }
   0x7   :  { %1155 = vmatpush3.bf16.msra.mxu0 %v1154_v16  ;;  %308 = vmatprep.mubr.f32.mxu1 %v15_v21  ;;  %v1121_v27 = vpack.c.bf16 %v118_v25, %v117_v24  ;;  %v119_v28 = vld [vmem:[%s2109_s1 + $0x60] sm:$0xff]  ;;  %v120_v29 = vld [vmem:[%s2109_s1 + $0x68] sm:$0xff]  ;;  %v121_v32 = vld [vmem:[%s2109_s1 + $0x70] sm:$0xff] }
   0x8   :  { %1110 = vmatpush1.bf16.msra.mxu1 %v1109_v7  ;;  %1156 = vmatprep.subr.bf16.mxu0 %v1286_v0  ;;  %v19_v30 = vld [vmem:[%s2110_s0 + $0x28] sm:$0xff]  ;;  %v1124_v31 = vpack.c.bf16 %v120_v29, %v119_v28  ;;  %v122_v33 = vld [vmem:[%s2109_s1 + $0x78] sm:$0xff]  ;;  %v22_v34 = vld [vmem:[%s2110_s0 + $0x40] sm:$0xff] }
   0x9   :  { %1111 = vmatprep.subr.bf16.mxu1 %v1286_v0  ;;  %v1127_v35 = vpack.c.bf16 %v122_v33, %v121_v32  ;;  %v123_v36 = vld [vmem:[%s2109_s1 + $0x80] sm:$0xff]  ;;  %v124_v37 = vld [vmem:[%s2109_s1 + $0x88] sm:$0xff]  ;;  %v25_v38 = vld [vmem:[%s2110_s0 + $0x58] sm:$0xff] }
   0xa   :  { %v1130_v39 = vpack.c.bf16 %v124_v37, %v123_v36  ;;  %v125_v40 = vld [vmem:[%s2109_s1 + $0x90] sm:$0xff]  ;;  %v126_v41 = vld [vmem:[%s2109_s1 + $0x98] sm:$0xff]  ;;  %v127_v44 = vld [vmem:[%s2109_s1 + $0xa0] sm:$0xff] }
   0xb   :  { %1158 = vmatpush3.bf16.msra.mxu0 %v1157_v22  ;;  %v28_v42 = vld [vmem:[%s2110_s0 + $0x70] sm:$0xff]  ;;  %v1133_v43 = vpack.c.bf16 %v126_v41, %v125_v40  ;;  %v128_v45 = vld [vmem:[%s2109_s1 + $0xa8] sm:$0xff]  ;;  %v130_v49 = vld [vmem:[%s2109_s1 + $0xb8] sm:$0xff] }
   0xc   :  { %1113 = vmatpush1.bf16.msra.mxu1 %v1112_v10  ;;  %v31_v46 = vld [vmem:[%s2110_s0 + $0x88] sm:$0xff]  ;;  %v1136_v47 = vpack.c.bf16 %v128_v45, %v127_v44  ;;  %v129_v48 = vld [vmem:[%s2109_s1 + $0xb0] sm:$0xff]  ;;  %v34_v50 = vld [vmem:[%s2110_s0 + $0xa0] sm:$0xff] }
   0xd   :  { %1114 = vmatprep.subr.bf16.mxu1 %v1286_v0  ;;  %v1139_v51 = vpack.c.bf16 %v130_v49, %v129_v48  ;;  %v131_v52 = vld [vmem:[%s2109_s1 + $0xc0] sm:$0xff]  ;;  %v132_v53 = vld [vmem:[%s2109_s1 + $0xc8] sm:$0xff]  ;;  %v37_v54 = vld [vmem:[%s2110_s0 + $0xb8] sm:$0xff] }
   0xe   :  { %1013 = vmatmul.mubr.msk.f32.vlgmr.msra.gmra.mrb[0].mxu0 %vm150_vm1, %v16_v26  ;;  %v1142_v55 = vpack.c.bf16 %v132_v53, %v131_v52  ;;  %v133_v56 = vld [vmem:[%s2109_s1 + $0xd0] sm:$0xff]  ;;  %v134_v57 = vld [vmem:[%s2109_s1 + $0xd8] sm:$0xff]  ;;  %v135_v60 = vld [vmem:[%s2109_s1 + $0xe0] sm:$0xff] }
   0xf   :  { %1015 = vmatprep.mubr.msk.f32.mxu0 %vm1287_vm0, %v1288_v6  ;;  %v40_v58 = vld [vmem:[%s2110_s0 + $0xd0] sm:$0xff]  ;;  %v1145_v59 = vpack.c.bf16 %v134_v57, %v133_v56  ;;  %v136_v61 = vld [vmem:[%s2109_s1 + $0xe8] sm:$0xff]  ;;  %v138_v2 = vld [vmem:[%s2109_s1 + $0xf8] sm:$0xff] }
  0x10   :  { %1116 = vmatpush1.bf16.msra.mxu1 %v1115_v15  ;;  %v43_v62 = vld [vmem:[%s2110_s0 + $0xe8] sm:$0xff]  ;;  %v1148_v63 = vpack.c.bf16 %v136_v61, %v135_v60  ;;  %v137_v1 = vld [vmem:[%s2109_s1 + $0xf0] sm:$0xff]  ;;  %v46_v3 = vld [vmem:[%s2110_s0 + $0x100] sm:$0xff] }
  0x11   :  { %1117 = vmatprep.subr.bf16.mxu1 %v1286_v0  ;;  %v1151_v4 = vpack.c.bf16 %v138_v2, %v137_v1  ;;  %v49_v5 = vld [vmem:[%s2110_s0 + $0x118] sm:$0xff]  ;;  %v14_v7 = vld [vmem:[%s2110_s0] sm:$0xff]  ;;  %v55_v11 = vld [vmem:[%s2110_s0 + $0x148] sm:$0xff] }
  0x12   :  { %1016 = vmatmul.mubr.msk.f32.gmra.mrb[2].mxu0 %vm150_vm1, %v19_v30  ;;  %v18_v8 = vld [vmem:[%s2110_s0 + $0x20] sm:$0xff]  ;;  %v17_v9 = vld [vmem:[%s2110_s0 + $0x18] sm:$0xff]  ;;  %v20_v12 = vld [vmem:[%s2110_s0 + $0x30] sm:$0xff] }
  0x13   :  { %1018 = vmatprep.mubr.msk.f32.mxu0 %vm1287_vm0, %v1288_v6  ;;  %v21_v10 = vld [vmem:[%s2110_s0 + $0x38] sm:$0xff]  ;;  %v24_v13 = vld [vmem:[%s2110_s0 + $0x50] sm:$0xff]  ;;  %v58_v14 = vld [vmem:[%s2110_s0 + $0x160] sm:$0xff] }
  0x14   :  { %1119 = vmatpush1.bf16.msra.mxu1 %v1118_v23  ;;  %v23_v15 = vld [vmem:[%s2110_s0 + $0x48] sm:$0xff]  ;;  %v61_v17 = vld [vmem:[%s2110_s0 + $0x178] sm:$0xff]  ;;  %v26_v18 = vld [vmem:[%s2110_s0 + $0x60] sm:$0xff] }
  0x15   :  { %1120 = vmatprep.subr.bf16.mxu1 %v1286_v0  ;;  %v27_v16 = vld [vmem:[%s2110_s0 + $0x68] sm:$0xff]  ;;  %v30_v19 = vld [vmem:[%s2110_s0 + $0x80] sm:$0xff]  ;;  %v64_v20 = vld [vmem:[%s2110_s0 + $0x190] sm:$0xff] }
  0x16   :  { %1019 = vmatmul.mubr.msk.f32.gmra.mrb[4].mxu0 %vm150_vm1, %v22_v34  ;;  %v29_v21 = vld [vmem:[%s2110_s0 + $0x78] sm:$0xff]  ;;  %v67_v23 = vld [vmem:[%s2110_s0 + $0x1a8] sm:$0xff]  ;;  %v32_v24 = vld [vmem:[%s2110_s0 + $0x90] sm:$0xff] }
  0x17   :  { %1021 = vmatprep.mubr.msk.f32.mxu0 %vm1287_vm0, %v1288_v6  ;;  %v33_v22 = vld [vmem:[%s2110_s0 + $0x98] sm:$0xff]  ;;  %v36_v25 = vld [vmem:[%s2110_s0 + $0xb0] sm:$0xff]  ;;  %v70_v26 = vld [vmem:[%s2110_s0 + $0x1c0] sm:$0xff] }
  0x18   :  { %1122 = vmatpush1.bf16.msra.mxu1 %v1121_v27  ;;  %v35_v27 = vld [vmem:[%s2110_s0 + $0xa8] sm:$0xff]  ;;  %v73_v29 = vld [vmem:[%s2110_s0 + $0x1d8] sm:$0xff]  ;;  %v38_v30 = vld [vmem:[%s2110_s0 + $0xc0] sm:$0xff] }
  0x19   :  { %1123 = vmatprep.subr.bf16.mxu1 %v1286_v0  ;;  %v39_v28 = vld [vmem:[%s2110_s0 + $0xc8] sm:$0xff]  ;;  %v76_v32 = vld [vmem:[%s2110_s0 + $0x1f0] sm:$0xff]  ;;  %v41_v33 = vld [vmem:[%s2110_s0 + $0xd8] sm:$0xff] }
  0x1a   :  { %1022 = vmatmul.mubr.msk.f32.gmra.mrb[6].mxu0 %vm150_vm1, %v25_v38  ;;  %v45_v34 = vld [vmem:[%s2110_s0 + $0xf8] sm:$0xff]  ;;  %v44_v36 = vld [vmem:[%s2110_s0 + $0xf0] sm:$0xff]  ;;  %v82_v38 = vld [vmem:[%s2110_s0 + $0x220] sm:$0xff] }
  0x1b   :  { %1024 = vmatprep.mubr.msk.f32.mxu0 %vm1287_vm0, %v1288_v6  ;;  %v48_v37 = vld [vmem:[%s2110_s0 + $0x110] sm:$0xff]  ;;  %v51_v40 = vld [vmem:[%s2110_s0 + $0x128] sm:$0xff]  ;;  %v85_v41 = vld [vmem:[%s2110_s0 + $0x238] sm:$0xff] }
  0x1c   :  { %1125 = vmatpush1.bf16.msra.mxu1 %v1124_v31  ;;  %v42_v31 = vld [vmem:[%s2110_s0 + $0xe0] sm:$0xff]  ;;  %v88_v44 = vld [vmem:[%s2110_s0 + $0x250] sm:$0xff]  ;;  %v53_v45 = vld [vmem:[%s2110_s0 + $0x138] sm:$0xff] }
  0x1d   :  { %1126 = vmatprep.subr.bf16.mxu1 %v1286_v0  ;;  %v56_v48 = vld [vmem:[%s2110_s0 + $0x150] sm:$0xff]  ;;  %v63_v52 = vld [vmem:[%s2110_s0 + $0x188] sm:$0xff]  ;;  %v97_v53 = vld [vmem:[%s2110_s0 + $0x298] sm:$0xff] }
  0x1e   :  { %1025 = vmatmul.mubr.msk.f32.gmra.mrb[8].mxu0 %vm150_vm1, %v28_v42  ;;  %v50_v42 = vld [vmem:[%s2110_s0 + $0x120] sm:$0xff]  ;;  %v60_v49 = vld [vmem:[%s2110_s0 + $0x170] sm:$0xff]  ;;  %v65_v57 = vld [vmem:[%s2110_s0 + $0x198] sm:$0xff] }
  0x1f   :  { %1027 = vmatprep.mubr.msk.f32.mxu0 %vm1287_vm0, %v1288_v6  ;;  %v100_v56 = vld [vmem:[%s2110_s0 + $0x2b0] sm:$0xff]  ;;  %v75_v1 = vld [vmem:[%s2110_s0 + $0x1e8] sm:$0xff]  ;;  %v78_v2 = vld [vmem:[%s2110_s0 + $0x200] sm:$0xff] }
  0x20   :  { %1128 = vmatpush1.bf16.msra.mxu1 %v1127_v35  ;;  %v79_v35 = vld [vmem:[%s2110_s0 + $0x208] sm:$0xff]  ;;  %v68_v60 = vld [vmem:[%s2110_s0 + $0x1b0] sm:$0xff] }
  0x21   :  { %1129 = vmatprep.subr.bf16.mxu1 %v1286_v0  ;;  %v72_v61 = vld [vmem:[%s2110_s0 + $0x1d0] sm:$0xff] }
  0x22   :  { %1028 = vmatmul.mubr.msk.f32.gmra.mrb[10].mxu0 %vm150_vm1, %v31_v46  ;;  %v57_v46 = vld [vmem:[%s2110_s0 + $0x158] sm:$0xff] }
  0x23   :  { %1030 = vmatprep.mubr.msk.f32.mxu0 %vm1287_vm0, %v1288_v6 }
  0x24   :  { %1131 = vmatpush1.bf16.msra.mxu1 %v1130_v39  ;;  %v47_v39 = vld [vmem:[%s2110_s0 + $0x108] sm:$0xff] }
  0x25   :  { %1132 = vmatprep.subr.bf16.mxu1 %v1286_v0 }
  0x26   :  { %1031 = vmatmul.mubr.msk.f32.gmra.mrb[12].mxu0 %vm150_vm1, %v34_v50  ;;  %v94_v50 = vld [vmem:[%s2110_s0 + $0x280] sm:$0xff] }
  0x27   :  { %1033 = vmatprep.mubr.msk.f32.mxu0 %vm1287_vm0, %v1288_v6 }
  0x28   :  { %1134 = vmatpush1.bf16.msra.mxu1 %v1133_v43  ;;  %v54_v43 = vld [vmem:[%s2110_s0 + $0x140] sm:$0xff] }
  0x29   :  { %1135 = vmatprep.subr.bf16.mxu1 %v1286_v0 }
  0x2a   :  { %1034 = vmatmul.mubr.msk.f32.gmra.mrb[14].mxu0 %vm150_vm1, %v37_v54  ;;  %v62_v54 = vld [vmem:[%s2110_s0 + $0x180] sm:$0xff] }
  0x2b   :  { %1036 = vmatprep.mubr.msk.f32.mxu0 %vm1287_vm0, %v1288_v6 }
  0x2c   :  { %1137 = vmatpush1.bf16.msra.mxu1 %v1136_v47  ;;  %v91_v47 = vld [vmem:[%s2110_s0 + $0x268] sm:$0xff] }
  0x2d   :  { %1138 = vmatprep.subr.bf16.mxu1 %v1286_v0 }
  0x2e   :  { %1037 = vmatmul.mubr.msk.f32.gmra.mrb[16].mxu0 %vm150_vm1, %v40_v58  ;;  %v69_v58 = vld [vmem:[%s2110_s0 + $0x1b8] sm:$0xff] }
  0x2f   :  { %1039 = vmatprep.mubr.msk.f32.mxu0 %vm1287_vm0, %v1288_v6 }
  0x30   :  { %1140 = vmatpush1.bf16.msra.mxu1 %v1139_v51  ;;  %v59_v51 = vld [vmem:[%s2110_s0 + $0x168] sm:$0xff] }
  0x31   :  { %1141 = vmatprep.subr.bf16.mxu1 %v1286_v0 }
  0x32   :  { %1040 = vmatmul.mubr.msk.f32.gmra.mrb[18].mxu0 %vm150_vm1, %v43_v62  ;;  %v106_v62 = vld [vmem:[%s2110_s0 + $0x2e0] sm:$0x3] }
  0x33   :  { %1042 = vmatprep.mubr.msk.f32.mxu0 %vm1287_vm0, %v1288_v6 }
  0x34   :  { %1143 = vmatpush1.bf16.msra.mxu1 %v1142_v55  ;;  %v66_v55 = vld [vmem:[%s2110_s0 + $0x1a0] sm:$0xff] }
  0x35   :  { %1144 = vmatprep.subr.bf16.mxu1 %v1286_v0 }
  0x36   :  { %1043 = vmatmul.mubr.msk.f32.gmra.mrb[20].mxu0 %vm150_vm1, %v46_v3  ;;  %v77_v3 = vld [vmem:[%s2110_s0 + $0x1f8] sm:$0xff] }
  0x37   :  { %1045 = vmatprep.mubr.msk.f32.mxu0 %vm1287_vm0, %v1288_v6 }
  0x38   :  { %1146 = vmatpush1.bf16.msra.mxu1 %v1145_v59  ;;  %v103_v59 = vld [vmem:[%s2110_s0 + $0x2c8] sm:$0xff] }
  0x39   :  { %1147 = vmatprep.subr.bf16.mxu1 %v1286_v0 }
  0x3a   :  { %1046 = vmatmul.mubr.msk.f32.gmra.mrb[22].mxu0 %vm150_vm1, %v49_v5  ;;  %v80_v5 = vld [vmem:[%s2110_s0 + $0x210] sm:$0xff] }
  0x3b   :  { %1048 = vmatprep.mubr.msk.f32.mxu0 %vm1287_vm0, %v1288_v6 }
  0x3c   :  { %1149 = vmatpush1.bf16.msra.mxu1 %v1148_v63  ;;  %v71_v63 = vld [vmem:[%s2110_s0 + $0x1c8] sm:$0xff] }
  0x3d   :  { %1150 = vmatprep.subr.bf16.mxu1 %v1286_v0  ;;  %v52_v0 = vld [vmem:[%s2110_s0 + $0x130] sm:$0xff] }
  0x3e   :  { %1049 = vmatmul.mubr.msk.f32.gmra.mrb[24].mxu0 %vm150_vm1, %v52_v0  ;;  %v87_v0 = vld [vmem:[%s2110_s0 + $0x248] sm:$0xff] }
  0x3f   :  { %1051 = vmatprep.mubr.msk.f32.mxu0 %vm1287_vm0, %v1288_v6 }
  0x40   :  { %1152 = vmatpush1.bf16.msra.mxu1 %v1151_v4  ;;  %v81_v4 = vld [vmem:[%s2110_s0 + $0x218] sm:$0xff] }
  0x42   :  { %1052 = vmatmul.mubr.msk.f32.gmra.mrb[26].mxu0 %vm150_vm1, %v55_v11  ;;  %v89_v11 = vld [vmem:[%s2110_s0 + $0x258] sm:$0xff] }
  0x43   :  { %309 = vmatmul.mubr.f32.vlgmr.msra.gmra.mrb[0].mxu1 %v14_v7  ;;  %1054 = vmatprep.mubr.msk.f32.mxu0 %vm1287_vm0, %v1288_v6  ;;  %v84_v7 = vld [vmem:[%s2110_s0 + $0x230] sm:$0xff] }
  0x44   :  { %313 = vmatprep.mubr.f32.mxu1 %v18_v8  ;;  %v83_v8 = vld [vmem:[%s2110_s0 + $0x228] sm:$0xff] }
  0x46   :  { %1055 = vmatmul.mubr.msk.f32.gmra.mrb[28].mxu0 %vm150_vm1, %v58_v14  ;;  %v96_v14 = vld [vmem:[%s2110_s0 + $0x290] sm:$0xff] }
  0x47   :  { %314 = vmatmul.mubr.f32.gmra.mrb[2].mxu1 %v17_v9  ;;  %1057 = vmatprep.mubr.msk.f32.mxu0 %vm1287_vm0, %v1288_v6  ;;  %v86_v9 = vld [vmem:[%s2110_s0 + $0x240] sm:$0xff] }
  0x48   :  { %318 = vmatprep.mubr.f32.mxu1 %v21_v10  ;;  %v90_v10 = vld [vmem:[%s2110_s0 + $0x260] sm:$0xff] }
  0x4a   :  { %1058 = vmatmul.mubr.msk.f32.gmra.mrb[30].mxu0 %vm150_vm1, %v61_v17  ;;  %v98_v17 = vld [vmem:[%s2110_s0 + $0x2a0] sm:$0xff] }
  0x4b   :  { %319 = vmatmul.mubr.f32.gmra.mrb[4].mxu1 %v20_v12  ;;  %1060 = vmatprep.mubr.msk.f32.mxu0 %vm1287_vm0, %v1288_v6  ;;  %v93_v12 = vld [vmem:[%s2110_s0 + $0x278] sm:$0xff] }
  0x4c   :  { %323 = vmatprep.mubr.f32.mxu1 %v24_v13  ;;  %v92_v13 = vld [vmem:[%s2110_s0 + $0x270] sm:$0xff] }
  0x4e   :  { %1061 = vmatmul.mubr.msk.f32.gmra.mrb[32].mxu0 %vm150_vm1, %v64_v20  ;;  %v105_v20 = vld [vmem:[%s2110_s0 + $0x2d8] sm:$0x3] }
  0x4f   :  { %324 = vmatmul.mubr.f32.gmra.mrb[6].mxu1 %v23_v15  ;;  %1063 = vmatprep.mubr.msk.f32.mxu0 %vm1287_vm0, %v1288_v6  ;;  %v95_v15 = vld [vmem:[%s2110_s0 + $0x288] sm:$0xff] }
  0x50   :  { %328 = vmatprep.mubr.f32.mxu1 %v27_v16  ;;  %v99_v16 = vld [vmem:[%s2110_s0 + $0x2a8] sm:$0xff] }
  0x52   :  { %1064 = vmatmul.mubr.msk.f32.gmra.mrb[34].mxu0 %vm150_vm1, %v67_v23 }
  0x53   :  { %329 = vmatmul.mubr.f32.gmra.mrb[8].mxu1 %v26_v18  ;;  %1066 = vmatprep.mubr.msk.f32.mxu0 %vm1287_vm0, %v1288_v6  ;;  %v102_v18 = vld [vmem:[%s2110_s0 + $0x2c0] sm:$0xff] }
  0x54   :  { %333 = vmatprep.mubr.f32.mxu1 %v30_v19  ;;  %v101_v19 = vld [vmem:[%s2110_s0 + $0x2b8] sm:$0xff] }
  0x56   :  { %1067 = vmatmul.mubr.msk.f32.gmra.mrb[36].mxu0 %vm150_vm1, %v70_v26 }
  0x57   :  { %334 = vmatmul.mubr.f32.gmra.mrb[10].mxu1 %v29_v21  ;;  %1069 = vmatprep.mubr.msk.f32.mxu0 %vm1287_vm0, %v1288_v6  ;;  %v104_v21 = vld [vmem:[%s2110_s0 + $0x2d0] sm:$0x3] }
  0x58   :  { %338 = vmatprep.mubr.f32.mxu1 %v33_v22 }
  0x5a   :  { %1070 = vmatmul.mubr.msk.f32.gmra.mrb[38].mxu0 %vm150_vm1, %v73_v29 }
  0x5b   :  { %339 = vmatmul.mubr.f32.gmra.mrb[12].mxu1 %v32_v24  ;;  %1072 = vmatprep.mubr.msk.f32.mxu0 %vm1287_vm0, %v1288_v6 }
  0x5c   :  { %343 = vmatprep.mubr.f32.mxu1 %v36_v25 }
  0x5e   :  { %1073 = vmatmul.mubr.msk.f32.gmra.mrb[40].mxu0 %vm150_vm1, %v76_v32 }
  0x5f   :  { %344 = vmatmul.mubr.f32.gmra.mrb[14].mxu1 %v35_v27  ;;  %1075 = vmatprep.mubr.msk.f32.mxu0 %vm1287_vm0, %v1288_v6 }
  0x60   :  { %348 = vmatprep.mubr.f32.mxu1 %v39_v28 }
  0x62   :  { %1076 = vmatmul.mubr.msk.f32.gmra.mrb[42].mxu0 %vm150_vm1, %v79_v35 }
  0x63   :  { %349 = vmatmul.mubr.f32.gmra.mrb[16].mxu1 %v38_v30  ;;  %1078 = vmatprep.mubr.msk.f32.mxu0 %vm1287_vm0, %v1288_v6 }
  0x64   :  { %353 = vmatprep.mubr.f32.mxu1 %v42_v31 }
  0x66   :  { %1079 = vmatmul.mubr.msk.f32.gmra.mrb[44].mxu0 %vm150_vm1, %v82_v38 }
  0x67   :  { %354 = vmatmul.mubr.f32.gmra.mrb[18].mxu1 %v41_v33  ;;  %1081 = vmatprep.mubr.msk.f32.mxu0 %vm1287_vm0, %v1288_v6 }
  0x68   :  { %358 = vmatprep.mubr.f32.mxu1 %v45_v34 }
  0x6a   :  { %1082 = vmatmul.mubr.msk.f32.gmra.mrb[46].mxu0 %vm150_vm1, %v85_v41 }
  0x6b   :  { %359 = vmatmul.mubr.f32.gmra.mrb[20].mxu1 %v44_v36  ;;  %1084 = vmatprep.mubr.msk.f32.mxu0 %vm1287_vm0, %v1288_v6 }
  0x6c   :  { %363 = vmatprep.mubr.f32.mxu1 %v48_v37 }
  0x6e   :  { %1085 = vmatmul.mubr.msk.f32.gmra.mrb[48].mxu0 %vm150_vm1, %v88_v44  ;;  %v1822_v44 = vld [vmem:[%s2111_s2] ss:$0 sm:$0xff] }
  0x6f   :  { %364 = vmatmul.mubr.f32.gmra.mrb[22].mxu1 %v47_v39  ;;  %1087 = vmatprep.mubr.msk.f32.mxu0 %vm1287_vm0, %v1288_v6 }
  0x70   :  { %368 = vmatprep.mubr.f32.mxu1 %v51_v40 }
  0x72   :  { %1088 = vmatmul.mubr.msk.f32.gmra.mrb[50].mxu0 %vm150_vm1, %v91_v47 }
  0x73   :  { %369 = vmatmul.mubr.f32.gmra.mrb[24].mxu1 %v50_v42  ;;  %1090 = vmatprep.mubr.msk.f32.mxu0 %vm1287_vm0, %v1288_v6 }
  0x74   :  { %373 = vmatprep.mubr.f32.mxu1 %v54_v43 }
  0x76   :  { %1091 = vmatmul.mubr.msk.f32.gmra.mrb[52].mxu0 %vm150_vm1, %v94_v50 }
  0x77   :  { %374 = vmatmul.mubr.f32.gmra.mrb[26].mxu1 %v53_v45  ;;  %1093 = vmatprep.mubr.msk.f32.mxu0 %vm1287_vm0, %v1288_v6 }
  0x78   :  { %378 = vmatprep.mubr.f32.mxu1 %v57_v46 }
  0x7a   :  { %1094 = vmatmul.mubr.msk.f32.gmra.mrb[54].mxu0 %vm150_vm1, %v97_v53 }
  0x7b   :  { %379 = vmatmul.mubr.f32.gmra.mrb[28].mxu1 %v56_v48  ;;  %1096 = vmatprep.mubr.msk.f32.mxu0 %vm1287_vm0, %v1288_v6 }
  0x7c   :  { %383 = vmatprep.mubr.f32.mxu1 %v60_v49 }
  0x7e   :  { %1097 = vmatmul.mubr.msk.f32.gmra.mrb[56].mxu0 %vm150_vm1, %v100_v56 }
  0x7f   :  { %384 = vmatmul.mubr.f32.gmra.mrb[30].mxu1 %v59_v51  ;;  %1099 = vmatprep.mubr.msk.f32.mxu0 %vm1287_vm0, %v1288_v6 }
  0x80   :  { %388 = vmatprep.mubr.f32.mxu1 %v63_v52 }
  0x82   :  { %1100 = vmatmul.mubr.msk.f32.gmra.mrb[58].mxu0 %vm150_vm1, %v103_v59 }
  0x83   :  { %389 = vmatmul.mubr.f32.gmra.mrb[32].mxu1 %v62_v54  ;;  %1102 = vmatprep.mubr.msk.f32.mxu0 %vm1287_vm0, %v1288_v6  ;;  %v74_v6 = vld [vmem:[%s2110_s0 + $0x1e0] sm:$0xff] }
  0x84   :  { %393 = vmatprep.mubr.f32.mxu1 %v66_v55 }
  0x86   :  { %1103 = vmatmul.mubr.msk.f32.gmra.mrb[60].mxu0 %vm150_vm1, %v106_v62 }
  0x87   :  { %394 = vmatmul.mubr.f32.gmra.mrb[34].mxu1 %v65_v57 }
  0x88   :  { %398 = vmatprep.mubr.f32.mxu1 %v69_v58 }
  0x8b   :  { %399 = vmatmul.mubr.f32.gmra.mrb[36].mxu1 %v68_v60 }
  0x8c   :  { %403 = vmatprep.mubr.f32.mxu1 %v72_v61 }
  0x8f   :  { %404 = vmatmul.mubr.f32.gmra.mrb[38].mxu1 %v71_v63 }
  0x90   :  { %408 = vmatprep.mubr.f32.mxu1 %v75_v1 }
  0x93   :  { %409 = vmatmul.mubr.f32.gmra.mrb[40].mxu1 %v74_v6 }
  0x94   :  { %413 = vmatprep.mubr.f32.mxu1 %v78_v2 }
  0x97   :  { %414 = vmatmul.mubr.f32.gmra.mrb[42].mxu1 %v77_v3 }
  0x98   :  { %418 = vmatprep.mubr.f32.mxu1 %v81_v4 }
  0x9b   :  { %419 = vmatmul.mubr.f32.gmra.mrb[44].mxu1 %v80_v5 }
  0x9c   :  { %423 = vmatprep.mubr.f32.mxu1 %v84_v7 }
  0x9f   :  { %424 = vmatmul.mubr.f32.gmra.mrb[46].mxu1 %v83_v8 }
  0xa0   :  { %428 = vmatprep.mubr.f32.mxu1 %v87_v0 }
  0xa3   :  { %429 = vmatmul.mubr.f32.gmra.mrb[48].mxu1 %v86_v9 }
  0xa4   :  { %433 = vmatprep.mubr.f32.mxu1 %v90_v10 }
  0xa7   :  { %434 = vmatmul.mubr.f32.gmra.mrb[50].mxu1 %v89_v11 }
  0xa8   :  { %438 = vmatprep.mubr.f32.mxu1 %v93_v12 }
  0xab   :  { %439 = vmatmul.mubr.f32.gmra.mrb[52].mxu1 %v92_v13 }
  0xac   :  { %443 = vmatprep.mubr.f32.mxu1 %v96_v14 }
  0xaf   :  { %444 = vmatmul.mubr.f32.gmra.mrb[54].mxu1 %v95_v15 }
  0xb0   :  { %448 = vmatprep.mubr.f32.mxu1 %v99_v16 }
  0xb3   :  { %449 = vmatmul.mubr.f32.gmra.mrb[56].mxu1 %v98_v17 }
  0xb4   :  { %453 = vmatprep.mubr.f32.mxu1 %v102_v18 }
  0xb7   :  { %454 = vmatmul.mubr.f32.gmra.mrb[58].mxu1 %v101_v19 }
  0xb8   :  { %458 = vmatprep.mubr.f32.mxu1 %v105_v20 }
  0xbb   :  { %459 = vmatmul.mubr.f32.gmra.mrb[60].mxu1 %v104_v21 }
  0xe1   :  { %v530_v22 = vpop.f32.mrb[0].mxu0 }
  0xe2   :  { %v1014_v23 = vpop.f32.mrb[1].mxu0 }
  0xe5   :  { %v535_v24 = vpop.f32.mrb[2].mxu0 }
  0xe6   :  { %v1017_v25 = vpop.f32.mrb[3].mxu0 }
  0xe9   :  { %v540_v26 = vpop.f32.mrb[4].mxu0 }
  0xea   :  { %v1020_v27 = vpop.f32.mrb[5].mxu0 }
  0xed   :  { %v545_v28 = vpop.f32.mrb[6].mxu0 }
  0xee   :  { %v1023_v29 = vpop.f32.mrb[7].mxu0 }
  0xf1   :  { %v550_v30 = vpop.f32.mrb[8].mxu0 }
  0xf2   :  { %v1026_v31 = vpop.f32.mrb[9].mxu0 }
  0xf5   :  { %v1807_v32 = vpop.f32.mrb[10].mxu0 }
  0xf6   :  { %v1029_v33 = vpop.f32.mrb[11].mxu0 }
  0xf9   :  { %v1809_v34 = vpop.f32.mrb[12].mxu0 }
  0xfa   :  { %v1032_v35 = vpop.f32.mrb[13].mxu0 }
  0xfd   :  { %v1811_v36 = vpop.f32.mrb[14].mxu0 }
  0xfe   :  { %v1035_v37 = vpop.f32.mrb[15].mxu0 }
 0x101   :  { %v1813_v38 = vpop.f32.mrb[16].mxu0 }
 0x102   :  { %v1038_v39 = vpop.f32.mrb[17].mxu0 }
 0x105   :  { %v1815_v40 = vpop.f32.mrb[18].mxu0 }
 0x106   :  { %v1041_v41 = vpop.f32.mrb[19].mxu0 }
 0x109   :  { %v1817_v42 = vpop.f32.mrb[20].mxu0 }
 0x10a   :  { %v1044_v43 = vpop.f32.mrb[21].mxu0 }
 0x10d   :  { %v1824_v45 = vpop.f32.mrb[22].mxu0 }
 0x10e   :  { %v1047_v46 = vpop.f32.mrb[23].mxu0 }
 0x111   :  { %v1827_v50 = vpop.f32.mrb[24].mxu0 }
 0x112   :  { %v1050_v52 = vpop.f32.mrb[25].mxu0 }
 0x115   :  { %v1830_v57 = vpop.f32.mrb[26].mxu0 }
 0x116   :  { %v310_v47 = vpop.f32.mrb[0].mxu1  ;;  %v1053_v60 = vpop.f32.mrb[27].mxu0 }
 0x117   :  { %v311_v48 = vadd.f32 %v1822_v44, %v310_v47  ;;  %v312_v49 = vpop.f32.mrb[1].mxu1 }
 0x119   :  { %v531_v51 = vadd.f32 %v530_v22, %v311_v48  ;;  %v1833_v6 = vpop.f32.mrb[28].mxu0 }
 0x11a   :  { %v315_v53 = vpop.f32.mrb[2].mxu1  ;;  %v1056_v4 = vpop.f32.mrb[29].mxu0 }
 0x11b   :  { %v715_v54 = vmin.f32 %v531_v51, 0.0  ;;  %v316_v55 = vadd.f32 %v1822_v44, %v315_v53  ;;  %v317_v56 = vpop.f32.mrb[3].mxu1  ;;  %vm684_vm2 = vcmp.gt.f32.partialorder %v531_v51, 0.0 }
 0x11d   :  { %v746_v58 = vmul.f32 1.442695, %v715_v54  ;;  %v536_v59 = vadd.f32 %v535_v24, %v316_v55  ;;  %v1836_v9 = vpop.f32.mrb[30].mxu0 }
 0x11e   :  { %v320_v61 = vpop.f32.mrb[4].mxu1  ;;  %v1059_v12 = vpop.f32.mrb[31].mxu0 }
 0x11f   :  { %1224 = vpow2.f32 %v746_v58  ;;  %v716_v62 = vmin.f32 %v536_v59, 0.0  ;;  %v321_v63 = vadd.f32 %v1822_v44, %v320_v61  ;;  %v322_v1 = vpop.f32.mrb[5].mxu1  ;;  %vm685_vm3 = vcmp.gt.f32.partialorder %v536_v59, 0.0 }
 0x121   :  { %v748_v2 = vmul.f32 1.442695, %v716_v62  ;;  %v541_v3 = vadd.f32 %v540_v26, %v321_v63  ;;  %v1842_v17 = vpop.f32.mrb[32].mxu0 }
 0x122   :  { %v325_v5 = vpop.f32.mrb[6].mxu1  ;;  %v1062_v21 = vpop.f32.mrb[33].mxu0 }
 0x123   :  { %1226 = vpow2.f32 %v748_v2  ;;  %v717_v7 = vmin.f32 %v541_v3, 0.0  ;;  %v326_v8 = vadd.f32 %v1822_v44, %v325_v5  ;;  %v327_v0 = vpop.f32.mrb[7].mxu1  ;;  %vm686_vm4 = vcmp.gt.f32.partialorder %v541_v3, 0.0 }
 0x125   :  { %v750_v10 = vmul.f32 1.442695, %v717_v7  ;;  %v1838_v11 = vadd.f32 %v545_v28, %v326_v8  ;;  %v1848_v28 = vpop.f32.mrb[34].mxu0 }
 0x126   :  { %v330_v13 = vpop.f32.mrb[8].mxu1  ;;  %v1065_v33 = vpop.f32.mrb[35].mxu0 }
 0x127   :  { %1228 = vpow2.f32 %v750_v10  ;;  %v718_v14 = vmin.f32 %v1838_v11, 0.0  ;;  %v331_v15 = vadd.f32 %v1822_v44, %v330_v13  ;;  %v332_v16 = vpop.f32.mrb[9].mxu1  ;;  %vm687_vm5 = vcmp.gt.f32.partialorder %v1838_v11, 0.0 }
 0x129   :  { %v1225_v18 = vpop.eup %1224  ;;  %v752_v19 = vmul.f32 1.442695, %v718_v14  ;;  %v1844_v20 = vadd.f32 %v550_v30, %v331_v15  ;;  %v1859_v47 = vpop.f32.mrb[36].mxu0 }
 0x12a   :  { %v938_v22 = vadd.f32 -1.0, %v1225_v18  ;;  %v335_v23 = vpop.f32.mrb[10].mxu1 }
 0x12b   :  { %1230 = vpow2.f32 %v752_v19  ;;  %v719_v24 = vmin.f32 %v1844_v20, 0.0  ;;  %v336_v25 = vadd.f32 %v1822_v44, %v335_v23  ;;  %v337_v26 = vpop.f32.mrb[11].mxu1  ;;  %vm688_vm6 = vcmp.gt.f32.partialorder %v1844_v20, 0.0 }
 0x12c   :  { %v839_v27 = vsel %vm684_vm2, %v531_v51, %v938_v22  ;;  %v1068_v51 = vpop.f32.mrb[37].mxu0 }
 0x12d   :  { %v1227_v29 = vpop.eup %1226  ;;  %870 = vst.msk [vmem:[%s2112_s3] sm:$0xff] %vm150_vm1, %v839_v27  ;;  %v754_v30 = vmul.f32 1.442695, %v719_v24  ;;  %v1855_v31 = vadd.f32 %v1807_v32, %v336_v25 }
 0x12e   :  { %v939_v35 = vadd.f32 -1.0, %v1227_v29  ;;  %v340_v37 = vpop.f32.mrb[12].mxu1 }
 0x12f   :  { %1232 = vpow2.f32 %v754_v30  ;;  %v720_v39 = vmin.f32 %v1855_v31, 0.0  ;;  %v341_v41 = vadd.f32 %v1822_v44, %v340_v37  ;;  %v342_v43 = vpop.f32.mrb[13].mxu1  ;;  %vm689_vm7 = vcmp.gt.f32.partialorder %v1855_v31, 0.0 }
 0x130   :  { %v840_v46 = vsel %vm685_vm3, %v536_v59, %v939_v35  ;;  %v1870_v59 = vpop.f32.mrb[38].mxu0 }
 0x131   :  { %v1229_v48 = vpop.eup %1228  ;;  %871 = vst.msk [vmem:[%s2112_s3 + $0x8] sm:$0xff] %vm150_vm1, %v840_v46  ;;  %v756_v32 = vmul.f32 1.442695, %v720_v39  ;;  %v1866_v49 = vadd.f32 %v1809_v34, %v341_v41  ;;  %v1071_v62 = vpop.f32.mrb[39].mxu0 }
 0x132   :  { %v940_v52 = vadd.f32 -1.0, %v1229_v48  ;;  %v345_v53 = vpop.f32.mrb[14].mxu1  ;;  %v1883_v7 = vpop.f32.mrb[40].mxu0 }
 0x133   :  { %1234 = vpow2.f32 %v756_v32  ;;  %v721_v54 = vmin.f32 %v1866_v49, 0.0  ;;  %v346_v55 = vadd.f32 %v1822_v44, %v345_v53  ;;  %v347_v56 = vpop.f32.mrb[15].mxu1  ;;  %v1074_v10 = vpop.f32.mrb[41].mxu0  ;;  %vm690_vm8 = vcmp.gt.f32.partialorder %v1866_v49, 0.0 }
 0x134   :  { %v841_v58 = vsel %vm686_vm4, %v541_v3, %v940_v52 }
 0x135   :  { %v1231_v60 = vpop.eup %1230  ;;  %872 = vst.msk [vmem:[%s2112_s3 + $0x10] sm:$0xff] %vm150_vm1, %v841_v58  ;;  %v758_v34 = vmul.f32 1.442695, %v721_v54  ;;  %v1877_v61 = vadd.f32 %v1811_v36, %v346_v55  ;;  %v1896_v18 = vpop.f32.mrb[42].mxu0 }
 0x136   :  { %v941_v63 = vadd.f32 -1.0, %v1231_v60  ;;  %v350_v1 = vpop.f32.mrb[16].mxu1  ;;  %v1077_v22 = vpop.f32.mrb[43].mxu0 }
 0x137   :  { %1236 = vpow2.f32 %v758_v34  ;;  %v722_v2 = vmin.f32 %v1877_v61, 0.0  ;;  %v351_v3 = vadd.f32 %v1822_v44, %v350_v1  ;;  %v352_v4 = vpop.f32.mrb[17].mxu1  ;;  %vm691_vm9 = vcmp.gt.f32.partialorder %v1877_v61, 0.0 }
 0x138   :  { %v842_v5 = vsel %vm687_vm5, %v1838_v11, %v941_v63 }
 0x139   :  { %v1233_v8 = vpop.eup %1232  ;;  %873 = vst.msk [vmem:[%s2112_s3 + $0x18] sm:$0xff] %vm150_vm1, %v842_v5  ;;  %v760_v36 = vmul.f32 1.442695, %v722_v2  ;;  %v1890_v0 = vadd.f32 %v1813_v38, %v351_v3  ;;  %v1909_v29 = vpop.f32.mrb[44].mxu0 }
 0x13a   :  { %v942_v12 = vadd.f32 -1.0, %v1233_v8  ;;  %v355_v13 = vpop.f32.mrb[18].mxu1  ;;  %v1080_v35 = vpop.f32.mrb[45].mxu0 }
 0x13b   :  { %1238 = vpow2.f32 %v760_v36  ;;  %v723_v11 = vmin.f32 %v1890_v0, 0.0  ;;  %v356_v14 = vadd.f32 %v1822_v44, %v355_v13  ;;  %v357_v15 = vpop.f32.mrb[19].mxu1  ;;  %vm692_vm10 = vcmp.gt.f32.partialorder %v1890_v0, 0.0 }
 0x13c   :  { %v843_v16 = vsel %vm688_vm6, %v1844_v20, %v942_v12 }
 0x13d   :  { %v1235_v19 = vpop.eup %1234  ;;  %874 = vst.msk [vmem:[%s2112_s3 + $0x20] sm:$0xff] %vm150_vm1, %v843_v16  ;;  %v762_v38 = vmul.f32 1.442695, %v723_v11  ;;  %v1903_v21 = vadd.f32 %v1815_v40, %v356_v14  ;;  %v1922_v48 = vpop.f32.mrb[46].mxu0 }
 0x13e   :  { %v943_v23 = vadd.f32 -1.0, %v1235_v19  ;;  %v360_v24 = vpop.f32.mrb[20].mxu1  ;;  %v1083_v52 = vpop.f32.mrb[47].mxu0 }
 0x13f   :  { %1240 = vpow2.f32 %v762_v38  ;;  %v724_v20 = vmin.f32 %v1903_v21, 0.0  ;;  %v361_v25 = vadd.f32 %v1822_v44, %v360_v24  ;;  %v362_v26 = vpop.f32.mrb[21].mxu1  ;;  %vm693_vm11 = vcmp.gt.f32.partialorder %v1903_v21, 0.0 }
 0x140   :  { %v844_v27 = vsel %vm689_vm7, %v1855_v31, %v943_v23 }
 0x141   :  { %v1237_v30 = vpop.eup %1236  ;;  %875 = vst.msk [vmem:[%s2112_s3 + $0x28] sm:$0xff] %vm150_vm1, %v844_v27  ;;  %v764_v40 = vmul.f32 1.442695, %v724_v20  ;;  %v1916_v33 = vadd.f32 %v1817_v42, %v361_v25  ;;  %v1935_v60 = vpop.f32.mrb[48].mxu0 }
 0x142   :  { %v944_v37 = vadd.f32 -1.0, %v1237_v30  ;;  %v365_v39 = vpop.f32.mrb[22].mxu1  ;;  %v1086_v63 = vpop.f32.mrb[49].mxu0 }
 0x143   :  { %1242 = vpow2.f32 %v764_v40  ;;  %v725_v31 = vmin.f32 %v1916_v33, 0.0  ;;  %v366_v41 = vadd.f32 %v1822_v44, %v365_v39  ;;  %v367_v43 = vpop.f32.mrb[23].mxu1  ;;  %vm694_vm12 = vcmp.gt.f32.partialorder %v1916_v33, 0.0 }
 0x144   :  { %v845_v46 = vsel %vm690_vm8, %v1866_v49, %v944_v37 }
 0x145   :  { %v1239_v32 = vpop.eup %1238  ;;  %876 = vst.msk [vmem:[%s2112_s3 + $0x30] sm:$0xff] %vm150_vm1, %v845_v46  ;;  %v766_v42 = vmul.f32 1.442695, %v725_v31  ;;  %v1929_v51 = vadd.f32 %v1824_v45, %v366_v41  ;;  %v1948_v8 = vpop.f32.mrb[50].mxu0 }
 0x146   :  { %v945_v53 = vadd.f32 -1.0, %v1239_v32  ;;  %v370_v54 = vpop.f32.mrb[24].mxu1  ;;  %v1089_v12 = vpop.f32.mrb[51].mxu0 }
 0x147   :  { %1244 = vpow2.f32 %v766_v42  ;;  %v726_v49 = vmin.f32 %v1929_v51, 0.0  ;;  %v371_v55 = vadd.f32 %v1822_v44, %v370_v54  ;;  %v372_v56 = vpop.f32.mrb[25].mxu1  ;;  %vm695_vm13 = vcmp.gt.f32.partialorder %v1929_v51, 0.0 }
 0x148   :  { %v846_v58 = vsel %vm691_vm9, %v1877_v61, %v945_v53 }
 0x149   :  { %v1241_v34 = vpop.eup %1240  ;;  %877 = vst.msk [vmem:[%s2112_s3 + $0x38] sm:$0xff] %vm150_vm1, %v846_v58  ;;  %v768_v45 = vmul.f32 1.442695, %v726_v49  ;;  %v1942_v62 = vadd.f32 %v1827_v50, %v371_v55  ;;  %v1961_v19 = vpop.f32.mrb[52].mxu0 }
 0x14a   :  { %v946_v1 = vadd.f32 -1.0, %v1241_v34  ;;  %v375_v2 = vpop.f32.mrb[26].mxu1  ;;  %v1092_v23 = vpop.f32.mrb[53].mxu0 }
 0x14b   :  { %1246 = vpow2.f32 %v768_v45  ;;  %v727_v61 = vmin.f32 %v1942_v62, 0.0  ;;  %v376_v3 = vadd.f32 %v1822_v44, %v375_v2  ;;  %v377_v4 = vpop.f32.mrb[27].mxu1  ;;  %vm696_vm14 = vcmp.gt.f32.partialorder %v1942_v62, 0.0 }
 0x14c   :  { %v847_v5 = vsel %vm692_vm10, %v1890_v0, %v946_v1 }
 0x14d   :  { %v1243_v36 = vpop.eup %1242  ;;  %878 = vst.msk [vmem:[%s2112_s3 + $0x40] sm:$0xff] %vm150_vm1, %v847_v5  ;;  %v770_v50 = vmul.f32 1.442695, %v727_v61  ;;  %v1955_v10 = vadd.f32 %v1830_v57, %v376_v3  ;;  %v1974_v30 = vpop.f32.mrb[54].mxu0 }
 0x14e   :  { %v947_v13 = vadd.f32 -1.0, %v1243_v36  ;;  %v380_v11 = vpop.f32.mrb[28].mxu1  ;;  %v1095_v37 = vpop.f32.mrb[55].mxu0 }
 0x14f   :  { %1248 = vpow2.f32 %v770_v50  ;;  %v728_v0 = vmin.f32 %v1955_v10, 0.0  ;;  %v381_v14 = vadd.f32 %v1822_v44, %v380_v11  ;;  %v382_v15 = vpop.f32.mrb[29].mxu1  ;;  %vm697_vm15 = vcmp.gt.f32.partialorder %v1955_v10, 0.0 }
 0x150   :  { %v848_v16 = vsel %vm693_vm11, %v1903_v21, %v947_v13 }
 0x151   :  { %v1245_v38 = vpop.eup %1244  ;;  %879 = vst.msk [vmem:[%s2112_s3 + $0x48] sm:$0xff] %vm150_vm1, %v848_v16  ;;  %v772_v57 = vmul.f32 1.442695, %v728_v0  ;;  %v1968_v22 = vadd.f32 %v1833_v6, %v381_v14  ;;  %v1987_v32 = vpop.f32.mrb[56].mxu0 }
 0x152   :  { %v948_v24 = vadd.f32 -1.0, %v1245_v38  ;;  %v385_v20 = vpop.f32.mrb[30].mxu1  ;;  %v1098_v53 = vpop.f32.mrb[57].mxu0 }
 0x153   :  { %1250 = vpow2.f32 %v772_v57  ;;  %v729_v21 = vmin.f32 %v1968_v22, 0.0  ;;  %v386_v25 = vadd.f32 %v1822_v44, %v385_v20  ;;  %v387_v26 = vpop.f32.mrb[31].mxu1  ;;  %vm698_vm0 = vcmp.gt.f32.partialorder %v1968_v22, 0.0 }
 0x154   :  { %v849_v27 = vsel %vm694_vm12, %v1916_v33, %v948_v24 }
 0x155   :  { %v1247_v40 = vpop.eup %1246  ;;  %880 = vst.msk [vmem:[%s2112_s3 + $0x50] sm:$0xff] %vm150_vm1, %v849_v27  ;;  %v774_v6 = vmul.f32 1.442695, %v729_v21  ;;  %v1981_v35 = vadd.f32 %v1836_v9, %v386_v25  ;;  %v1997_v34 = vpop.f32.mrb[58].mxu0 }
 0x156   :  { %v949_v39 = vadd.f32 -1.0, %v1247_v40  ;;  %v390_v31 = vpop.f32.mrb[32].mxu1  ;;  %v1101_v1 = vpop.f32.mrb[59].mxu0 }
 0x157   :  { %1252 = vpow2.f32 %v774_v6  ;;  %v730_v33 = vmin.f32 %v1981_v35, 0.0  ;;  %v391_v41 = vadd.f32 %v1822_v44, %v390_v31  ;;  %v392_v43 = vpop.f32.mrb[33].mxu1  ;;  %vm699_vm2 = vcmp.gt.f32.partialorder %v1981_v35, 0.0 }
 0x158   :  { %v850_v46 = vsel %vm695_vm13, %v1929_v51, %v949_v39 }
 0x159   :  { %v1249_v42 = vpop.eup %1248  ;;  %881 = vst.msk [vmem:[%s2112_s3 + $0x58] sm:$0xff] %vm150_vm1, %v850_v46  ;;  %v776_v9 = vmul.f32 1.442695, %v730_v33  ;;  %v611_v52 = vadd.f32 %v1842_v17, %v391_v41  ;;  %v2007_v36 = vpop.f32.mrb[60].mxu0 }
 0x15a   :  { %v950_v54 = vadd.f32 -1.0, %v1249_v42  ;;  %v395_v49 = vpop.f32.mrb[34].mxu1  ;;  %v1104_v13 = vpop.f32.mrb[61].mxu0 }
 0x15b   :  { %1254 = vpow2.f32 %v776_v9  ;;  %v731_v55 = vmin.f32 %v611_v52, 0.0  ;;  %v396_v51 = vadd.f32 %v1822_v44, %v395_v49  ;;  %v397_v56 = vpop.f32.mrb[35].mxu1  ;;  %vm700_vm3 = vcmp.gt.f32.partialorder %v611_v52, 0.0 }
 0x15c   :  { %v851_v58 = vsel %vm696_vm14, %v1942_v62, %v950_v54 }
 0x15d   :  { %v1251_v45 = vpop.eup %1250  ;;  %882 = vst.msk [vmem:[%s2112_s3 + $0x60] sm:$0xff] %vm150_vm1, %v851_v58  ;;  %v778_v17 = vmul.f32 1.442695, %v731_v55  ;;  %v616_v63 = vadd.f32 %v1848_v28, %v396_v51 }
 0x15e   :  { %v951_v2 = vadd.f32 -1.0, %v1251_v45  ;;  %v400_v61 = vpop.f32.mrb[36].mxu1 }
 0x15f   :  { %1256 = vpow2.f32 %v778_v17  ;;  %v732_v3 = vmin.f32 %v616_v63, 0.0  ;;  %v401_v62 = vadd.f32 %v1822_v44, %v400_v61  ;;  %v402_v4 = vpop.f32.mrb[37].mxu1  ;;  %vm701_vm4 = vcmp.gt.f32.partialorder %v616_v63, 0.0 }
 0x160   :  { %v852_v5 = vsel %vm697_vm15, %v1955_v10, %v951_v2 }
 0x161   :  { %v1253_v50 = vpop.eup %1252  ;;  %883 = vst.msk [vmem:[%s2112_s3 + $0x68] sm:$0xff] %vm150_vm1, %v852_v5  ;;  %v780_v28 = vmul.f32 1.442695, %v732_v3  ;;  %v621_v12 = vadd.f32 %v1859_v47, %v401_v62 }
 0x162   :  { %v952_v11 = vadd.f32 -1.0, %v1253_v50  ;;  %v405_v0 = vpop.f32.mrb[38].mxu1 }
 0x163   :  { %1258 = vpow2.f32 %v780_v28  ;;  %v733_v14 = vmin.f32 %v621_v12, 0.0  ;;  %v406_v10 = vadd.f32 %v1822_v44, %v405_v0  ;;  %v407_v15 = vpop.f32.mrb[39].mxu1  ;;  %vm702_vm5 = vcmp.gt.f32.partialorder %v621_v12, 0.0 }
 0x164   :  { %v853_v16 = vsel %vm698_vm0, %v1968_v22, %v952_v11 }
 0x165   :  { %v1255_v38 = vpop.eup %1254  ;;  %884 = vst.msk [vmem:[%s2112_s3 + $0x70] sm:$0xff] %vm150_vm1, %v853_v16  ;;  %v782_v57 = vmul.f32 1.442695, %v733_v14  ;;  %v626_v47 = vadd.f32 %v1870_v59, %v406_v10 }
 0x166   :  { %v953_v23 = vadd.f32 -1.0, %v1255_v38  ;;  %v410_v24 = vpop.f32.mrb[40].mxu1 }
 0x167   :  { %1260 = vpow2.f32 %v782_v57  ;;  %v734_v20 = vmin.f32 %v626_v47, 0.0  ;;  %v411_v21 = vadd.f32 %v1822_v44, %v410_v24  ;;  %v412_v25 = vpop.f32.mrb[41].mxu1  ;;  %vm703_vm6 = vcmp.gt.f32.partialorder %v626_v47, 0.0 }
 0x168   :  { %v854_v22 = vsel %vm699_vm2, %v1981_v35, %v953_v23  ;;  %vm900_vm2 = vcmask 254976  }
 0x169   :  { %v1257_v26 = vpop.eup %1256  ;;  %885 = vst.msk [vmem:[%s2112_s3 + $0x78] sm:$0xff] %vm150_vm1, %v854_v22  ;;  %v784_v27 = vmul.f32 1.442695, %v734_v20  ;;  %v631_v59 = vadd.f32 %v1883_v7, %v411_v21 }
 0x16a   :  { %v954_v40 = vadd.f32 -1.0, %v1257_v26  ;;  %v415_v6 = vpop.f32.mrb[42].mxu1 }
 0x16b   :  { %1262 = vpow2.f32 %v784_v27  ;;  %v735_v37 = vmin.f32 %v631_v59, 0.0  ;;  %v416_v39 = vadd.f32 %v1822_v44, %v415_v6  ;;  %v417_v31 = vpop.f32.mrb[43].mxu1  ;;  %vm704_vm7 = vcmp.gt.f32.partialorder %v631_v59, 0.0 }
 0x16c   :  { %v855_v33 = vsel %vm700_vm3, %v611_v52, %v954_v40 }
 0x16d   :  { %v1259_v41 = vpop.eup %1258  ;;  %886 = vst.msk [vmem:[%s2112_s3 + $0x80] sm:$0xff] %vm150_vm1, %v855_v33  ;;  %v786_v35 = vmul.f32 1.442695, %v735_v37  ;;  %v636_v43 = vadd.f32 %v1896_v18, %v416_v39 }
 0x16e   :  { %v955_v46 = vadd.f32 -1.0, %v1259_v41  ;;  %v420_v7 = vpop.f32.mrb[44].mxu1 }
 0x16f   :  { %1264 = vpow2.f32 %v786_v35  ;;  %v736_v42 = vmin.f32 %v636_v43, 0.0  ;;  %v421_v9 = vadd.f32 %v1822_v44, %v420_v7  ;;  %v422_v53 = vpop.f32.mrb[45].mxu1  ;;  %vm705_vm8 = vcmp.gt.f32.partialorder %v636_v43, 0.0 }
 0x170   :  { %v856_v54 = vsel %vm701_vm4, %v616_v63, %v955_v46 }
 0x171   :  { %v1261_v49 = vpop.eup %1260  ;;  %887 = vst.msk [vmem:[%s2112_s3 + $0x88] sm:$0xff] %vm150_vm1, %v856_v54  ;;  %v788_v52 = vmul.f32 1.442695, %v736_v42  ;;  %v641_v55 = vadd.f32 %v1909_v29, %v421_v9 }
 0x172   :  { %v956_v51 = vadd.f32 -1.0, %v1261_v49  ;;  %v425_v18 = vpop.f32.mrb[46].mxu1 }
 0x173   :  { %1266 = vpow2.f32 %v788_v52  ;;  %v737_v56 = vmin.f32 %v641_v55, 0.0  ;;  %v426_v58 = vadd.f32 %v1822_v44, %v425_v18  ;;  %v427_v45 = vpop.f32.mrb[47].mxu1  ;;  %vm706_vm9 = vcmp.gt.f32.partialorder %v641_v55, 0.0 }
 0x174   :  { %v857_v17 = vsel %vm702_vm5, %v621_v12, %v956_v51 }
 0x175   :  { %v1263_v1 = vpop.eup %1262  ;;  %888 = vst.msk [vmem:[%s2112_s3 + $0x90] sm:$0xff] %vm150_vm1, %v857_v17  ;;  %v790_v63 = vmul.f32 1.442695, %v737_v56  ;;  %v646_v2 = vadd.f32 %v1922_v48, %v426_v58 }
 0x176   :  { %v957_v61 = vadd.f32 -1.0, %v1263_v1  ;;  %v430_v29 = vpop.f32.mrb[48].mxu1 }
 0x177   :  { %1268 = vpow2.f32 %v790_v63  ;;  %v738_v3 = vmin.f32 %v646_v2, 0.0  ;;  %v431_v62 = vadd.f32 %v1822_v44, %v430_v29  ;;  %v432_v4 = vpop.f32.mrb[49].mxu1  ;;  %vm707_vm10 = vcmp.gt.f32.partialorder %v646_v2, 0.0 }
 0x178   :  { %v858_v5 = vsel %vm703_vm6, %v626_v47, %v957_v61 }
 0x179   :  { %v1265_v50 = vpop.eup %1264  ;;  %889 = vst.msk [vmem:[%s2112_s3 + $0x98] sm:$0xff] %vm150_vm1, %v858_v5  ;;  %v792_v28 = vmul.f32 1.442695, %v738_v3  ;;  %v651_v12 = vadd.f32 %v1935_v60, %v431_v62 }
 0x17a   :  { %v958_v13 = vadd.f32 -1.0, %v1265_v50  ;;  %v435_v48 = vpop.f32.mrb[50].mxu1 }
 0x17b   :  { %1270 = vpow2.f32 %v792_v28  ;;  %v739_v11 = vmin.f32 %v651_v12, 0.0  ;;  %v436_v0 = vadd.f32 %v1822_v44, %v435_v48  ;;  %v437_v14 = vpop.f32.mrb[51].mxu1  ;;  %vm708_vm11 = vcmp.gt.f32.partialorder %v651_v12, 0.0 }
 0x17c   :  { %v859_v10 = vsel %vm704_vm7, %v631_v59, %v958_v13 }
 0x17d   :  { %v1267_v15 = vpop.eup %1266  ;;  %890 = vst.msk [vmem:[%s2112_s3 + $0xa0] sm:$0xff] %vm150_vm1, %v859_v10  ;;  %v794_v16 = vmul.f32 1.442695, %v739_v11  ;;  %v656_v38 = vadd.f32 %v1948_v8, %v436_v0 }
 0x17e   :  { %v959_v57 = vadd.f32 -1.0, %v1267_v15  ;;  %v440_v60 = vpop.f32.mrb[52].mxu1 }
 0x17f   :  { %1272 = vpow2.f32 %v794_v16  ;;  %v740_v47 = vmin.f32 %v656_v38, 0.0  ;;  %v441_v23 = vadd.f32 %v1822_v44, %v440_v60  ;;  %v442_v24 = vpop.f32.mrb[53].mxu1  ;;  %vm709_vm12 = vcmp.gt.f32.partialorder %v656_v38, 0.0 }
 0x180   :  { %v860_v20 = vsel %vm705_vm8, %v636_v43, %v959_v57 }
 0x181   :  { %v1269_v21 = vpop.eup %1268  ;;  %891 = vst.msk [vmem:[%s2112_s3 + $0xa8] sm:$0xff] %vm150_vm1, %v860_v20  ;;  %v796_v25 = vmul.f32 1.442695, %v740_v47  ;;  %v661_v22 = vadd.f32 %v1961_v19, %v441_v23 }
 0x182   :  { %v960_v26 = vadd.f32 -1.0, %v1269_v21  ;;  %v445_v8 = vpop.f32.mrb[54].mxu1 }
 0x183   :  { %1274 = vpow2.f32 %v796_v25  ;;  %v741_v27 = vmin.f32 %v661_v22, 0.0  ;;  %v446_v59 = vadd.f32 %v1822_v44, %v445_v8  ;;  %v447_v40 = vpop.f32.mrb[55].mxu1  ;;  %vm710_vm13 = vcmp.gt.f32.partialorder %v661_v22, 0.0 }
 0x184   :  { %v861_v6 = vsel %vm706_vm9, %v641_v55, %v960_v26 }
 0x185   :  { %v1271_v37 = vpop.eup %1270  ;;  %892 = vst.msk [vmem:[%s2112_s3 + $0xb0] sm:$0xff] %vm150_vm1, %v861_v6  ;;  %v798_v39 = vmul.f32 1.442695, %v741_v27  ;;  %v666_v31 = vadd.f32 %v1974_v30, %v446_v59 }
 0x186   :  { %v961_v33 = vadd.f32 -1.0, %v1271_v37  ;;  %v450_v19 = vpop.f32.mrb[56].mxu1 }
 0x187   :  { %1276 = vpow2.f32 %v798_v39  ;;  %v742_v41 = vmin.f32 %v666_v31, 0.0  ;;  %v451_v35 = vadd.f32 %v1822_v44, %v450_v19  ;;  %v452_v43 = vpop.f32.mrb[57].mxu1  ;;  %vm711_vm14 = vcmp.gt.f32.partialorder %v666_v31, 0.0 }
 0x188   :  { %v862_v46 = vsel %vm707_vm10, %v646_v2, %v961_v33 }
 0x189   :  { %v1273_v7 = vpop.eup %1272  ;;  %893 = vst.msk [vmem:[%s2112_s3 + $0xb8] sm:$0xff] %vm150_vm1, %v862_v46  ;;  %v800_v42 = vmul.f32 1.442695, %v742_v41  ;;  %v671_v9 = vadd.f32 %v1987_v32, %v451_v35 }
 0x18a   :  { %v962_v53 = vadd.f32 -1.0, %v1273_v7  ;;  %v455_v30 = vpop.f32.mrb[58].mxu1 }
 0x18b   :  { %1278 = vpow2.f32 %v800_v42  ;;  %v743_v54 = vmin.f32 %v671_v9, 0.0  ;;  %v456_v49 = vadd.f32 %v1822_v44, %v455_v30  ;;  %v457_v52 = vpop.f32.mrb[59].mxu1  ;;  %vm712_vm15 = vcmp.gt.f32.partialorder %v671_v9, 0.0 }
 0x18c   :  { %v863_v55 = vsel %vm708_vm11, %v651_v12, %v962_v53 }
 0x18d   :  { %v1275_v51 = vpop.eup %1274  ;;  %894 = vst.msk [vmem:[%s2112_s3 + $0xc0] sm:$0xff] %vm150_vm1, %v863_v55  ;;  %v802_v18 = vmul.f32 1.442695, %v743_v54  ;;  %v676_v56 = vadd.f32 %v1997_v34, %v456_v49 }
 0x18e   :  { %v963_v58 = vadd.f32 -1.0, %v1275_v51  ;;  %v460_v32 = vpop.f32.mrb[60].mxu1 }
 0x18f   :  { %1280 = vpow2.f32 %v802_v18  ;;  %v744_v45 = vmin.f32 %v676_v56, 0.0  ;;  %v461_v17 = vadd.f32 %v1822_v44, %v460_v32  ;;  %v462_v1 = vpop.f32.mrb[61].mxu1  ;;  %vm713_vm0 = vcmp.gt.f32.partialorder %v676_v56, 0.0 }
 0x190   :  { %v864_v63 = vsel %vm709_vm12, %v656_v38, %v963_v58 }
 0x191   :  { %v1277_v2 = vpop.eup %1276  ;;  %895 = vst.msk [vmem:[%s2112_s3 + $0xc8] sm:$0xff] %vm150_vm1, %v864_v63  ;;  %v804_v61 = vmul.f32 1.442695, %v744_v45  ;;  %v681_v29 = vadd.f32 %v2007_v36, %v461_v17 }
 0x192   :  { %v964_v3 = vadd.f32 -1.0, %v1277_v2 }
 0x193   :  { %1282 = vpow2.f32 %v804_v61  ;;  %v745_v34 = vmin.f32 %v681_v29, 0.0  ;;  %vm714_vm3 = vcmp.gt.f32.partialorder %v681_v29, 0.0 }
 0x194   :  { %v865_v62 = vsel %vm710_vm13, %v661_v22, %v964_v3 }
 0x195   :  { %v1279_v4 = vpop.eup %1278  ;;  %896 = vst.msk [vmem:[%s2112_s3 + $0xd0] sm:$0xff] %vm150_vm1, %v865_v62  ;;  %v806_v44 = vmul.f32 1.442695, %v745_v34 }
 0x196   :  { %v965_v5 = vadd.f32 -1.0, %v1279_v4 }
 0x197   :  { %1284 = vpow2.f32 %v806_v44 }
 0x198   :  { %v866_v50 = vsel %vm711_vm14, %v666_v31, %v965_v5 }
 0x199   :  { %v1281_v28 = vpop.eup %1280  ;;  %897 = vst.msk [vmem:[%s2112_s3 + $0xd8] sm:$0xff] %vm150_vm1, %v866_v50 }
 0x19a   :  { %v966_v36 = vadd.f32 -1.0, %v1281_v28 }
 0x19c   :  { %v867_v12 = vsel %vm712_vm15, %v671_v9, %v966_v36 }
 0x19d   :  { %v1283_v13 = vpop.eup %1282  ;;  %898 = vst.msk [vmem:[%s2112_s3 + $0xe0] sm:$0xff] %vm150_vm1, %v867_v12 }
 0x19e   :  { %v967_v48 = vadd.f32 -1.0, %v1283_v13 }
 0x1a0   :  { %v868_v11 = vsel %vm713_vm0, %v676_v56, %v967_v48 }
 0x1a1   :  { %v1285_v0 = vpop.eup %1284  ;;  %899 = vst.msk [vmem:[%s2112_s3 + $0xe8] sm:$0xff] %vm150_vm1, %v868_v11 }
 0x1a2   :  { %v968_v14 = vadd.f32 -1.0, %v1285_v0 }
 0x1a4   :  { %v869_v10 = vsel %vm714_vm3, %v681_v29, %v968_v14 }
 0x1a5   :  { %901 = vst.msk [vmem:[%s2112_s3 + $0xf0] sm:$0x3] %vm900_vm2, %v869_v10 }

// kernel: icm_forward.7
= control target key start
LH: loop header
LB: loop body
LE: loop exit
PB: predicated region body
PF: predicated region fallthrough
CT: control target
= control target key end

     0   :  { %v584_v3 = vmov 0.0|0.0   ;;  %vm585_vm0 = vmmov 0   ;;  %v586_v4 = vmov 0.0   ;;  %vm84_vm1 = vcmask 261120   ;;  %s873_s1 = inlined_call_operand.vmem [shape: f32[288,32], index: 1, kind: input, shape index: {}]   ;;  %s874_s0 = inlined_call_operand.vmem [shape: f32[72,288], index: 0, kind: input, shape index: {}]   ;;  %s875_s2 = inlined_call_operand.vmem [shape: f32[1,32], index: 2, kind: input, shape index: {}]   ;;  %s876_s3 = inlined_call_operand.vmem [shape: f32[72,32], index: 3, kind: output, shape index: {}]  }
   0x1   :  { %v57_v0 = vld [vmem:[%s873_s1 + $0x80] sm:$0xff]  ;;  %v58_v1 = vld [vmem:[%s873_s1 + $0x88] sm:$0xff]  ;;  %557 = vmatprep.subr.bf16.mxu1 %v584_v3  ;;  %498 = vmatprep.mubr.msk.f32.mxu1 %vm585_vm0, %v586_v4  ;;  %v59_v7 = vld [vmem:[%s873_s1 + $0x90] sm:$0xff] }
   0x2   :  { %v41_v2 = vld [vmem:[%s873_s1] sm:$0xff]  ;;  %v525_v5 = vpack.c.bf16 %v58_v1, %v57_v0  ;;  %v42_v6 = vld [vmem:[%s873_s1 + $0x8] sm:$0xff]  ;;  %v60_v8 = vld [vmem:[%s873_s1 + $0x98] sm:$0xff] }
   0x3   :  { %v527_v9 = vpack.c.bf16 %v42_v6, %v41_v2  ;;  %v529_v10 = vpack.c.bf16 %v60_v8, %v59_v7  ;;  %v43_v11 = vld [vmem:[%s873_s1 + $0x10] sm:$0xff]  ;;  %v44_v12 = vld [vmem:[%s873_s1 + $0x18] sm:$0xff]  ;;  %v61_v13 = vld [vmem:[%s873_s1 + $0xa0] sm:$0xff] }
   0x4   :  { %526 = vmatprep.subr.bf16.mxu0 %v525_v5  ;;  %v62_v14 = vld [vmem:[%s873_s1 + $0xa8] sm:$0xff]  ;;  %v531_v15 = vpack.c.bf16 %v44_v12, %v43_v11  ;;  %v45_v17 = vld [vmem:[%s873_s1 + $0x20] sm:$0xff]  ;;  %v63_v19 = vld [vmem:[%s873_s1 + $0xb0] sm:$0xff] }
   0x5   :  { %528 = vmatpush3.bf16.msra.mxu0 %v527_v9  ;;  %v533_v16 = vpack.c.bf16 %v62_v14, %v61_v13  ;;  %v46_v18 = vld [vmem:[%s873_s1 + $0x28] sm:$0xff]  ;;  %v64_v20 = vld [vmem:[%s873_s1 + $0xb8] sm:$0xff]  ;;  %v47_v23 = vld [vmem:[%s873_s1 + $0x30] sm:$0xff] }
   0x6   :  { %530 = vmatprep.subr.bf16.mxu0 %v529_v10  ;;  %v535_v21 = vpack.c.bf16 %v46_v18, %v45_v17  ;;  %v537_v22 = vpack.c.bf16 %v64_v20, %v63_v19  ;;  %v48_v24 = vld [vmem:[%s873_s1 + $0x38] sm:$0xff]  ;;  %v65_v25 = vld [vmem:[%s873_s1 + $0xc0] sm:$0xff]  ;;  %v66_v26 = vld [vmem:[%s873_s1 + $0xc8] sm:$0xff] }
   0x7   :  { %v73_v27 = vld [vmem:[%s873_s1 + $0x100] sm:$0xff]  ;;  %v74_v28 = vld [vmem:[%s873_s1 + $0x108] sm:$0xff]  ;;  %v539_v30 = vpack.c.bf16 %v48_v24, %v47_v23  ;;  %v75_v32 = vld [vmem:[%s873_s1 + $0x110] sm:$0xff]  ;;  %v541_v34 = vpack.c.bf16 %v66_v26, %v65_v25 }
   0x8   :  { %v15_v29 = vld [vmem:[%s874_s0 + $0x8] sm:$0xff]  ;;  %v558_v31 = vpack.c.bf16 %v74_v28, %v73_v27  ;;  %v76_v33 = vld [vmem:[%s873_s1 + $0x118] sm:$0xff]  ;;  %v49_v35 = vld [vmem:[%s873_s1 + $0x40] sm:$0xff] }
   0x9   :  { %532 = vmatpush3.bf16.msra.mxu0 %v531_v15  ;;  %176 = vmatprep.mubr.f32.mxu0 %v15_v29  ;;  %v50_v36 = vld [vmem:[%s873_s1 + $0x48] sm:$0xff]  ;;  %v67_v37 = vld [vmem:[%s873_s1 + $0xd0] sm:$0xff]  ;;  %v68_v38 = vld [vmem:[%s873_s1 + $0xd8] sm:$0xff]  ;;  %v561_v39 = vpack.c.bf16 %v76_v33, %v75_v32 }
   0xa   :  { %534 = vmatprep.subr.bf16.mxu0 %v533_v16  ;;  %559 = vmatpush3.bf16.msra.mxu1 %v558_v31  ;;  %v543_v40 = vpack.c.bf16 %v50_v36, %v49_v35  ;;  %v545_v41 = vpack.c.bf16 %v68_v38, %v67_v37  ;;  %v51_v42 = vld [vmem:[%s873_s1 + $0x50] sm:$0xff]  ;;  %v52_v43 = vld [vmem:[%s873_s1 + $0x58] sm:$0xff]  ;;  %v69_v44 = vld [vmem:[%s873_s1 + $0xe0] sm:$0xff] }
   0xb   :  { %560 = vmatprep.subr.bf16.mxu1 %v584_v3  ;;  %v70_v45 = vld [vmem:[%s873_s1 + $0xe8] sm:$0xff]  ;;  %v16_v46 = vld [vmem:[%s874_s0 + $0x10] sm:$0xff]  ;;  %v547_v47 = vpack.c.bf16 %v52_v43, %v51_v42  ;;  %v53_v49 = vld [vmem:[%s873_s1 + $0x60] sm:$0xff] }
   0xc   :  { %v549_v48 = vpack.c.bf16 %v70_v45, %v69_v44  ;;  %v54_v50 = vld [vmem:[%s873_s1 + $0x68] sm:$0xff]  ;;  %v71_v51 = vld [vmem:[%s873_s1 + $0xf0] sm:$0xff]  ;;  %v72_v52 = vld [vmem:[%s873_s1 + $0xf8] sm:$0xff] }
   0xd   :  { %536 = vmatpush3.bf16.msra.mxu0 %v535_v21  ;;  %v19_v53 = vld [vmem:[%s874_s0 + $0x28] sm:$0xff]  ;;  %v551_v54 = vpack.c.bf16 %v54_v50, %v53_v49  ;;  %v553_v55 = vpack.c.bf16 %v72_v52, %v71_v51  ;;  %v55_v56 = vld [vmem:[%s873_s1 + $0x70] sm:$0xff]  ;;  %v56_v57 = vld [vmem:[%s873_s1 + $0x78] sm:$0xff] }
   0xe   :  { %538 = vmatprep.subr.bf16.mxu0 %v537_v22  ;;  %562 = vmatpush3.bf16.msra.mxu1 %v561_v39  ;;  %v22_v58 = vld [vmem:[%s874_s0 + $0x40] sm:$0xff]  ;;  %v555_v59 = vpack.c.bf16 %v56_v57, %v55_v56  ;;  %v25_v60 = vld [vmem:[%s874_s0 + $0x58] sm:$0xff]  ;;  %v28_v63 = vld [vmem:[%s874_s0 + $0x70] sm:$0xff] }
   0xf   :  { %v14_v61 = vld [vmem:[%s874_s0] sm:$0xff]  ;;  %v17_v0 = vld [vmem:[%s874_s0 + $0x18] sm:$0xff]  ;;  %v31_v2 = vld [vmem:[%s874_s0 + $0x88] sm:$0xff] }
  0x10   :  { %v18_v62 = vld [vmem:[%s874_s0 + $0x20] sm:$0xff]  ;;  %v21_v1 = vld [vmem:[%s874_s0 + $0x38] sm:$0xff]  ;;  %v20_v3 = vld [vmem:[%s874_s0 + $0x30] sm:$0xff] }
  0x11   :  { %540 = vmatpush3.bf16.msra.mxu0 %v539_v30  ;;  %499 = vmatmul.mubr.msk.f32.vlgmr.msra.gmra.mrb[0].mxu1 %vm84_vm1, %v16_v46  ;;  %v24_v5 = vld [vmem:[%s874_s0 + $0x50] sm:$0xff]  ;;  %v34_v6 = vld [vmem:[%s874_s0 + $0xa0] sm:$0xff]  ;;  %v23_v7 = vld [vmem:[%s874_s0 + $0x48] sm:$0xff] }
  0x12   :  { %542 = vmatprep.subr.bf16.mxu0 %v541_v34  ;;  %501 = vmatprep.mubr.msk.f32.mxu1 %vm585_vm0, %v586_v4  ;;  %v27_v8 = vld [vmem:[%s874_s0 + $0x68] sm:$0xff]  ;;  %v37_v9 = vld [vmem:[%s874_s0 + $0xb8] sm:$0xff]  ;;  %v26_v10 = vld [vmem:[%s874_s0 + $0x60] sm:$0xff] }
  0x13   :  { %v30_v11 = vld [vmem:[%s874_s0 + $0x80] sm:$0xff]  ;;  %v40_v12 = vld [vmem:[%s874_s0 + $0xd0] sm:$0xff]  ;;  %v29_v13 = vld [vmem:[%s874_s0 + $0x78] sm:$0xff] }
  0x14   :  { %v33_v14 = vld [vmem:[%s874_s0 + $0x98] sm:$0xff]  ;;  %v36_v15 = vld [vmem:[%s874_s0 + $0xb0] sm:$0xff]  ;;  %v35_v16 = vld [vmem:[%s874_s0 + $0xa8] sm:$0xff] }
  0x15   :  { %544 = vmatpush3.bf16.msra.mxu0 %v543_v40  ;;  %502 = vmatmul.mubr.msk.f32.gmra.mrb[2].mxu1 %vm84_vm1, %v19_v53  ;;  %v39_v17 = vld [vmem:[%s874_s0 + $0xc8] sm:$0xff]  ;;  %v38_v18 = vld [vmem:[%s874_s0 + $0xc0] sm:$0xff] }
  0x16   :  { %546 = vmatprep.subr.bf16.mxu0 %v545_v41  ;;  %504 = vmatprep.mubr.msk.f32.mxu1 %vm585_vm0, %v586_v4  ;;  %v826_v29 = vld [vmem:[%s875_s2] ss:$0 sm:$0xff] }
  0x19   :  { %548 = vmatpush3.bf16.msra.mxu0 %v547_v47  ;;  %505 = vmatmul.mubr.msk.f32.gmra.mrb[4].mxu1 %vm84_vm1, %v22_v58 }
  0x1a   :  { %550 = vmatprep.subr.bf16.mxu0 %v549_v48  ;;  %507 = vmatprep.mubr.msk.f32.mxu1 %vm585_vm0, %v586_v4 }
  0x1d   :  { %552 = vmatpush3.bf16.msra.mxu0 %v551_v54  ;;  %508 = vmatmul.mubr.msk.f32.gmra.mrb[6].mxu1 %vm84_vm1, %v25_v60 }
  0x1e   :  { %554 = vmatprep.subr.bf16.mxu0 %v553_v55  ;;  %510 = vmatprep.mubr.msk.f32.mxu1 %vm585_vm0, %v586_v4 }
  0x21   :  { %556 = vmatpush3.bf16.msra.mxu0 %v555_v59  ;;  %511 = vmatmul.mubr.msk.f32.gmra.mrb[8].mxu1 %vm84_vm1, %v28_v63 }
  0x22   :  { %513 = vmatprep.mubr.msk.f32.mxu1 %vm585_vm0, %v586_v4 }
  0x24   :  { %177 = vmatmul.mubr.f32.vlgmr.msra.gmra.mrb[0].mxu0 %v14_v61 }
  0x25   :  { %181 = vmatprep.mubr.f32.mxu0 %v18_v62  ;;  %514 = vmatmul.mubr.msk.f32.gmra.mrb[10].mxu1 %vm84_vm1, %v31_v2 }
  0x26   :  { %516 = vmatprep.mubr.msk.f32.mxu1 %vm585_vm0, %v586_v4 }
  0x28   :  { %182 = vmatmul.mubr.f32.gmra.mrb[2].mxu0 %v17_v0 }
  0x29   :  { %186 = vmatprep.mubr.f32.mxu0 %v21_v1  ;;  %517 = vmatmul.mubr.msk.f32.gmra.mrb[12].mxu1 %vm84_vm1, %v34_v6 }
  0x2a   :  { %519 = vmatprep.mubr.msk.f32.mxu1 %vm585_vm0, %v586_v4 }
  0x2c   :  { %187 = vmatmul.mubr.f32.gmra.mrb[4].mxu0 %v20_v3 }
  0x2d   :  { %191 = vmatprep.mubr.f32.mxu0 %v24_v5  ;;  %520 = vmatmul.mubr.msk.f32.gmra.mrb[14].mxu1 %vm84_vm1, %v37_v9 }
  0x2e   :  { %522 = vmatprep.mubr.msk.f32.mxu1 %vm585_vm0, %v586_v4  ;;  %v32_v4 = vld [vmem:[%s874_s0 + $0x90] sm:$0xff] }
  0x30   :  { %192 = vmatmul.mubr.f32.gmra.mrb[6].mxu0 %v23_v7 }
  0x31   :  { %196 = vmatprep.mubr.f32.mxu0 %v27_v8  ;;  %523 = vmatmul.mubr.msk.f32.gmra.mrb[16].mxu1 %vm84_vm1, %v40_v12 }
  0x34   :  { %197 = vmatmul.mubr.f32.gmra.mrb[8].mxu0 %v26_v10 }
  0x35   :  { %201 = vmatprep.mubr.f32.mxu0 %v30_v11 }
  0x38   :  { %202 = vmatmul.mubr.f32.gmra.mrb[10].mxu0 %v29_v13 }
  0x39   :  { %206 = vmatprep.mubr.f32.mxu0 %v33_v14 }
  0x3c   :  { %207 = vmatmul.mubr.f32.gmra.mrb[12].mxu0 %v32_v4 }
  0x3d   :  { %211 = vmatprep.mubr.f32.mxu0 %v36_v15 }
  0x40   :  { %212 = vmatmul.mubr.f32.gmra.mrb[14].mxu0 %v35_v16 }
  0x41   :  { %216 = vmatprep.mubr.f32.mxu0 %v39_v17 }
  0x44   :  { %217 = vmatmul.mubr.f32.gmra.mrb[16].mxu0 %v38_v18 }
  0xe4   :  { %v288_v19 = vpop.f32.mrb[0].mxu1 }
  0xe5   :  { %v500_v20 = vpop.f32.mrb[1].mxu1 }
  0xe8   :  { %v293_v21 = vpop.f32.mrb[2].mxu1 }
  0xe9   :  { %v503_v22 = vpop.f32.mrb[3].mxu1 }
  0xec   :  { %v298_v23 = vpop.f32.mrb[4].mxu1 }
  0xed   :  { %v506_v24 = vpop.f32.mrb[5].mxu1 }
  0xf0   :  { %v303_v25 = vpop.f32.mrb[6].mxu1 }
  0xf1   :  { %v509_v26 = vpop.f32.mrb[7].mxu1 }
  0xf4   :  { %v308_v31 = vpop.f32.mrb[8].mxu1 }
  0xf5   :  { %v512_v32 = vpop.f32.mrb[9].mxu1 }
  0xf7   :  { %v450_v27 = vpop.f32.mrb[0].mxu0 }
  0xf8   :  { %v451_v28 = vpop.f32.mrb[1].mxu0  ;;  %v313_v38 = vpop.f32.mrb[10].mxu1 }
  0xf9   :  { %v452_v30 = vadd.f32 %v451_v28, %v450_v27  ;;  %v515_v39 = vpop.f32.mrb[11].mxu1 }
  0xfb   :  { %v453_v33 = vpop.f32.mrb[2].mxu0  ;;  %v179_v34 = vadd.f32 %v452_v30, %v826_v29 }
  0xfc   :  { %v454_v35 = vpop.f32.mrb[3].mxu0  ;;  %v318_v47 = vpop.f32.mrb[12].mxu1 }
  0xfd   :  { %v289_v36 = vadd.f32 %v288_v19, %v179_v34  ;;  %v455_v37 = vadd.f32 %v454_v35, %v453_v33  ;;  %v518_v48 = vpop.f32.mrb[13].mxu1 }
  0xff   :  { %v341_v40 = vmin.f32 %v289_v36, 0.0  ;;  %v456_v41 = vpop.f32.mrb[4].mxu0  ;;  %v184_v42 = vadd.f32 %v455_v37, %v826_v29  ;;  %vm332_vm2 = vcmp.gt.f32.partialorder %v289_v36, 0.0 }
 0x100   :  { %v457_v43 = vpop.f32.mrb[5].mxu0  ;;  %v323_v56 = vpop.f32.mrb[14].mxu1 }
 0x101   :  { %v350_v44 = vmul.f32 1.442695, %v341_v40  ;;  %v294_v45 = vadd.f32 %v293_v21, %v184_v42  ;;  %v458_v46 = vadd.f32 %v457_v43, %v456_v41  ;;  %v521_v57 = vpop.f32.mrb[15].mxu1 }
 0x103   :  { %566 = vpow2.f32 %v350_v44  ;;  %v342_v49 = vmin.f32 %v294_v45, 0.0  ;;  %v459_v50 = vpop.f32.mrb[6].mxu0  ;;  %v189_v51 = vadd.f32 %v458_v46, %v826_v29  ;;  %vm333_vm3 = vcmp.gt.f32.partialorder %v294_v45, 0.0 }
 0x104   :  { %v460_v52 = vpop.f32.mrb[7].mxu0  ;;  %v328_v1 = vpop.f32.mrb[16].mxu1 }
 0x105   :  { %v352_v53 = vmul.f32 1.442695, %v342_v49  ;;  %v299_v54 = vadd.f32 %v298_v23, %v189_v51  ;;  %v461_v55 = vadd.f32 %v460_v52, %v459_v50  ;;  %v524_v2 = vpop.f32.mrb[17].mxu1 }
 0x107   :  { %568 = vpow2.f32 %v352_v53  ;;  %v343_v58 = vmin.f32 %v299_v54, 0.0  ;;  %v462_v59 = vpop.f32.mrb[8].mxu0  ;;  %v194_v60 = vadd.f32 %v461_v55, %v826_v29  ;;  %vm334_vm4 = vcmp.gt.f32.partialorder %v299_v54, 0.0 }
 0x108   :  { %v463_v61 = vpop.f32.mrb[9].mxu0 }
 0x109   :  { %v354_v62 = vmul.f32 1.442695, %v343_v58  ;;  %v304_v63 = vadd.f32 %v303_v25, %v194_v60  ;;  %v464_v0 = vadd.f32 %v463_v61, %v462_v59 }
 0x10b   :  { %570 = vpow2.f32 %v354_v62  ;;  %v344_v3 = vmin.f32 %v304_v63, 0.0  ;;  %v465_v5 = vpop.f32.mrb[10].mxu0  ;;  %v199_v6 = vadd.f32 %v464_v0, %v826_v29  ;;  %vm335_vm5 = vcmp.gt.f32.partialorder %v304_v63, 0.0 }
 0x10c   :  { %v466_v7 = vpop.f32.mrb[11].mxu0 }
 0x10d   :  { %v567_v8 = vpop.eup %566  ;;  %v356_v9 = vmul.f32 1.442695, %v344_v3  ;;  %v309_v10 = vadd.f32 %v308_v31, %v199_v6  ;;  %v467_v11 = vadd.f32 %v466_v7, %v465_v5 }
 0x10e   :  { %v409_v12 = vadd.f32 -1.0, %v567_v8 }
 0x10f   :  { %572 = vpow2.f32 %v356_v9  ;;  %v345_v13 = vmin.f32 %v309_v10, 0.0  ;;  %v468_v14 = vpop.f32.mrb[12].mxu0  ;;  %v204_v4 = vadd.f32 %v467_v11, %v826_v29  ;;  %vm336_vm6 = vcmp.gt.f32.partialorder %v309_v10, 0.0 }
 0x110   :  { %v377_v15 = vsel %vm332_vm2, %v289_v36, %v409_v12  ;;  %v469_v16 = vpop.f32.mrb[13].mxu0 }
 0x111   :  { %v569_v17 = vpop.eup %568  ;;  %386 = vst.msk [vmem:[%s876_s3] sm:$0xff] %vm84_vm1, %v377_v15  ;;  %v358_v18 = vmul.f32 1.442695, %v345_v13  ;;  %v314_v19 = vadd.f32 %v313_v38, %v204_v4  ;;  %v470_v20 = vadd.f32 %v469_v16, %v468_v14 }
 0x112   :  { %v410_v21 = vadd.f32 -1.0, %v569_v17 }
 0x113   :  { %574 = vpow2.f32 %v358_v18  ;;  %v346_v22 = vmin.f32 %v314_v19, 0.0  ;;  %v471_v23 = vpop.f32.mrb[14].mxu0  ;;  %v209_v24 = vadd.f32 %v470_v20, %v826_v29  ;;  %vm337_vm7 = vcmp.gt.f32.partialorder %v314_v19, 0.0 }
 0x114   :  { %v378_v25 = vsel %vm333_vm3, %v294_v45, %v410_v21  ;;  %v472_v26 = vpop.f32.mrb[15].mxu0 }
 0x115   :  { %v571_v27 = vpop.eup %570  ;;  %387 = vst.msk [vmem:[%s876_s3 + $0x8] sm:$0xff] %vm84_vm1, %v378_v25  ;;  %v360_v28 = vmul.f32 1.442695, %v346_v22  ;;  %v319_v30 = vadd.f32 %v318_v47, %v209_v24  ;;  %v473_v31 = vadd.f32 %v472_v26, %v471_v23 }
 0x116   :  { %v411_v32 = vadd.f32 -1.0, %v571_v27 }
 0x117   :  { %576 = vpow2.f32 %v360_v28  ;;  %v347_v33 = vmin.f32 %v319_v30, 0.0  ;;  %v474_v34 = vpop.f32.mrb[16].mxu0  ;;  %v214_v35 = vadd.f32 %v473_v31, %v826_v29  ;;  %vm338_vm8 = vcmp.gt.f32.partialorder %v319_v30, 0.0 }
 0x118   :  { %v379_v36 = vsel %vm334_vm4, %v299_v54, %v411_v32  ;;  %v475_v37 = vpop.f32.mrb[17].mxu0 }
 0x119   :  { %v573_v38 = vpop.eup %572  ;;  %388 = vst.msk [vmem:[%s876_s3 + $0x10] sm:$0xff] %vm84_vm1, %v379_v36  ;;  %v362_v39 = vmul.f32 1.442695, %v347_v33  ;;  %v324_v40 = vadd.f32 %v323_v56, %v214_v35  ;;  %v476_v41 = vadd.f32 %v475_v37, %v474_v34 }
 0x11a   :  { %v412_v42 = vadd.f32 -1.0, %v573_v38 }
 0x11b   :  { %578 = vpow2.f32 %v362_v39  ;;  %v348_v43 = vmin.f32 %v324_v40, 0.0  ;;  %v219_v44 = vadd.f32 %v476_v41, %v826_v29  ;;  %vm339_vm9 = vcmp.gt.f32.partialorder %v324_v40, 0.0 }
 0x11c   :  { %v380_v45 = vsel %vm335_vm5, %v304_v63, %v412_v42 }
 0x11d   :  { %v575_v46 = vpop.eup %574  ;;  %389 = vst.msk [vmem:[%s876_s3 + $0x18] sm:$0xff] %vm84_vm1, %v380_v45  ;;  %v364_v47 = vmul.f32 1.442695, %v348_v43  ;;  %v329_v48 = vadd.f32 %v328_v1, %v219_v44 }
 0x11e   :  { %v413_v49 = vadd.f32 -1.0, %v575_v46 }
 0x11f   :  { %580 = vpow2.f32 %v364_v47  ;;  %v349_v50 = vmin.f32 %v329_v48, 0.0  ;;  %vm340_vm10 = vcmp.gt.f32.partialorder %v329_v48, 0.0 }
 0x120   :  { %v381_v51 = vsel %vm336_vm6, %v309_v10, %v413_v49 }
 0x121   :  { %v577_v52 = vpop.eup %576  ;;  %390 = vst.msk [vmem:[%s876_s3 + $0x20] sm:$0xff] %vm84_vm1, %v381_v51  ;;  %v366_v29 = vmul.f32 1.442695, %v349_v50 }
 0x122   :  { %v414_v53 = vadd.f32 -1.0, %v577_v52 }
 0x123   :  { %582 = vpow2.f32 %v366_v29 }
 0x124   :  { %v382_v54 = vsel %vm337_vm7, %v314_v19, %v414_v53 }
 0x125   :  { %v579_v55 = vpop.eup %578  ;;  %391 = vst.msk [vmem:[%s876_s3 + $0x28] sm:$0xff] %vm84_vm1, %v382_v54 }
 0x126   :  { %v415_v56 = vadd.f32 -1.0, %v579_v55 }
 0x128   :  { %v383_v57 = vsel %vm338_vm8, %v319_v30, %v415_v56 }
 0x129   :  { %v581_v58 = vpop.eup %580  ;;  %392 = vst.msk [vmem:[%s876_s3 + $0x30] sm:$0xff] %vm84_vm1, %v383_v57 }
 0x12a   :  { %v416_v59 = vadd.f32 -1.0, %v581_v58 }
 0x12c   :  { %v384_v60 = vsel %vm339_vm9, %v324_v40, %v416_v59 }
 0x12d   :  { %v583_v61 = vpop.eup %582  ;;  %393 = vst.msk [vmem:[%s876_s3 + $0x38] sm:$0xff] %vm84_vm1, %v384_v60 }
 0x12e   :  { %v417_v62 = vadd.f32 -1.0, %v583_v61 }
 0x130   :  { %v385_v63 = vsel %vm340_vm10, %v329_v48, %v417_v62 }
 0x131   :  { %394 = vst.msk [vmem:[%s876_s3 + $0x40] sm:$0xff] %vm84_vm1, %v385_v63 }

// kernel: icm_forward.8
= control target key start
LH: loop header
LB: loop body
LE: loop exit
PB: predicated region body
PF: predicated region fallthrough
CT: control target
= control target key end

     0   :  { %v381_v3 = vmov 0.0|0.0   ;;  %vm382_vm0 = vmmov 0   ;;  %v383_v4 = vmov 0.0   ;;  %vm66_vm1 = vcmask 261120   ;;  %s562_s1 = inlined_call_operand.vmem [shape: f32[288,32], index: 1, kind: input, shape index: {}]   ;;  %s563_s0 = inlined_call_operand.vmem [shape: f32[18,288], index: 0, kind: input, shape index: {}]   ;;  %s564_s2 = inlined_call_operand.vmem [shape: f32[1,32], index: 2, kind: input, shape index: {}]   ;;  %s565_s3 = inlined_call_operand.vmem [shape: f32[18,32], index: 3, kind: output, shape index: {}]  }
   0x1   :  { %v39_v0 = vld [vmem:[%s562_s1 + $0x80] sm:$0xff]  ;;  %v40_v1 = vld [vmem:[%s562_s1 + $0x88] sm:$0xff]  ;;  %366 = vmatprep.subr.bf16.mxu1 %v381_v3  ;;  %325 = vmatprep.mubr.msk.f32.mxu1 %vm382_vm0, %v383_v4  ;;  %v41_v7 = vld [vmem:[%s562_s1 + $0x90] sm:$0xff]  ;;  %vm256_vm4 = vcmask 254976  }
   0x2   :  { %v23_v2 = vld [vmem:[%s562_s1] sm:$0xff]  ;;  %v334_v5 = vpack.c.bf16 %v40_v1, %v39_v0  ;;  %v24_v6 = vld [vmem:[%s562_s1 + $0x8] sm:$0xff]  ;;  %v42_v8 = vld [vmem:[%s562_s1 + $0x98] sm:$0xff] }
   0x3   :  { %v336_v9 = vpack.c.bf16 %v24_v6, %v23_v2  ;;  %v338_v10 = vpack.c.bf16 %v42_v8, %v41_v7  ;;  %v25_v11 = vld [vmem:[%s562_s1 + $0x10] sm:$0xff]  ;;  %v26_v12 = vld [vmem:[%s562_s1 + $0x18] sm:$0xff]  ;;  %v43_v13 = vld [vmem:[%s562_s1 + $0xa0] sm:$0xff] }
   0x4   :  { %335 = vmatprep.subr.bf16.mxu0 %v334_v5  ;;  %v44_v14 = vld [vmem:[%s562_s1 + $0xa8] sm:$0xff]  ;;  %v340_v15 = vpack.c.bf16 %v26_v12, %v25_v11  ;;  %v27_v17 = vld [vmem:[%s562_s1 + $0x20] sm:$0xff]  ;;  %v45_v19 = vld [vmem:[%s562_s1 + $0xb0] sm:$0xff] }
   0x5   :  { %337 = vmatpush3.bf16.msra.mxu0 %v336_v9  ;;  %v342_v16 = vpack.c.bf16 %v44_v14, %v43_v13  ;;  %v28_v18 = vld [vmem:[%s562_s1 + $0x28] sm:$0xff]  ;;  %v46_v20 = vld [vmem:[%s562_s1 + $0xb8] sm:$0xff]  ;;  %v29_v23 = vld [vmem:[%s562_s1 + $0x30] sm:$0xff] }
   0x6   :  { %339 = vmatprep.subr.bf16.mxu0 %v338_v10  ;;  %v344_v21 = vpack.c.bf16 %v28_v18, %v27_v17  ;;  %v346_v22 = vpack.c.bf16 %v46_v20, %v45_v19  ;;  %v30_v24 = vld [vmem:[%s562_s1 + $0x38] sm:$0xff]  ;;  %v47_v25 = vld [vmem:[%s562_s1 + $0xc0] sm:$0xff]  ;;  %v48_v26 = vld [vmem:[%s562_s1 + $0xc8] sm:$0xff] }
   0x7   :  { %v55_v27 = vld [vmem:[%s562_s1 + $0x100] sm:$0xff]  ;;  %v56_v28 = vld [vmem:[%s562_s1 + $0x108] sm:$0xff]  ;;  %v348_v30 = vpack.c.bf16 %v30_v24, %v29_v23  ;;  %v57_v32 = vld [vmem:[%s562_s1 + $0x110] sm:$0xff]  ;;  %v350_v34 = vpack.c.bf16 %v48_v26, %v47_v25 }
   0x8   :  { %v15_v29 = vld [vmem:[%s563_s0 + $0x8] sm:$0xff]  ;;  %v367_v31 = vpack.c.bf16 %v56_v28, %v55_v27  ;;  %v58_v33 = vld [vmem:[%s562_s1 + $0x118] sm:$0xff]  ;;  %v31_v35 = vld [vmem:[%s562_s1 + $0x40] sm:$0xff] }
   0x9   :  { %341 = vmatpush3.bf16.msra.mxu0 %v340_v15  ;;  %140 = vmatprep.mubr.f32.mxu0 %v15_v29  ;;  %v32_v36 = vld [vmem:[%s562_s1 + $0x48] sm:$0xff]  ;;  %v49_v37 = vld [vmem:[%s562_s1 + $0xd0] sm:$0xff]  ;;  %v50_v38 = vld [vmem:[%s562_s1 + $0xd8] sm:$0xff]  ;;  %v370_v39 = vpack.c.bf16 %v58_v33, %v57_v32 }
   0xa   :  { %343 = vmatprep.subr.bf16.mxu0 %v342_v16  ;;  %368 = vmatpush3.bf16.msra.mxu1 %v367_v31  ;;  %v352_v40 = vpack.c.bf16 %v32_v36, %v31_v35  ;;  %v354_v41 = vpack.c.bf16 %v50_v38, %v49_v37  ;;  %v33_v42 = vld [vmem:[%s562_s1 + $0x50] sm:$0xff]  ;;  %v34_v43 = vld [vmem:[%s562_s1 + $0x58] sm:$0xff]  ;;  %v51_v44 = vld [vmem:[%s562_s1 + $0xe0] sm:$0xff] }
   0xb   :  { %369 = vmatprep.subr.bf16.mxu1 %v381_v3  ;;  %v52_v45 = vld [vmem:[%s562_s1 + $0xe8] sm:$0xff]  ;;  %v16_v46 = vld [vmem:[%s563_s0 + $0x10] sm:$0xff]  ;;  %v356_v47 = vpack.c.bf16 %v34_v43, %v33_v42  ;;  %v35_v49 = vld [vmem:[%s562_s1 + $0x60] sm:$0xff] }
   0xc   :  { %v358_v48 = vpack.c.bf16 %v52_v45, %v51_v44  ;;  %v36_v50 = vld [vmem:[%s562_s1 + $0x68] sm:$0xff]  ;;  %v53_v51 = vld [vmem:[%s562_s1 + $0xf0] sm:$0xff]  ;;  %v54_v52 = vld [vmem:[%s562_s1 + $0xf8] sm:$0xff] }
   0xd   :  { %345 = vmatpush3.bf16.msra.mxu0 %v344_v21  ;;  %v19_v53 = vld [vmem:[%s563_s0 + $0x28] sm:$0xff]  ;;  %v360_v54 = vpack.c.bf16 %v36_v50, %v35_v49  ;;  %v362_v55 = vpack.c.bf16 %v54_v52, %v53_v51  ;;  %v37_v56 = vld [vmem:[%s562_s1 + $0x70] sm:$0xff]  ;;  %v38_v57 = vld [vmem:[%s562_s1 + $0x78] sm:$0xff] }
   0xe   :  { %347 = vmatprep.subr.bf16.mxu0 %v346_v22  ;;  %371 = vmatpush3.bf16.msra.mxu1 %v370_v39  ;;  %v22_v58 = vld [vmem:[%s563_s0 + $0x40] sm:$0x3]  ;;  %v364_v59 = vpack.c.bf16 %v38_v57, %v37_v56  ;;  %v17_v62 = vld [vmem:[%s563_s0 + $0x18] sm:$0xff]  ;;  %v20_v0 = vld [vmem:[%s563_s0 + $0x30] sm:$0x3] }
   0xf   :  { %v14_v60 = vld [vmem:[%s563_s0] sm:$0xff]  ;;  %v21_v63 = vld [vmem:[%s563_s0 + $0x38] sm:$0x3] }
  0x10   :  { %v18_v61 = vld [vmem:[%s563_s0 + $0x20] sm:$0xff] }
  0x11   :  { %349 = vmatpush3.bf16.msra.mxu0 %v348_v30  ;;  %326 = vmatmul.mubr.msk.f32.vlgmr.msra.gmra.mrb[0].mxu1 %vm66_vm1, %v16_v46  ;;  %v262_v9 = vld [vmem:[%s564_s2] ss:$0 sm:$0xff] }
  0x12   :  { %351 = vmatprep.subr.bf16.mxu0 %v350_v34  ;;  %328 = vmatprep.mubr.msk.f32.mxu1 %vm382_vm0, %v383_v4 }
  0x15   :  { %353 = vmatpush3.bf16.msra.mxu0 %v352_v40  ;;  %329 = vmatmul.mubr.msk.f32.gmra.mrb[2].mxu1 %vm66_vm1, %v19_v53 }
  0x16   :  { %355 = vmatprep.subr.bf16.mxu0 %v354_v41  ;;  %331 = vmatprep.mubr.msk.f32.mxu1 %vm382_vm0, %v383_v4 }
  0x19   :  { %357 = vmatpush3.bf16.msra.mxu0 %v356_v47  ;;  %332 = vmatmul.mubr.msk.f32.gmra.mrb[4].mxu1 %vm66_vm1, %v22_v58 }
  0x1a   :  { %359 = vmatprep.subr.bf16.mxu0 %v358_v48 }
  0x1d   :  { %361 = vmatpush3.bf16.msra.mxu0 %v360_v54 }
  0x1e   :  { %363 = vmatprep.subr.bf16.mxu0 %v362_v55 }
  0x21   :  { %365 = vmatpush3.bf16.msra.mxu0 %v364_v59 }
  0x24   :  { %141 = vmatmul.mubr.f32.vlgmr.msra.gmra.mrb[0].mxu0 %v14_v60 }
  0x25   :  { %145 = vmatprep.mubr.f32.mxu0 %v18_v61 }
  0x28   :  { %146 = vmatmul.mubr.f32.gmra.mrb[2].mxu0 %v17_v62 }
  0x29   :  { %150 = vmatprep.mubr.f32.mxu0 %v21_v63 }
  0x2c   :  { %151 = vmatmul.mubr.f32.gmra.mrb[4].mxu0 %v20_v0 }
  0xe4   :  { %v222_v1 = vpop.f32.mrb[0].mxu1 }
  0xe5   :  { %v327_v2 = vpop.f32.mrb[1].mxu1 }
  0xe8   :  { %v227_v3 = vpop.f32.mrb[2].mxu1 }
  0xe9   :  { %v330_v4 = vpop.f32.mrb[3].mxu1 }
  0xec   :  { %v232_v5 = vpop.f32.mrb[4].mxu1 }
  0xed   :  { %v333_v6 = vpop.f32.mrb[5].mxu1 }
  0xf7   :  { %v301_v7 = vpop.f32.mrb[0].mxu0 }
  0xf8   :  { %v302_v8 = vpop.f32.mrb[1].mxu0 }
  0xf9   :  { %v303_v10 = vadd.f32 %v302_v8, %v301_v7 }
  0xfb   :  { %v304_v11 = vpop.f32.mrb[2].mxu0  ;;  %v143_v12 = vadd.f32 %v303_v10, %v262_v9 }
  0xfc   :  { %v305_v13 = vpop.f32.mrb[3].mxu0 }
  0xfd   :  { %v223_v14 = vadd.f32 %v222_v1, %v143_v12  ;;  %v306_v15 = vadd.f32 %v305_v13, %v304_v11 }
  0xff   :  { %v239_v16 = vmin.f32 %v223_v14, 0.0  ;;  %v307_v17 = vpop.f32.mrb[4].mxu0  ;;  %v148_v18 = vadd.f32 %v306_v15, %v262_v9  ;;  %vm236_vm2 = vcmp.gt.f32.partialorder %v223_v14, 0.0 }
 0x100   :  { %v308_v19 = vpop.f32.mrb[5].mxu0 }
 0x101   :  { %v242_v20 = vmul.f32 1.442695, %v239_v16  ;;  %v228_v21 = vadd.f32 %v227_v3, %v148_v18  ;;  %v309_v22 = vadd.f32 %v308_v19, %v307_v17 }
 0x103   :  { %375 = vpow2.f32 %v242_v20  ;;  %v240_v23 = vmin.f32 %v228_v21, 0.0  ;;  %v153_v24 = vadd.f32 %v309_v22, %v262_v9  ;;  %vm237_vm3 = vcmp.gt.f32.partialorder %v228_v21, 0.0 }
 0x105   :  { %v244_v25 = vmul.f32 1.442695, %v240_v23  ;;  %v233_v26 = vadd.f32 %v232_v5, %v153_v24 }
 0x107   :  { %377 = vpow2.f32 %v244_v25  ;;  %v241_v27 = vmin.f32 %v233_v26, 0.0  ;;  %vm238_vm5 = vcmp.gt.f32.partialorder %v233_v26, 0.0 }
 0x109   :  { %v246_v28 = vmul.f32 1.442695, %v241_v27 }
 0x10b   :  { %379 = vpow2.f32 %v246_v28 }
 0x10d   :  { %v376_v29 = vpop.eup %375 }
 0x10e   :  { %v266_v30 = vadd.f32 -1.0, %v376_v29 }
 0x110   :  { %v251_v31 = vsel %vm236_vm2, %v223_v14, %v266_v30 }
 0x111   :  { %v378_v32 = vpop.eup %377  ;;  %254 = vst.msk [vmem:[%s565_s3] sm:$0xff] %vm66_vm1, %v251_v31 }
 0x112   :  { %v267_v33 = vadd.f32 -1.0, %v378_v32 }
 0x114   :  { %v252_v34 = vsel %vm237_vm3, %v228_v21, %v267_v33 }
 0x115   :  { %v380_v35 = vpop.eup %379  ;;  %255 = vst.msk [vmem:[%s565_s3 + $0x8] sm:$0xff] %vm66_vm1, %v252_v34 }
 0x116   :  { %v268_v36 = vadd.f32 -1.0, %v380_v35 }
 0x118   :  { %v253_v37 = vsel %vm238_vm5, %v233_v26, %v268_v36 }
 0x119   :  { %257 = vst.msk [vmem:[%s565_s3 + $0x10] sm:$0x3] %vm256_vm4, %v253_v37 }

// kernel: icm_forward.9
= control target key start
LH: loop header
LB: loop body
LE: loop exit
PB: predicated region body
PF: predicated region fallthrough
CT: control target
= control target key end

     0   :  { %v188_v25 = vlaneseq  ;;  %vm223_vm0 = vcmask 523264   ;;  %vm659_vm3 = vcmask 1045504   ;;  %vm656_vm4 = vcmask 310272   ;;  %s2799_s4 = inlined_call_operand.vmem [shape: f32[576,256], index: 4, kind: input, shape index: {}]   ;;  %s2800_s0 = inlined_call_operand.vmem [shape: f32[1,576], index: 0, kind: input, shape index: {}]   ;;  %s2801_s6 = inlined_call_operand.vmem [shape: f32[256,6], index: 6, kind: input, shape index: {}]   ;;  %s2802_s8 = inlined_call_operand.vmem [shape: f32[294,256], index: 8, kind: input, shape index: {}]   ;;  %s2803_s5 = inlined_call_operand.vmem [shape: f32[1,256], index: 5, kind: input, shape index: {}]   ;;  %s2804_s1 = inlined_call_operand.vmem [shape: f32[1,294], index: 1, kind: input, shape index: {}]   ;;  %s2805_s10 = inlined_call_operand.vmem [shape: f32[256,288], index: 10, kind: input, shape index: {}]   ;;  %s2806_s7 = inlined_call_operand.vmem [shape: f32[1,6], index: 7, kind: input, shape index: {}]   ;;  %s2807_s9 = inlined_call_operand.vmem [shape: f32[1,256], index: 9, kind: input, shape index: {}]   ;;  %s2808_s11 = inlined_call_operand.vmem [shape: f32[1,288], index: 11, kind: input, shape index: {}]   ;;  %s2809_s2 = inlined_call_operand.vmem [shape: f32[1,288], index: 2, kind: input, shape index: {}]   ;;  %s2810_s3 = inlined_call_operand.vmem [shape: f32[1,6], index: 3, kind: input, shape index: {}]   ;;  %s2811_s12 = inlined_call_operand.vmem [shape: f32[1,128], index: 12, kind: output, shape index: {}]  }
   0x1   :  { %v43_v0 = vld [vmem:[%s2799_s4 + $0x8] sm:$0xff]  ;;  %v45_v1 = vld [vmem:[%s2799_s4 + $0x18] sm:$0xff]  ;;  %v42_v2 = vld [vmem:[%s2799_s4] sm:$0xff]  ;;  %vm1130_vm5 = vcmask 40960   ;;  %vm1120_vm8 = vcmask 1040384   ;;  %vm1124_vm9 = vcmask 253952  }
   0x2   :  { %v1245_v3 = vpack.c.bf16 %v45_v1, %v43_v0  ;;  %v44_v4 = vld [vmem:[%s2799_s4 + $0x10] sm:$0xff]  ;;  %v47_v5 = vld [vmem:[%s2799_s4 + $0x28] sm:$0xff]  ;;  %v49_v6 = vld [vmem:[%s2799_s4 + $0x38] sm:$0xff]  ;;  %v1747_v32 = vshrl.u32 %v188_v25, 7 }
   0x3   :  { %v1247_v7 = vpack.c.bf16 %v44_v4, %v42_v2  ;;  %v1249_v8 = vpack.c.bf16 %v49_v6, %v47_v5  ;;  %v46_v9 = vld [vmem:[%s2799_s4 + $0x20] sm:$0xff]  ;;  %v48_v10 = vld [vmem:[%s2799_s4 + $0x30] sm:$0xff]  ;;  %v51_v11 = vld [vmem:[%s2799_s4 + $0x48] sm:$0xff] }
   0x4   :  { %1246 = vmatprep.subr.bf16.mxu0 %v1245_v3  ;;  %v53_v12 = vld [vmem:[%s2799_s4 + $0x58] sm:$0xff]  ;;  %v1251_v13 = vpack.c.bf16 %v48_v10, %v46_v9  ;;  %v50_v15 = vld [vmem:[%s2799_s4 + $0x40] sm:$0xff]  ;;  %v52_v16 = vld [vmem:[%s2799_s4 + $0x50] sm:$0xff]  ;;  %v1762_v39 = vsub.s32 1, %v1747_v32 }
   0x5   :  { %1248 = vmatpush1.bf16.msra.mxu0 %v1247_v7  ;;  %v1253_v14 = vpack.c.bf16 %v53_v12, %v51_v11  ;;  %v55_v17 = vld [vmem:[%s2799_s4 + $0x68] sm:$0xff]  ;;  %v57_v18 = vld [vmem:[%s2799_s4 + $0x78] sm:$0xff]  ;;  %v1255_v19 = vpack.c.bf16 %v52_v16, %v50_v15  ;;  %v54_v21 = vld [vmem:[%s2799_s4 + $0x60] sm:$0xff] }
   0x6   :  { %1250 = vmatprep.subr.bf16.mxu0 %v1249_v8  ;;  %v1257_v20 = vpack.c.bf16 %v57_v18, %v55_v17  ;;  %v56_v22 = vld [vmem:[%s2799_s4 + $0x70] sm:$0xff]  ;;  %v59_v23 = vld [vmem:[%s2799_s4 + $0x88] sm:$0xff]  ;;  %v61_v24 = vld [vmem:[%s2799_s4 + $0x98] sm:$0xff] }
   0x7   :  { %v1259_v26 = vpack.c.bf16 %v56_v22, %v54_v21  ;;  %v1261_v27 = vpack.c.bf16 %v61_v24, %v59_v23  ;;  %v58_v28 = vld [vmem:[%s2799_s4 + $0x80] sm:$0xff]  ;;  %v60_v29 = vld [vmem:[%s2799_s4 + $0x90] sm:$0xff]  ;;  %v63_v30 = vld [vmem:[%s2799_s4 + $0xa8] sm:$0xff] }
   0x8   :  { %v65_v31 = vld [vmem:[%s2799_s4 + $0xb8] sm:$0xff]  ;;  %v1263_v33 = vpack.c.bf16 %v60_v29, %v58_v28  ;;  %v62_v35 = vld [vmem:[%s2799_s4 + $0xa0] sm:$0xff]  ;;  %v64_v36 = vld [vmem:[%s2799_s4 + $0xb0] sm:$0xff] }
   0x9   :  { %1252 = vmatpush1.bf16.msra.mxu0 %v1251_v13  ;;  %v1265_v34 = vpack.c.bf16 %v65_v31, %v63_v30  ;;  %v67_v37 = vld [vmem:[%s2799_s4 + $0xc8] sm:$0xff]  ;;  %v69_v38 = vld [vmem:[%s2799_s4 + $0xd8] sm:$0xff]  ;;  %v1267_v40 = vpack.c.bf16 %v64_v36, %v62_v35  ;;  %v66_v42 = vld [vmem:[%s2799_s4 + $0xc0] sm:$0xff] }
   0xa   :  { %1254 = vmatprep.subr.bf16.mxu0 %v1253_v14  ;;  %v1269_v41 = vpack.c.bf16 %v69_v38, %v67_v37  ;;  %v68_v43 = vld [vmem:[%s2799_s4 + $0xd0] sm:$0xff]  ;;  %v1773_v44 = vld [vmem:[%s2800_s0] sm:$0x1f]  ;;  %v71_v45 = vld [vmem:[%s2799_s4 + $0xe8] sm:$0xff] }
   0xb   :  { %v73_v46 = vld [vmem:[%s2799_s4 + $0xf8] sm:$0xff]  ;;  %v195_v47 = vrot.slane %v1773_v44, %v1762_v39  ;;  %v1271_v48 = vpack.c.bf16 %v68_v43, %v66_v42  ;;  %v70_v50 = vld [vmem:[%s2799_s4 + $0xe0] sm:$0xff]  ;;  %v72_v51 = vld [vmem:[%s2799_s4 + $0xf0] sm:$0xff] }
   0xc   :  { %v1273_v49 = vpack.c.bf16 %v73_v46, %v71_v45  ;;  %v75_v52 = vld [vmem:[%s2799_s4 + $0x108] sm:$0xff]  ;;  %v77_v53 = vld [vmem:[%s2799_s4 + $0x118] sm:$0xff]  ;;  %v1275_v54 = vpack.c.bf16 %v72_v51, %v70_v50  ;;  %v74_v56 = vld [vmem:[%s2799_s4 + $0x100] sm:$0xff] }
   0xd   :  { %1256 = vmatpush1.bf16.msra.mxu0 %v1255_v19  ;;  %290 = vmatprep.mubr.f32.mxu0 %v195_v47  ;;  %v1277_v55 = vpack.c.bf16 %v77_v53, %v75_v52  ;;  %v76_v57 = vld [vmem:[%s2799_s4 + $0x110] sm:$0xff]  ;;  %v79_v58 = vld [vmem:[%s2799_s4 + $0x128] sm:$0xff]  ;;  %v81_v59 = vld [vmem:[%s2799_s4 + $0x138] sm:$0xff] }
   0xe   :  { %1258 = vmatprep.subr.bf16.mxu0 %v1257_v20  ;;  %v1279_v60 = vpack.c.bf16 %v76_v57, %v74_v56  ;;  %v1281_v61 = vpack.c.bf16 %v81_v59, %v79_v58  ;;  %v78_v62 = vld [vmem:[%s2799_s4 + $0x120] sm:$0xff]  ;;  %v80_v63 = vld [vmem:[%s2799_s4 + $0x130] sm:$0xff]  ;;  %v83_v0 = vld [vmem:[%s2799_s4 + $0x148] sm:$0xff] }
   0xf   :  { %v85_v1 = vld [vmem:[%s2799_s4 + $0x158] sm:$0xff]  ;;  %v1283_v2 = vpack.c.bf16 %v80_v63, %v78_v62  ;;  %v82_v4 = vld [vmem:[%s2799_s4 + $0x140] sm:$0xff]  ;;  %v84_v5 = vld [vmem:[%s2799_s4 + $0x150] sm:$0xff]  ;;  %v202_v62 = vsub.s32 3, %v1747_v32 }
  0x10   :  { %v1285_v3 = vpack.c.bf16 %v85_v1, %v83_v0  ;;  %v87_v6 = vld [vmem:[%s2799_s4 + $0x168] sm:$0xff]  ;;  %v89_v7 = vld [vmem:[%s2799_s4 + $0x178] sm:$0xff]  ;;  %v1287_v8 = vpack.c.bf16 %v84_v5, %v82_v4  ;;  %v86_v10 = vld [vmem:[%s2799_s4 + $0x160] sm:$0xff] }
  0x11   :  { %1260 = vmatpush1.bf16.msra.mxu0 %v1259_v26  ;;  %v1289_v9 = vpack.c.bf16 %v89_v7, %v87_v6  ;;  %v88_v11 = vld [vmem:[%s2799_s4 + $0x170] sm:$0xff]  ;;  %v91_v12 = vld [vmem:[%s2799_s4 + $0x188] sm:$0xff]  ;;  %v93_v13 = vld [vmem:[%s2799_s4 + $0x198] sm:$0xff]  ;;  %v203_v6 = vrot.slane %v1773_v44, %v202_v62 }
  0x12   :  { %1262 = vmatprep.subr.bf16.mxu0 %v1261_v27  ;;  %v1291_v14 = vpack.c.bf16 %v88_v11, %v86_v10  ;;  %v1293_v15 = vpack.c.bf16 %v93_v13, %v91_v12  ;;  %v90_v16 = vld [vmem:[%s2799_s4 + $0x180] sm:$0xff]  ;;  %v92_v17 = vld [vmem:[%s2799_s4 + $0x190] sm:$0xff]  ;;  %v95_v18 = vld [vmem:[%s2799_s4 + $0x1a8] sm:$0xff] }
  0x13   :  { %v97_v19 = vld [vmem:[%s2799_s4 + $0x1b8] sm:$0xff]  ;;  %v94_v20 = vld [vmem:[%s2799_s4 + $0x1a0] sm:$0xff]  ;;  %v96_v21 = vld [vmem:[%s2799_s4 + $0x1b0] sm:$0xff]  ;;  %v1295_v22 = vpack.c.bf16 %v92_v17, %v90_v16 }
  0x14   :  { %v99_v23 = vld [vmem:[%s2799_s4 + $0x1c8] sm:$0xff]  ;;  %v101_v24 = vld [vmem:[%s2799_s4 + $0x1d8] sm:$0xff]  ;;  %v467_v26 = vld [vmem:[%s2801_s6 + $0x80] sm:$0xff]  ;;  %v1297_v28 = vpack.c.bf16 %v97_v19, %v95_v18  ;;  %v1299_v42 = vpack.c.bf16 %v96_v21, %v94_v20 }
  0x15   :  { %1264 = vmatpush1.bf16.msra.mxu0 %v1263_v33  ;;  %v468_v27 = vld [vmem:[%s2801_s6 + $0x88] sm:$0xff]  ;;  %v451_v30 = vld [vmem:[%s2801_s6] sm:$0xff]  ;;  %v469_v33 = vld [vmem:[%s2801_s6 + $0x90] sm:$0xff]  ;;  %v1301_v46 = vpack.c.bf16 %v101_v24, %v99_v23 }
  0x16   :  { %1266 = vmatprep.subr.bf16.mxu0 %v1265_v34  ;;  %v1389_v29 = vpack.c.bf16 %v468_v27, %v467_v26  ;;  %v452_v31 = vld [vmem:[%s2801_s6 + $0x8] sm:$0xff]  ;;  %v470_v35 = vld [vmem:[%s2801_s6 + $0x98] sm:$0xff]  ;;  %v453_v36 = vld [vmem:[%s2801_s6 + $0x10] sm:$0xff] }
  0x17   :  { %v1391_v34 = vpack.c.bf16 %v452_v31, %v451_v30  ;;  %v454_v37 = vld [vmem:[%s2801_s6 + $0x18] sm:$0xff]  ;;  %v1393_v38 = vpack.c.bf16 %v470_v35, %v469_v33  ;;  %v98_v43 = vld [vmem:[%s2799_s4 + $0x1c0] sm:$0xff]  ;;  %v100_v47 = vld [vmem:[%s2799_s4 + $0x1d0] sm:$0xff] }
  0x18   :  { %1390 = vmatprep.subr.bf16.mxu1 %v1389_v29  ;;  %v1395_v45 = vpack.c.bf16 %v454_v37, %v453_v36  ;;  %v456_v50 = vld [vmem:[%s2801_s6 + $0x28] sm:$0xff]  ;;  %v105_v52 = vld [vmem:[%s2799_s4 + $0x1f8] sm:$0xff]  ;;  %v1303_v53 = vpack.c.bf16 %v100_v47, %v98_v43  ;;  %v102_v56 = vld [vmem:[%s2799_s4 + $0x1e0] sm:$0xff] }
  0x19   :  { %1268 = vmatpush1.bf16.msra.mxu0 %v1267_v40  ;;  %v471_v40 = vld [vmem:[%s2801_s6 + $0xa0] sm:$0xff]  ;;  %1392 = vmatpush3.bf16.msra.mxu1 %v1391_v34  ;;  %v103_v51 = vld [vmem:[%s2799_s4 + $0x1e8] sm:$0xff]  ;;  %v104_v57 = vld [vmem:[%s2799_s4 + $0x1f0] sm:$0xff] }
  0x1a   :  { %1270 = vmatprep.subr.bf16.mxu0 %v1269_v41  ;;  %v472_v41 = vld [vmem:[%s2801_s6 + $0xa8] sm:$0xff]  ;;  %1394 = vmatprep.subr.bf16.mxu1 %v1393_v38  ;;  %v109_v59 = vld [vmem:[%s2799_s4 + $0x218] sm:$0xff]  ;;  %v106_v0 = vld [vmem:[%s2799_s4 + $0x200] sm:$0xff] }
  0x1b   :  { %v107_v58 = vld [vmem:[%s2799_s4 + $0x208] sm:$0xff]  ;;  %v108_v1 = vld [vmem:[%s2799_s4 + $0x210] sm:$0xff]  ;;  %v117_v11 = vld [vmem:[%s2799_s4 + $0x258] sm:$0xff] }
  0x1c   :  { %v1309_v63 = vpack.c.bf16 %v109_v59, %v107_v58  ;;  %v1311_v5 = vpack.c.bf16 %v108_v1, %v106_v0  ;;  %v115_v10 = vld [vmem:[%s2799_s4 + $0x248] sm:$0xff]  ;;  %v121_v17 = vld [vmem:[%s2799_s4 + $0x278] sm:$0xff]  ;;  %v118_v20 = vld [vmem:[%s2799_s4 + $0x260] sm:$0xff] }
  0x1d   :  { %1272 = vmatpush1.bf16.msra.mxu0 %v1271_v48  ;;  %v1397_v48 = vpack.c.bf16 %v472_v41, %v471_v40  ;;  %1396 = vmatpush3.bf16.msra.mxu1 %v1395_v45  ;;  %v1317_v13 = vpack.c.bf16 %v117_v11, %v115_v10  ;;  %v119_v16 = vld [vmem:[%s2799_s4 + $0x268] sm:$0xff]  ;;  %v120_v21 = vld [vmem:[%s2799_s4 + $0x270] sm:$0xff]  ;;  %v125_v23 = vld [vmem:[%s2799_s4 + $0x298] sm:$0xff] }
  0x1e   :  { %1274 = vmatprep.subr.bf16.mxu0 %v1273_v49  ;;  %v455_v49 = vld [vmem:[%s2801_s6 + $0x20] sm:$0xff]  ;;  %v1321_v19 = vpack.c.bf16 %v121_v17, %v119_v16  ;;  %v1323_v24 = vpack.c.bf16 %v120_v21, %v118_v20  ;;  %v127_v29 = vld [vmem:[%s2799_s4 + $0x2a8] sm:$0xff]  ;;  %v129_v30 = vld [vmem:[%s2799_s4 + $0x2b8] sm:$0xff] }
  0x1f   :  { %1398 = vmatprep.subr.bf16.mxu1 %v1397_v48  ;;  %v122_v27 = vld [vmem:[%s2799_s4 + $0x280] sm:$0xff]  ;;  %v1329_v33 = vpack.c.bf16 %v129_v30, %v127_v29  ;;  %v128_v35 = vld [vmem:[%s2799_s4 + $0x2b0] sm:$0xff]  ;;  %v131_v36 = vld [vmem:[%s2799_s4 + $0x2c8] sm:$0xff] }
  0x20   :  { %v126_v34 = vld [vmem:[%s2799_s4 + $0x2a0] sm:$0xff]  ;;  %v133_v37 = vld [vmem:[%s2799_s4 + $0x2d8] sm:$0xff]  ;;  %v135_v43 = vld [vmem:[%s2799_s4 + $0x2e8] sm:$0xff] }
  0x21   :  { %1276 = vmatpush1.bf16.msra.mxu0 %v1275_v54  ;;  %v1399_v54 = vpack.c.bf16 %v456_v50, %v455_v49  ;;  %v1331_v38 = vpack.c.bf16 %v128_v35, %v126_v34  ;;  %v1333_v40 = vpack.c.bf16 %v133_v37, %v131_v36  ;;  %v130_v41 = vld [vmem:[%s2799_s4 + $0x2c0] sm:$0xff]  ;;  %v137_v45 = vld [vmem:[%s2799_s4 + $0x2f8] sm:$0xff]  ;;  %v136_v49 = vld [vmem:[%s2799_s4 + $0x2f0] sm:$0xff] }
  0x22   :  { %1278 = vmatprep.subr.bf16.mxu0 %v1277_v55  ;;  %v1305_v55 = vpack.c.bf16 %v105_v52, %v103_v51  ;;  %v1337_v47 = vpack.c.bf16 %v137_v45, %v135_v43  ;;  %v134_v48 = vld [vmem:[%s2799_s4 + $0x2e0] sm:$0xff]  ;;  %v139_v50 = vld [vmem:[%s2799_s4 + $0x308] sm:$0xff]  ;;  %v141_v51 = vld [vmem:[%s2799_s4 + $0x318] sm:$0xff] }
  0x23   :  { %1400 = vmatpush3.bf16.msra.mxu1 %v1399_v54  ;;  %v1339_v52 = vpack.c.bf16 %v136_v49, %v134_v48  ;;  %v138_v54 = vld [vmem:[%s2799_s4 + $0x300] sm:$0xff]  ;;  %v144_v62 = vld [vmem:[%s2799_s4 + $0x330] sm:$0xff]  ;;  %v149_v0 = vld [vmem:[%s2799_s4 + $0x358] sm:$0xff] }
  0x24   :  { %v152_v10 = vld [vmem:[%s2799_s4 + $0x370] sm:$0xff]  ;;  %v155_v11 = vld [vmem:[%s2799_s4 + $0x388] sm:$0xff]  ;;  %v158_v21 = vld [vmem:[%s2799_s4 + $0x3a0] sm:$0xff] }
  0x25   :  { %1280 = vmatpush1.bf16.msra.mxu0 %v1279_v60  ;;  %v1928_v60 = vsub.s32 0, %v1747_v32  ;;  %v156_v16 = vld [vmem:[%s2799_s4 + $0x390] sm:$0xff]  ;;  %v159_v17 = vld [vmem:[%s2799_s4 + $0x3a8] sm:$0xff]  ;;  %v166_v35 = vld [vmem:[%s2799_s4 + $0x3e0] sm:$0xff] }
  0x26   :  { %1282 = vmatprep.subr.bf16.mxu0 %v1281_v61  ;;  %v1307_v61 = vpack.c.bf16 %v104_v57, %v102_v56  ;;  %v143_v56 = vld [vmem:[%s2799_s4 + $0x328] sm:$0xff]  ;;  %v145_v57 = vld [vmem:[%s2799_s4 + $0x338] sm:$0xff]  ;;  %v164_v29 = vld [vmem:[%s2799_s4 + $0x3d0] sm:$0xff] }
  0x27   :  { %v191_v4 = vrot.slane %v1773_v44, %v1928_v60  ;;  %v1345_v59 = vpack.c.bf16 %v145_v57, %v143_v56  ;;  %v167_v30 = vld [vmem:[%s2799_s4 + $0x3e8] sm:$0xff]  ;;  %v168_v36 = vld [vmem:[%s2799_s4 + $0x3f0] sm:$0xff]  ;;  %v170_v43 = vld [vmem:[%s2799_s4 + $0x400] sm:$0xff]  ;;  %v1613_v56 = vmov 0.0  }
  0x28   :  { %v171_v37 = vld [vmem:[%s2799_s4 + $0x408] sm:$0xff]  ;;  %v172_v45 = vld [vmem:[%s2799_s4 + $0x410] sm:$0xff] }
  0x29   :  { %1284 = vmatpush1.bf16.msra.mxu0 %v1283_v2  ;;  %v111_v2 = vld [vmem:[%s2799_s4 + $0x228] sm:$0xff]  ;;  %v1375_v49 = vpack.c.bf16 %v172_v45, %v170_v43 }
  0x2a   :  { %1286 = vmatprep.subr.bf16.mxu0 %v1285_v3  ;;  %v113_v3 = vld [vmem:[%s2799_s4 + $0x238] sm:$0xff] }
  0x2b   :  { %v1313_v7 = vpack.c.bf16 %v113_v3, %v111_v2  ;;  %v146_v3 = vld [vmem:[%s2799_s4 + $0x340] sm:$0xff] }
  0x2d   :  { %1288 = vmatpush1.bf16.msra.mxu0 %v1287_v8  ;;  %v110_v8 = vld [vmem:[%s2799_s4 + $0x220] sm:$0xff] }
  0x2e   :  { %1290 = vmatprep.subr.bf16.mxu0 %v1289_v9  ;;  %v112_v9 = vld [vmem:[%s2799_s4 + $0x230] sm:$0xff] }
  0x2f   :  { %v1315_v12 = vpack.c.bf16 %v112_v9, %v110_v8  ;;  %v150_v9 = vld [vmem:[%s2799_s4 + $0x360] sm:$0xff] }
  0x31   :  { %1292 = vmatpush1.bf16.msra.mxu0 %v1291_v14  ;;  %v114_v14 = vld [vmem:[%s2799_s4 + $0x240] sm:$0xff] }
  0x32   :  { %1294 = vmatprep.subr.bf16.mxu0 %v1293_v15  ;;  %v116_v15 = vld [vmem:[%s2799_s4 + $0x250] sm:$0xff] }
  0x33   :  { %v1319_v18 = vpack.c.bf16 %v116_v15, %v114_v14  ;;  %v154_v15 = vld [vmem:[%s2799_s4 + $0x380] sm:$0xff] }
  0x35   :  { %1296 = vmatpush1.bf16.msra.mxu0 %v1295_v22  ;;  %v123_v22 = vld [vmem:[%s2799_s4 + $0x288] sm:$0xff] }
  0x36   :  { %1298 = vmatprep.subr.bf16.mxu0 %v1297_v28  ;;  %v1325_v26 = vpack.c.bf16 %v125_v23, %v123_v22  ;;  %v124_v28 = vld [vmem:[%s2799_s4 + $0x290] sm:$0xff]  ;;  %v163_v23 = vld [vmem:[%s2799_s4 + $0x3c8] sm:$0xff] }
  0x37   :  { %v1327_v31 = vpack.c.bf16 %v124_v28, %v122_v27  ;;  %v160_v22 = vld [vmem:[%s2799_s4 + $0x3b0] sm:$0xff]  ;;  %v162_v28 = vld [vmem:[%s2799_s4 + $0x3c0] sm:$0xff] }
  0x39   :  { %1300 = vmatpush1.bf16.msra.mxu0 %v1299_v42  ;;  %v132_v42 = vld [vmem:[%s2799_s4 + $0x2d0] sm:$0xff] }
  0x3a   :  { %1302 = vmatprep.subr.bf16.mxu0 %v1301_v46  ;;  %v1335_v46 = vpack.c.bf16 %v132_v42, %v130_v41  ;;  %v1371_v41 = vpack.c.bf16 %v168_v36, %v166_v35  ;;  %v466_v35 = vld [vmem:[%s2801_s6 + $0x78] sm:$0xff] }
  0x3d   :  { %1304 = vmatpush1.bf16.msra.mxu0 %v1303_v53  ;;  %v1341_v53 = vpack.c.bf16 %v141_v51, %v139_v50  ;;  %v174_v51 = vld [vmem:[%s2799_s4 + $0x420] sm:$0xff] }
  0x3e   :  { %1306 = vmatprep.subr.bf16.mxu0 %v1305_v55  ;;  %v140_v55 = vld [vmem:[%s2799_s4 + $0x310] sm:$0xff] }
  0x3f   :  { %v1343_v58 = vpack.c.bf16 %v140_v55, %v138_v54  ;;  %v181_v54 = vld [vmem:[%s2799_s4 + $0x458] sm:$0xff] }
  0x41   :  { %1308 = vmatpush1.bf16.msra.mxu0 %v1307_v61  ;;  %v142_v61 = vld [vmem:[%s2799_s4 + $0x320] sm:$0xff] }
  0x42   :  { %1310 = vmatprep.subr.bf16.mxu0 %v1309_v63  ;;  %v147_v63 = vld [vmem:[%s2799_s4 + $0x348] sm:$0xff]  ;;  %v1347_v1 = vpack.c.bf16 %v144_v62, %v142_v61  ;;  %v185_v62 = vld [vmem:[%s2799_s4 + $0x478] sm:$0xff] }
  0x43   :  { %v1349_v2 = vpack.c.bf16 %v149_v0, %v147_v63  ;;  %v183_v61 = vld [vmem:[%s2799_s4 + $0x468] sm:$0xff] }
  0x44   :  { %291 = vmatmul.mubr.f32.vlgmr.msra.gmra.mrb[0].mxu0 %v191_v4  ;;  %v148_v4 = vld [vmem:[%s2799_s4 + $0x350] sm:$0xff]  ;;  %v1385_v0 = vpack.c.bf16 %v185_v62, %v183_v61  ;;  %v560_v62 = vld [vmem:[%s2802_s8 + $0x28] sm:$0xff] }
  0x45   :  { %1312 = vmatpush1.bf16.msra.mxu0 %v1311_v5  ;;  %361 = vmatprep.mubr.f32.mxu0 %v203_v6  ;;  %v151_v5 = vld [vmem:[%s2799_s4 + $0x368] sm:$0xff]  ;;  %v153_v6 = vld [vmem:[%s2799_s4 + $0x378] sm:$0xff] }
  0x46   :  { %1314 = vmatprep.subr.bf16.mxu0 %v1313_v7  ;;  %v1351_v7 = vpack.c.bf16 %v148_v4, %v146_v3  ;;  %v1353_v8 = vpack.c.bf16 %v153_v6, %v151_v5  ;;  %v206_v3 = vsub.s32 4, %v1747_v32  ;;  %v473_v6 = vld [vmem:[%s2801_s6 + $0xb0] sm:$0xff] }
  0x48   :  { %v207_v5 = vrot.slane %v1773_v44, %v206_v3 }
  0x49   :  { %1316 = vmatpush1.bf16.msra.mxu0 %v1315_v12  ;;  %v157_v12 = vld [vmem:[%s2799_s4 + $0x398] sm:$0xff] }
  0x4a   :  { %1318 = vmatprep.subr.bf16.mxu0 %v1317_v13  ;;  %v1355_v13 = vpack.c.bf16 %v152_v10, %v150_v9  ;;  %v1357_v14 = vpack.c.bf16 %v157_v12, %v155_v11  ;;  %v457_v9 = vld [vmem:[%s2801_s6 + $0x30] sm:$0xff]  ;;  %v475_v11 = vld [vmem:[%s2801_s6 + $0xc0] sm:$0xff]  ;;  %v476_v12 = vld [vmem:[%s2801_s6 + $0xc8] sm:$0xff] }
  0x4d   :  { %1320 = vmatpush1.bf16.msra.mxu0 %v1319_v18  ;;  %v161_v18 = vld [vmem:[%s2799_s4 + $0x3b8] sm:$0xff] }
  0x4e   :  { %1322 = vmatprep.subr.bf16.mxu0 %v1321_v19  ;;  %v1359_v19 = vpack.c.bf16 %v156_v16, %v154_v15  ;;  %v1361_v20 = vpack.c.bf16 %v161_v18, %v159_v17  ;;  %v460_v15 = vld [vmem:[%s2801_s6 + $0x48] sm:$0xff]  ;;  %v477_v17 = vld [vmem:[%s2801_s6 + $0xd0] sm:$0xff]  ;;  %v478_v18 = vld [vmem:[%s2801_s6 + $0xd8] sm:$0xff] }
  0x51   :  { %1324 = vmatpush1.bf16.msra.mxu0 %v1323_v24  ;;  %v165_v24 = vld [vmem:[%s2799_s4 + $0x3d8] sm:$0xff] }
  0x52   :  { %1326 = vmatprep.subr.bf16.mxu0 %v1325_v26  ;;  %v1363_v26 = vpack.c.bf16 %v160_v22, %v158_v21  ;;  %v1365_v27 = vpack.c.bf16 %v165_v24, %v163_v23  ;;  %v462_v21 = vld [vmem:[%s2801_s6 + $0x58] sm:$0xff]  ;;  %v479_v22 = vld [vmem:[%s2801_s6 + $0xe0] sm:$0xff]  ;;  %v480_v24 = vld [vmem:[%s2801_s6 + $0xe8] sm:$0xff] }
  0x55   :  { %1328 = vmatpush1.bf16.msra.mxu0 %v1327_v31  ;;  %v169_v31 = vld [vmem:[%s2799_s4 + $0x3f8] sm:$0xff] }
  0x56   :  { %1330 = vmatprep.subr.bf16.mxu0 %v1329_v33  ;;  %v1367_v33 = vpack.c.bf16 %v164_v29, %v162_v28  ;;  %v1369_v34 = vpack.c.bf16 %v169_v31, %v167_v30  ;;  %v1413_v28 = vpack.c.bf16 %v480_v24, %v479_v22  ;;  %v481_v29 = vld [vmem:[%s2801_s6 + $0xf0] sm:$0xff]  ;;  %v482_v30 = vld [vmem:[%s2801_s6 + $0xf8] sm:$0xff] }
  0x57   :  { %v573_v24 = vld [vmem:[%s2802_s8 + $0x90] sm:$0xff] }
  0x59   :  { %1332 = vmatpush1.bf16.msra.mxu0 %v1331_v38  ;;  %v173_v38 = vld [vmem:[%s2799_s4 + $0x418] sm:$0xff] }
  0x5a   :  { %1334 = vmatprep.subr.bf16.mxu0 %v1333_v40  ;;  %v2127_v40 = vsub.s32 2, %v1747_v32  ;;  %v1373_v42 = vpack.c.bf16 %v173_v38, %v171_v37  ;;  %v556_v37 = vld [vmem:[%s2802_s8 + $0x8] sm:$0xff]  ;;  %v558_v38 = vld [vmem:[%s2802_s8 + $0x18] sm:$0xff] }
  0x5c   :  { %v199_v48 = vrot.slane %v1773_v44, %v2127_v40  ;;  %v458_v44 = vld [vmem:[%s2801_s6 + $0x38] sm:$0xff] }
  0x5d   :  { %1336 = vmatpush1.bf16.msra.mxu0 %v1335_v46  ;;  %v175_v46 = vld [vmem:[%s2799_s4 + $0x428] sm:$0xff]  ;;  %v1403_v10 = vpack.c.bf16 %v458_v44, %v457_v9  ;;  %v566_v9 = vld [vmem:[%s2802_s8 + $0x58] sm:$0xff] }
  0x5e   :  { %1338 = vmatprep.subr.bf16.mxu0 %v1337_v47  ;;  %v177_v47 = vld [vmem:[%s2799_s4 + $0x438] sm:$0xff] }
  0x5f   :  { %v1377_v50 = vpack.c.bf16 %v177_v47, %v175_v46 }
  0x61   :  { %1340 = vmatpush1.bf16.msra.mxu0 %v1339_v52  ;;  %v176_v52 = vld [vmem:[%s2799_s4 + $0x430] sm:$0xff] }
  0x62   :  { %1342 = vmatprep.subr.bf16.mxu0 %v1341_v53  ;;  %v179_v53 = vld [vmem:[%s2799_s4 + $0x448] sm:$0xff]  ;;  %v1379_v55 = vpack.c.bf16 %v176_v52, %v174_v51 }
  0x63   :  { %v1381_v57 = vpack.c.bf16 %v181_v54, %v179_v53 }
  0x65   :  { %1344 = vmatpush1.bf16.msra.mxu0 %v1343_v58  ;;  %v178_v58 = vld [vmem:[%s2799_s4 + $0x440] sm:$0xff] }
  0x66   :  { %1346 = vmatprep.subr.bf16.mxu0 %v1345_v59  ;;  %v180_v59 = vld [vmem:[%s2799_s4 + $0x450] sm:$0xff] }
  0x67   :  { %v1383_v63 = vpack.c.bf16 %v180_v59, %v178_v58  ;;  %v2256_v58 = vld [vmem:[%s2804_s1] sm:$0x7] }
  0x69   :  { %1348 = vmatpush1.bf16.msra.mxu0 %v1347_v1  ;;  %v182_v1 = vld [vmem:[%s2799_s4 + $0x460] sm:$0xff] }
  0x6a   :  { %1350 = vmatprep.subr.bf16.mxu0 %v1349_v2  ;;  %v184_v2 = vld [vmem:[%s2799_s4 + $0x470] sm:$0xff] }
  0x6b   :  { %v1387_v4 = vpack.c.bf16 %v184_v2, %v182_v1  ;;  %v638_v2 = vrot.slane %v2256_v58, %v1762_v39 }
  0x6d   :  { %1352 = vmatpush1.bf16.msra.mxu0 %v1351_v7  ;;  %v474_v7 = vld [vmem:[%s2801_s6 + $0xb8] sm:$0xff] }
  0x6e   :  { %1354 = vmatprep.subr.bf16.mxu0 %v1353_v8  ;;  %v1401_v8 = vpack.c.bf16 %v474_v7, %v473_v6  ;;  %v561_v6 = vld [vmem:[%s2802_s8 + $0x30] sm:$0xff] }
  0x70   :  { %1402 = vmatprep.subr.bf16.mxu1 %v1401_v8  ;;  %v564_v8 = vld [vmem:[%s2802_s8 + $0x48] sm:$0xff] }
  0x71   :  { %1356 = vmatpush1.bf16.msra.mxu0 %v1355_v13  ;;  %1404 = vmatpush3.bf16.msra.mxu1 %v1403_v10  ;;  %v1405_v13 = vpack.c.bf16 %v476_v12, %v475_v11  ;;  %v1429_v10 = vpack.c.bf16 %v566_v9, %v564_v8  ;;  %v563_v11 = vld [vmem:[%s2802_s8 + $0x40] sm:$0xff]  ;;  %v565_v12 = vld [vmem:[%s2802_s8 + $0x50] sm:$0xff] }
  0x72   :  { %1358 = vmatprep.subr.bf16.mxu0 %v1357_v14  ;;  %v459_v14 = vld [vmem:[%s2801_s6 + $0x40] sm:$0xff] }
  0x73   :  { %v1407_v16 = vpack.c.bf16 %v460_v15, %v459_v14  ;;  %1406 = vmatprep.subr.bf16.mxu1 %v1405_v13  ;;  %v568_v13 = vld [vmem:[%s2802_s8 + $0x68] sm:$0xff]  ;;  %v570_v14 = vld [vmem:[%s2802_s8 + $0x78] sm:$0xff]  ;;  %v1431_v15 = vpack.c.bf16 %v565_v12, %v563_v11  ;;  %v599_v9 = vld [vmem:[%s2802_s8 + $0x160] sm:$0xff] }
  0x74   :  { %v606_v11 = vld [vmem:[%s2802_s8 + $0x198] sm:$0xff] }
  0x75   :  { %1360 = vmatpush1.bf16.msra.mxu0 %v1359_v19  ;;  %1408 = vmatpush3.bf16.msra.mxu1 %v1407_v16  ;;  %v1409_v19 = vpack.c.bf16 %v478_v18, %v477_v17  ;;  %v1433_v16 = vpack.c.bf16 %v570_v14, %v568_v13  ;;  %v567_v17 = vld [vmem:[%s2802_s8 + $0x60] sm:$0xff]  ;;  %v569_v18 = vld [vmem:[%s2802_s8 + $0x70] sm:$0xff] }
  0x76   :  { %1362 = vmatprep.subr.bf16.mxu0 %v1361_v20  ;;  %v461_v20 = vld [vmem:[%s2801_s6 + $0x50] sm:$0xff]  ;;  %v603_v14 = vld [vmem:[%s2802_s8 + $0x180] sm:$0xff] }
  0x77   :  { %v1411_v23 = vpack.c.bf16 %v462_v21, %v461_v20  ;;  %1410 = vmatprep.subr.bf16.mxu1 %v1409_v19  ;;  %v572_v19 = vld [vmem:[%s2802_s8 + $0x88] sm:$0xff]  ;;  %v574_v20 = vld [vmem:[%s2802_s8 + $0x98] sm:$0xff]  ;;  %v1435_v21 = vpack.c.bf16 %v569_v18, %v567_v17 }
  0x78   :  { %v1437_v22 = vpack.c.bf16 %v574_v20, %v572_v19  ;;  %v610_v17 = vld [vmem:[%s2802_s8 + $0x1b8] sm:$0xff]  ;;  %v607_v20 = vld [vmem:[%s2802_s8 + $0x1a0] sm:$0xff] }
  0x79   :  { %1364 = vmatpush1.bf16.msra.mxu0 %v1363_v26  ;;  %v463_v26 = vld [vmem:[%s2801_s6 + $0x60] sm:$0xff]  ;;  %1412 = vmatpush3.bf16.msra.mxu1 %v1411_v23 }
  0x7a   :  { %1366 = vmatprep.subr.bf16.mxu0 %v1365_v27  ;;  %v464_v27 = vld [vmem:[%s2801_s6 + $0x68] sm:$0xff]  ;;  %1414 = vmatprep.subr.bf16.mxu1 %v1413_v28  ;;  %v571_v23 = vld [vmem:[%s2802_s8 + $0x80] sm:$0xff] }
  0x7b   :  { %v1415_v31 = vpack.c.bf16 %v464_v27, %v463_v26  ;;  %v576_v26 = vld [vmem:[%s2802_s8 + $0xa8] sm:$0xff]  ;;  %v578_v27 = vld [vmem:[%s2802_s8 + $0xb8] sm:$0xff]  ;;  %v1439_v28 = vpack.c.bf16 %v573_v24, %v571_v23 }
  0x7c   :  { %v614_v23 = vld [vmem:[%s2802_s8 + $0x1d8] sm:$0xff] }
  0x7d   :  { %1368 = vmatpush1.bf16.msra.mxu0 %v1367_v33  ;;  %v1417_v33 = vpack.c.bf16 %v482_v30, %v481_v29  ;;  %1416 = vmatpush3.bf16.msra.mxu1 %v1415_v31  ;;  %v1441_v29 = vpack.c.bf16 %v578_v27, %v576_v26  ;;  %v575_v30 = vld [vmem:[%s2802_s8 + $0xa0] sm:$0xff]  ;;  %v577_v31 = vld [vmem:[%s2802_s8 + $0xb0] sm:$0xff] }
  0x7e   :  { %1370 = vmatprep.subr.bf16.mxu0 %v1369_v34  ;;  %v465_v34 = vld [vmem:[%s2801_s6 + $0x70] sm:$0xff]  ;;  %v611_v27 = vld [vmem:[%s2802_s8 + $0x1c0] sm:$0xff] }
  0x7f   :  { %v1419_v36 = vpack.c.bf16 %v466_v35, %v465_v34  ;;  %1418 = vmatprep.subr.bf16.mxu1 %v1417_v33  ;;  %v580_v33 = vld [vmem:[%s2802_s8 + $0xc8] sm:$0xff]  ;;  %v582_v34 = vld [vmem:[%s2802_s8 + $0xd8] sm:$0xff]  ;;  %v1443_v35 = vpack.c.bf16 %v577_v31, %v575_v30 }
  0x80   :  { %v618_v30 = vld [vmem:[%s2802_s8 + $0x1f8] sm:$0xff] }
  0x81   :  { %1372 = vmatpush1.bf16.msra.mxu0 %v1371_v41  ;;  %1420 = vmatpush3.bf16.msra.mxu1 %v1419_v36  ;;  %v1421_v41 = vpack.c.bf16 %v558_v38, %v556_v37  ;;  %v1445_v36 = vpack.c.bf16 %v582_v34, %v580_v33  ;;  %v579_v37 = vld [vmem:[%s2802_s8 + $0xc0] sm:$0xff]  ;;  %v581_v38 = vld [vmem:[%s2802_s8 + $0xd0] sm:$0xff] }
  0x82   :  { %1374 = vmatprep.subr.bf16.mxu0 %v1373_v42  ;;  %v186_v42 = vld [vmem:[%s2803_s5] sm:$0x3] }
  0x83   :  { %1422 = vmatprep.subr.bf16.mxu1 %v1421_v41  ;;  %v216_v43 = vrot.slane %v186_v42, %v1928_v60  ;;  %v220_v45 = vrot.slane %v186_v42, %v1762_v39  ;;  %v584_v41 = vld [vmem:[%s2802_s8 + $0xe8] sm:$0xff]  ;;  %v586_v42 = vld [vmem:[%s2802_s8 + $0xf8] sm:$0xff]  ;;  %v615_v34 = vld [vmem:[%s2802_s8 + $0x1e0] sm:$0xff] }
  0x84   :  { %362 = vmatmul.mubr.f32.vlgmr.msra.gmra.mrb[0].mxu0 %v199_v48 }
  0x85   :  { %1376 = vmatpush1.bf16.msra.mxu0 %v1375_v49  ;;  %432 = vmatprep.mubr.f32.mxu0 %v1613_v56 }
  0x86   :  { %1378 = vmatprep.subr.bf16.mxu0 %v1377_v50 }
  0x89   :  { %1380 = vmatpush1.bf16.msra.mxu0 %v1379_v55  ;;  %v555_v55 = vld [vmem:[%s2802_s8] sm:$0xff] }
  0x8a   :  { %1382 = vmatprep.subr.bf16.mxu0 %v1381_v57  ;;  %v557_v57 = vld [vmem:[%s2802_s8 + $0x10] sm:$0xff] }
  0x8b   :  { %v1423_v1 = vpack.c.bf16 %v557_v57, %v555_v55  ;;  %v594_v55 = vld [vmem:[%s2802_s8 + $0x138] sm:$0xff] }
  0x8d   :  { %1384 = vmatpush1.bf16.msra.mxu0 %v1383_v63  ;;  %v562_v63 = vld [vmem:[%s2802_s8 + $0x38] sm:$0xff] }
  0x8e   :  { %1386 = vmatprep.subr.bf16.mxu0 %v1385_v0 }
  0x91   :  { %1388 = vmatpush1.bf16.msra.mxu0 %v1387_v4  ;;  %v1425_v4 = vpack.c.bf16 %v562_v63, %v560_v62  ;;  %v593_v62 = vld [vmem:[%s2802_s8 + $0x130] sm:$0xff]  ;;  %v596_v63 = vld [vmem:[%s2802_s8 + $0x148] sm:$0xff] }
  0x94   :  { %1167 = vmatmul.mubr.msk.f32.vlgmr.msra.gmra.mrb[0].mxu0 %vm223_vm0, %v207_v5  ;;  %v559_v5 = vld [vmem:[%s2802_s8 + $0x20] sm:$0xff] }
  0x95   :  { %v1427_v44 = vpack.c.bf16 %v561_v6, %v559_v5  ;;  %v600_v5 = vld [vmem:[%s2802_s8 + $0x168] sm:$0xff]  ;;  %v602_v6 = vld [vmem:[%s2802_s8 + $0x178] sm:$0xff] }
  0x96   :  { %v1465_v8 = vpack.c.bf16 %v602_v6, %v600_v5  ;;  %v836_v5 = vld [vmem:[%s2805_s10 + $0x80] sm:$0xff] }
 0x167   :  { %v434_v46 = vpop.f32.mrb[0].mxu0 }
 0x168   :  { %v1589_v47 = vadd.f32 %v434_v46, %v216_v43  ;;  %v436_v48 = vpop.f32.mrb[1].mxu0  ;;  %v1447_v43 = vpack.c.bf16 %v581_v38, %v579_v37  ;;  %v583_v46 = vld [vmem:[%s2802_s8 + $0xe0] sm:$0xff]  ;;  %v622_v37 = vld [vmem:[%s2802_s8 + $0x218] sm:$0xff] }
 0x169   :  { %v1590_v49 = vadd.f32 %v436_v48, %v220_v45  ;;  %v1449_v45 = vpack.c.bf16 %v586_v42, %v584_v41  ;;  %v588_v48 = vld [vmem:[%s2802_s8 + $0x108] sm:$0xff]  ;;  %v619_v42 = vld [vmem:[%s2802_s8 + $0x200] sm:$0xff] }
 0x16a   :  { %v441_v50 = vmin.f32 %v1589_v47, 0.0  ;;  %vm439_vm2 = vcmp.gt.f32.partialorder %v1589_v47, 0.0 }
 0x16b   :  { %v442_v51 = vmin.f32 %v1590_v49, 0.0  ;;  %vm440_vm1 = vcmp.gt.f32.partialorder %v1590_v49, 0.0 }
 0x16c   :  { %v443_v52 = vmul.f32 1.442695, %v441_v50 }
 0x16d   :  { %v445_v53 = vmul.f32 1.442695, %v442_v51 }
 0x16e   :  { %1601 = vpow2.f32 %v443_v52  ;;  %v587_v52 = vld [vmem:[%s2802_s8 + $0x100] sm:$0xff] }
 0x16f   :  { %1603 = vpow2.f32 %v445_v53  ;;  %v589_v53 = vld [vmem:[%s2802_s8 + $0x110] sm:$0xff] }
 0x170   :  { %v1455_v57 = vpack.c.bf16 %v589_v53, %v587_v52  ;;  %v628_v53 = vld [vmem:[%s2802_s8 + $0x248] sm:$0x3f] }
 0x178   :  { %v1602_v54 = vpop.eup %1601 }
 0x179   :  { %v1604_v59 = vpop.eup %1603  ;;  %v1168_v61 = vadd.f32 -1.0, %v1602_v54  ;;  %v592_v54 = vld [vmem:[%s2802_s8 + $0x128] sm:$0xff] }
 0x17a   :  { %v1169_v0 = vadd.f32 -1.0, %v1604_v59  ;;  %v1457_v59 = vpack.c.bf16 %v594_v55, %v592_v54  ;;  %v642_v54 = vrot.slane %v2256_v58, %v2127_v40  ;;  %v627_v55 = vld [vmem:[%s2802_s8 + $0x240] sm:$0x3f] }
 0x17b   :  { %v449_v7 = vsel %vm439_vm2, %v1589_v47, %v1168_v61  ;;  %v585_v47 = vld [vmem:[%s2802_s8 + $0xf0] sm:$0xff]  ;;  %v591_v61 = vld [vmem:[%s2802_s8 + $0x120] sm:$0xff] }
 0x17c   :  { %v450_v3 = vsel %vm440_vm1, %v1590_v49, %v1169_v0  ;;  %v590_v49 = vld [vmem:[%s2802_s8 + $0x118] sm:$0xff]  ;;  %v1451_v50 = vpack.c.bf16 %v585_v47, %v583_v46  ;;  %v634_v47 = vrot.slane %v2256_v58, %v1928_v60  ;;  %v820_v58 = vld [vmem:[%s2805_s10] sm:$0xff] }
 0x17d   :  { %548 = vmatprep.mubr.f32.mxu1 %v450_v3  ;;  %v1453_v51 = vpack.c.bf16 %v590_v49, %v588_v48  ;;  %v598_v0 = vld [vmem:[%s2802_s8 + $0x158] sm:$0xff]  ;;  %v595_v3 = vld [vmem:[%s2802_s8 + $0x140] sm:$0xff] }
 0x17e   :  { %549 = vmatmul.mubr.f32.vlgmr.msra.gmra.mrb[0].mxu1 %v449_v7  ;;  %v626_v46 = vld [vmem:[%s2802_s8 + $0x238] sm:$0xff] }
 0x17f   :  { %1424 = vmatpush1.bf16.msra.mxu1 %v1423_v1  ;;  %730 = vmatprep.mubr.f32.mxu1 %v638_v2  ;;  %v1459_v1 = vpack.c.bf16 %v593_v62, %v591_v61  ;;  %v1461_v2 = vpack.c.bf16 %v598_v0, %v596_v63  ;;  %v823_v61 = vld [vmem:[%s2805_s10 + $0x18] sm:$0xff]  ;;  %v830_v63 = vld [vmem:[%s2805_s10 + $0x50] sm:$0xff] }
 0x180   :  { %1426 = vmatprep.subr.bf16.mxu1 %v1425_v4  ;;  %v597_v4 = vld [vmem:[%s2802_s8 + $0x150] sm:$0xff]  ;;  %v827_v62 = vld [vmem:[%s2805_s10 + $0x38] sm:$0xff]  ;;  %v1495_v0 = vpack.c.bf16 %v823_v61, %v820_v58  ;;  %v865_v58 = vld [vmem:[%s2805_s10 + $0x168] sm:$0xff] }
 0x181   :  { %v1463_v7 = vpack.c.bf16 %v597_v4, %v595_v3  ;;  %v829_v3 = vld [vmem:[%s2805_s10 + $0x48] sm:$0xff]  ;;  %v872_v61 = vld [vmem:[%s2805_s10 + $0x1a0] sm:$0xff] }
 0x182   :  { %v833_v4 = vld [vmem:[%s2805_s10 + $0x68] sm:$0xff] }
 0x183   :  { %1428 = vmatpush1.bf16.msra.mxu1 %v1427_v44  ;;  %v601_v44 = vld [vmem:[%s2802_s8 + $0x170] sm:$0xff] }
 0x184   :  { %1430 = vmatprep.subr.bf16.mxu1 %v1429_v10  ;;  %v604_v10 = vld [vmem:[%s2802_s8 + $0x188] sm:$0xff]  ;;  %v1467_v12 = vpack.c.bf16 %v601_v44, %v599_v9  ;;  %v835_v9 = vld [vmem:[%s2805_s10 + $0x78] sm:$0xff] }
 0x185   :  { %v1469_v13 = vpack.c.bf16 %v606_v11, %v604_v10  ;;  %v839_v44 = vld [vmem:[%s2805_s10 + $0x98] sm:$0xff]  ;;  %v842_v10 = vld [vmem:[%s2805_s10 + $0xb0] sm:$0xff] }
 0x187   :  { %1432 = vmatpush1.bf16.msra.mxu1 %v1431_v15  ;;  %v605_v15 = vld [vmem:[%s2802_s8 + $0x190] sm:$0xff] }
 0x188   :  { %1434 = vmatprep.subr.bf16.mxu1 %v1433_v16  ;;  %v608_v16 = vld [vmem:[%s2802_s8 + $0x1a8] sm:$0xff]  ;;  %v1471_v18 = vpack.c.bf16 %v605_v15, %v603_v14 }
 0x189   :  { %v1473_v19 = vpack.c.bf16 %v610_v17, %v608_v16  ;;  %v841_v14 = vld [vmem:[%s2805_s10 + $0xa8] sm:$0xff]  ;;  %v848_v16 = vld [vmem:[%s2805_s10 + $0xe0] sm:$0xff]  ;;  %v870_v17 = vld [vmem:[%s2805_s10 + $0x190] sm:$0xff] }
 0x18a   :  { %v845_v15 = vld [vmem:[%s2805_s10 + $0xc8] sm:$0xff] }
 0x18b   :  { %1436 = vmatpush1.bf16.msra.mxu1 %v1435_v21  ;;  %v609_v21 = vld [vmem:[%s2802_s8 + $0x1b0] sm:$0xff] }
 0x18c   :  { %1438 = vmatprep.subr.bf16.mxu1 %v1437_v22  ;;  %v612_v22 = vld [vmem:[%s2802_s8 + $0x1c8] sm:$0xff]  ;;  %v1475_v24 = vpack.c.bf16 %v609_v21, %v607_v20  ;;  %v844_v20 = vld [vmem:[%s2805_s10 + $0xc0] sm:$0xff] }
 0x18d   :  { %v1477_v26 = vpack.c.bf16 %v614_v23, %v612_v22  ;;  %v822_v22 = vld [vmem:[%s2805_s10 + $0x10] sm:$0xff]  ;;  %v1509_v23 = vpack.c.bf16 %v848_v16, %v845_v15  ;;  %v837_v15 = vld [vmem:[%s2805_s10 + $0x88] sm:$0xff] }
 0x18f   :  { %1440 = vmatpush1.bf16.msra.mxu1 %v1439_v28  ;;  %v613_v28 = vld [vmem:[%s2802_s8 + $0x1d0] sm:$0xff] }
 0x190   :  { %1442 = vmatprep.subr.bf16.mxu1 %v1441_v29  ;;  %v616_v29 = vld [vmem:[%s2802_s8 + $0x1e8] sm:$0xff]  ;;  %v1479_v31 = vpack.c.bf16 %v613_v28, %v611_v27  ;;  %v854_v28 = vld [vmem:[%s2805_s10 + $0x110] sm:$0xff] }
 0x191   :  { %v1481_v33 = vpack.c.bf16 %v618_v30, %v616_v29  ;;  %v825_v27 = vld [vmem:[%s2805_s10 + $0x28] sm:$0xff]  ;;  %v876_v30 = vld [vmem:[%s2805_s10 + $0x1c0] sm:$0xff] }
 0x192   :  { %v1559_v29 = vpack.c.bf16 %v825_v27, %v822_v22  ;;  %v886_v22 = vld [vmem:[%s2805_s10 + $0x210] sm:$0xff]  ;;  %v840_v27 = vld [vmem:[%s2805_s10 + $0xa0] sm:$0xff] }
 0x193   :  { %1444 = vmatpush1.bf16.msra.mxu1 %v1443_v35  ;;  %v617_v35 = vld [vmem:[%s2802_s8 + $0x1f0] sm:$0xff] }
 0x194   :  { %1446 = vmatprep.subr.bf16.mxu1 %v1445_v36  ;;  %v620_v36 = vld [vmem:[%s2802_s8 + $0x208] sm:$0xff]  ;;  %v1483_v38 = vpack.c.bf16 %v617_v35, %v615_v34  ;;  %v828_v34 = vld [vmem:[%s2805_s10 + $0x40] sm:$0xff]  ;;  %v831_v35 = vld [vmem:[%s2805_s10 + $0x58] sm:$0xff] }
 0x195   :  { %v1485_v41 = vpack.c.bf16 %v622_v37, %v620_v36  ;;  %v1563_v37 = vpack.c.bf16 %v831_v35, %v828_v34  ;;  %v897_v35 = vld [vmem:[%s2805_s10 + $0x268] sm:$0xff] }
 0x197   :  { %1448 = vmatpush1.bf16.msra.mxu1 %v1447_v43  ;;  %v621_v43 = vld [vmem:[%s2802_s8 + $0x210] sm:$0xff] }
 0x198   :  { %1450 = vmatprep.subr.bf16.mxu1 %v1449_v45  ;;  %v624_v45 = vld [vmem:[%s2802_s8 + $0x228] sm:$0xff]  ;;  %v1487_v48 = vpack.c.bf16 %v621_v43, %v619_v42  ;;  %v850_v42 = vld [vmem:[%s2805_s10 + $0xf0] sm:$0xff] }
 0x199   :  { %v1489_v49 = vpack.c.bf16 %v626_v46, %v624_v45  ;;  %v853_v43 = vld [vmem:[%s2805_s10 + $0x108] sm:$0xff] }
 0x19a   :  { %v885_v45 = vld [vmem:[%s2805_s10 + $0x208] sm:$0xff] }
 0x19b   :  { %1452 = vmatpush1.bf16.msra.mxu1 %v1451_v50  ;;  %v623_v50 = vld [vmem:[%s2802_s8 + $0x220] sm:$0xff]  ;;  %v857_v46 = vld [vmem:[%s2805_s10 + $0x128] sm:$0xff] }
 0x19c   :  { %1454 = vmatprep.subr.bf16.mxu1 %v1453_v51  ;;  %v625_v51 = vld [vmem:[%s2802_s8 + $0x230] sm:$0xff] }
 0x19d   :  { %v1491_v52 = vpack.c.bf16 %v625_v51, %v623_v50  ;;  %v856_v51 = vld [vmem:[%s2805_s10 + $0x120] sm:$0xff] }
 0x19f   :  { %1456 = vmatpush1.bf16.msra.mxu1 %v1455_v57  ;;  %v824_v57 = vld [vmem:[%s2805_s10 + $0x20] sm:$0xff] }
 0x1a0   :  { %1458 = vmatprep.subr.bf16.mxu1 %v1457_v59 }
 0x1a3   :  { %1460 = vmatpush1.bf16.msra.mxu1 %v1459_v1  ;;  %v1497_v1 = vpack.c.bf16 %v830_v63, %v827_v62 }
 0x1a4   :  { %1462 = vmatprep.subr.bf16.mxu1 %v1461_v2  ;;  %v826_v2 = vld [vmem:[%s2805_s10 + $0x30] sm:$0xff] }
 0x1a5   :  { %v1499_v6 = vpack.c.bf16 %v829_v3, %v826_v2  ;;  %v875_v2 = vld [vmem:[%s2805_s10 + $0x1b8] sm:$0xff]  ;;  %v878_v3 = vld [vmem:[%s2805_s10 + $0x1d0] sm:$0xff] }
 0x1a7   :  { %1464 = vmatpush1.bf16.msra.mxu1 %v1463_v7  ;;  %v1501_v7 = vpack.c.bf16 %v836_v5, %v833_v4  ;;  %v1529_v5 = vpack.c.bf16 %v878_v3, %v875_v2  ;;  %v907_v2 = vld [vmem:[%s2805_s10 + $0x2b8] sm:$0xff]  ;;  %v858_v3 = vld [vmem:[%s2805_s10 + $0x130] sm:$0xff] }
 0x1a8   :  { %1466 = vmatprep.subr.bf16.mxu1 %v1465_v8  ;;  %v832_v8 = vld [vmem:[%s2805_s10 + $0x60] sm:$0xff] }
 0x1a9   :  { %v1503_v11 = vpack.c.bf16 %v835_v9, %v832_v8  ;;  %v881_v8 = vld [vmem:[%s2805_s10 + $0x1e8] sm:$0xff]  ;;  %v884_v9 = vld [vmem:[%s2805_s10 + $0x200] sm:$0xff] }
 0x1ab   :  { %1468 = vmatpush1.bf16.msra.mxu1 %v1467_v12  ;;  %v1505_v12 = vpack.c.bf16 %v842_v10, %v839_v44  ;;  %v1533_v10 = vpack.c.bf16 %v884_v9, %v881_v8 }
 0x1ac   :  { %1470 = vmatprep.subr.bf16.mxu1 %v1469_v13  ;;  %v838_v13 = vld [vmem:[%s2805_s10 + $0x90] sm:$0xff] }
 0x1af   :  { %1472 = vmatpush1.bf16.msra.mxu1 %v1471_v18  ;;  %v873_v18 = vld [vmem:[%s2805_s10 + $0x1a8] sm:$0xff] }
 0x1b0   :  { %1474 = vmatprep.subr.bf16.mxu1 %v1473_v19  ;;  %v1507_v19 = vpack.c.bf16 %v841_v14, %v838_v13  ;;  %v1557_v21 = vpack.c.bf16 %v873_v18, %v870_v17  ;;  %v834_v13 = vld [vmem:[%s2805_s10 + $0x70] sm:$0xff]  ;;  %v887_v17 = vld [vmem:[%s2805_s10 + $0x218] sm:$0xff] }
 0x1b1   :  { %v1567_v16 = vpack.c.bf16 %v837_v15, %v834_v13  ;;  %v890_v18 = vld [vmem:[%s2805_s10 + $0x230] sm:$0xff]  ;;  %v913_v13 = vld [vmem:[%s2805_s10 + $0x2e8] sm:$0xff]  ;;  %v867_v15 = vld [vmem:[%s2805_s10 + $0x178] sm:$0xff] }
 0x1b2   :  { %1558 = vmatprep.subr.bf16.mxu0 %v1557_v21  ;;  %v891_v21 = vld [vmem:[%s2805_s10 + $0x238] sm:$0xff] }
 0x1b3   :  { %1476 = vmatpush1.bf16.msra.mxu1 %v1475_v24  ;;  %v847_v24 = vld [vmem:[%s2805_s10 + $0xd8] sm:$0xff]  ;;  %1560 = vmatpush3.bf16.msra.mxu0 %v1559_v29 }
 0x1b4   :  { %1478 = vmatprep.subr.bf16.mxu1 %v1477_v26  ;;  %v851_v26 = vld [vmem:[%s2805_s10 + $0xf8] sm:$0xff]  ;;  %v1511_v36 = vpack.c.bf16 %v847_v24, %v844_v20  ;;  %v1537_v20 = vpack.c.bf16 %v890_v18, %v887_v17 }
 0x1b7   :  { %1480 = vmatpush1.bf16.msra.mxu1 %v1479_v31  ;;  %v879_v31 = vld [vmem:[%s2805_s10 + $0x1d8] sm:$0xff] }
 0x1b8   :  { %1482 = vmatprep.subr.bf16.mxu1 %v1481_v33  ;;  %v1561_v33 = vpack.c.bf16 %v879_v31, %v876_v30  ;;  %v893_v30 = vld [vmem:[%s2805_s10 + $0x248] sm:$0xff]  ;;  %v896_v31 = vld [vmem:[%s2805_s10 + $0x260] sm:$0xff] }
 0x1b9   :  { %v1541_v34 = vpack.c.bf16 %v896_v31, %v893_v30 }
 0x1ba   :  { %1562 = vmatprep.subr.bf16.mxu0 %v1561_v33  ;;  %v894_v33 = vld [vmem:[%s2805_s10 + $0x250] sm:$0xff] }
 0x1bb   :  { %1484 = vmatpush1.bf16.msra.mxu1 %v1483_v38  ;;  %v882_v38 = vld [vmem:[%s2805_s10 + $0x1f0] sm:$0xff]  ;;  %1564 = vmatpush3.bf16.msra.mxu0 %v1563_v37  ;;  %v895_v37 = vld [vmem:[%s2805_s10 + $0x258] sm:$0xff] }
 0x1bc   :  { %1486 = vmatprep.subr.bf16.mxu1 %v1485_v41  ;;  %v1513_v41 = vpack.c.bf16 %v854_v28, %v851_v26  ;;  %v843_v28 = vld [vmem:[%s2805_s10 + $0xb8] sm:$0xff] }
 0x1bd   :  { %v1571_v29 = vpack.c.bf16 %v843_v28, %v840_v27 }
 0x1be   :  { %731 = vmatmul.mubr.f32.vlgmr.msra.gmra.mrb[2].mxu1 %v634_v47  ;;  %v860_v47 = vld [vmem:[%s2805_s10 + $0x140] sm:$0xff] }
 0x1bf   :  { %1488 = vmatpush1.bf16.msra.mxu1 %v1487_v48  ;;  %801 = vmatprep.mubr.f32.mxu1 %v1613_v56  ;;  %v821_v56 = vld [vmem:[%s2805_s10 + $0x8] sm:$0xff]  ;;  %v1565_v48 = vpack.c.bf16 %v885_v45, %v882_v38  ;;  %v1517_v50 = vpack.c.bf16 %v860_v47, %v857_v46  ;;  %v1573_v38 = vpack.c.bf16 %v897_v35, %v894_v33  ;;  %v899_v46 = vld [vmem:[%s2805_s10 + $0x278] sm:$0xff]  ;;  %v902_v47 = vld [vmem:[%s2805_s10 + $0x290] sm:$0xff] }
 0x1c0   :  { %1490 = vmatprep.subr.bf16.mxu1 %v1489_v49  ;;  %v1493_v59 = vpack.c.bf16 %v824_v57, %v821_v56  ;;  %v1515_v49 = vpack.c.bf16 %v853_v43, %v850_v42  ;;  %v862_v57 = vld [vmem:[%s2805_s10 + $0x150] sm:$0xff]  ;;  %v849_v43 = vld [vmem:[%s2805_s10 + $0xe8] sm:$0xff] }
 0x1c1   :  { %1566 = vmatprep.subr.bf16.mxu0 %v1565_v48  ;;  %v1523_v62 = vpack.c.bf16 %v865_v58, %v862_v57  ;;  %v846_v42 = vld [vmem:[%s2805_s10 + $0xd0] sm:$0xff]  ;;  %v900_v48 = vld [vmem:[%s2805_s10 + $0x280] sm:$0xff]  ;;  %v905_v57 = vld [vmem:[%s2805_s10 + $0x2a8] sm:$0xff] }
 0x1c2   :  { %1568 = vmatpush3.bf16.msra.mxu0 %v1567_v16  ;;  %v1575_v45 = vpack.c.bf16 %v849_v43, %v846_v42 }
 0x1c3   :  { %1492 = vmatpush1.bf16.msra.mxu1 %v1491_v52  ;;  %v859_v52 = vld [vmem:[%s2805_s10 + $0x138] sm:$0xff] }
 0x1c4   :  { %1170 = vmatprep.subr.msk.mxu1 %vm659_vm3, %v628_v53  ;;  %v863_v53 = vld [vmem:[%s2805_s10 + $0x158] sm:$0xff] }
 0x1c7   :  { %1171 = vmatpush1.msk.msra.mxu1 %vm659_vm3, %v627_v55  ;;  %v1519_v55 = vpack.c.bf16 %v859_v52, %v856_v51  ;;  %v898_v51 = vld [vmem:[%s2805_s10 + $0x270] sm:$0xff]  ;;  %v901_v52 = vld [vmem:[%s2805_s10 + $0x288] sm:$0xff] }
 0x1c8   :  { %1172 = vmatmul.mubr.msk.f32.vlgmr.msra.gmra.mrb[2].mxu1 %vm656_vm4, %v642_v54  ;;  %1494 = vmatprep.subr.bf16.mxu1 %v1493_v59  ;;  %v866_v54 = vld [vmem:[%s2805_s10 + $0x170] sm:$0xff]  ;;  %v869_v59 = vld [vmem:[%s2805_s10 + $0x188] sm:$0xff] }
 0x1c9   :  { %1496 = vmatpush1.bf16.msra.mxu1 %v1495_v0  ;;  %v1521_v56 = vpack.c.bf16 %v866_v54, %v863_v53  ;;  %v1525_v63 = vpack.c.bf16 %v872_v61, %v869_v59  ;;  %v868_v0 = vld [vmem:[%s2805_s10 + $0x180] sm:$0xff]  ;;  %v1547_v54 = vpack.c.bf16 %v901_v52, %v898_v51  ;;  %v906_v61 = vld [vmem:[%s2805_s10 + $0x2b0] sm:$0xff]  ;;  %v1614_v52 = vmov 1966171168  }
 0x1ca   :  { %1498 = vmatprep.subr.bf16.mxu1 %v1497_v1  ;;  %v871_v1 = vld [vmem:[%s2805_s10 + $0x198] sm:$0xff]  ;;  %v908_v59 = vld [vmem:[%s2805_s10 + $0x2c0] sm:$0xff] }
 0x1cb   :  { %v1527_v4 = vpack.c.bf16 %v871_v1, %v868_v0  ;;  %v904_v1 = vld [vmem:[%s2805_s10 + $0x2a0] sm:$0xff] }
 0x1cc   :  { %v916_v51 = vld [vmem:[%s2808_s11] sm:$0x7] }
 0x1cd   :  { %1500 = vmatpush1.bf16.msra.mxu1 %v1499_v6  ;;  %v874_v6 = vld [vmem:[%s2805_s10 + $0x1b0] sm:$0xff] }
 0x1ce   :  { %1502 = vmatprep.subr.bf16.mxu1 %v1501_v7  ;;  %v877_v7 = vld [vmem:[%s2805_s10 + $0x1c8] sm:$0xff] }
 0x1cf   :  { %v1531_v44 = vpack.c.bf16 %v877_v7, %v874_v6  ;;  %v911_v6 = vld [vmem:[%s2805_s10 + $0x2d8] sm:$0xff]  ;;  %v914_v7 = vld [vmem:[%s2805_s10 + $0x2f0] sm:$0xff] }
 0x1d0   :  { %v1553_v9 = vpack.c.bf16 %v914_v7, %v911_v6 }
 0x1d1   :  { %1504 = vmatpush1.bf16.msra.mxu1 %v1503_v11  ;;  %v880_v11 = vld [vmem:[%s2805_s10 + $0x1e0] sm:$0xff] }
 0x1d2   :  { %1506 = vmatprep.subr.bf16.mxu1 %v1505_v12  ;;  %v883_v12 = vld [vmem:[%s2805_s10 + $0x1f8] sm:$0xff] }
 0x1d3   :  { %v1535_v14 = vpack.c.bf16 %v883_v12, %v880_v11  ;;  %v910_v11 = vld [vmem:[%s2805_s10 + $0x2d0] sm:$0xff] }
 0x1d4   :  { %v1555_v16 = vpack.c.bf16 %v913_v13, %v910_v11 }
 0x1d5   :  { %1508 = vmatpush1.bf16.msra.mxu1 %v1507_v19  ;;  %v888_v19 = vld [vmem:[%s2805_s10 + $0x220] sm:$0xff] }
 0x1d6   :  { %1510 = vmatprep.subr.bf16.mxu1 %v1509_v23  ;;  %v889_v23 = vld [vmem:[%s2805_s10 + $0x228] sm:$0xff]  ;;  %v1569_v24 = vpack.c.bf16 %v891_v21, %v888_v19  ;;  %v483_v19 = vld [vmem:[%s2806_s7] sm:$0x1] }
 0x1d7   :  { %v1539_v26 = vpack.c.bf16 %v889_v23, %v886_v22 }
 0x1d8   :  { %1570 = vmatprep.subr.bf16.mxu0 %v1569_v24  ;;  %v629_v24 = vld [vmem:[%s2807_s9] sm:$0x3] }
 0x1d9   :  { %1512 = vmatpush1.bf16.msra.mxu1 %v1511_v36  ;;  %1572 = vmatpush3.bf16.msra.mxu0 %v1571_v29  ;;  %v892_v36 = vld [vmem:[%s2805_s10 + $0x240] sm:$0xff]  ;;  %v653_v27 = vrot.slane %v629_v24, %v1762_v39 }
 0x1da   :  { %1514 = vmatprep.subr.bf16.mxu1 %v1513_v41  ;;  %v1543_v41 = vpack.c.bf16 %v895_v37, %v892_v36  ;;  %1574 = vmatprep.subr.bf16.mxu0 %v1573_v38 }
 0x1dd   :  { %1516 = vmatpush1.bf16.msra.mxu1 %v1515_v49  ;;  %1576 = vmatpush3.bf16.msra.mxu0 %v1575_v45  ;;  %v1545_v49 = vpack.c.bf16 %v902_v47, %v899_v46 }
 0x1de   :  { %1518 = vmatprep.subr.bf16.mxu1 %v1517_v50  ;;  %v903_v50 = vld [vmem:[%s2805_s10 + $0x298] sm:$0xff] }
 0x1df   :  { %v1577_v53 = vpack.c.bf16 %v903_v50, %v900_v48 }
 0x1e1   :  { %1520 = vmatpush1.bf16.msra.mxu1 %v1519_v55  ;;  %v852_v55 = vld [vmem:[%s2805_s10 + $0x100] sm:$0xff]  ;;  %1578 = vmatprep.subr.bf16.mxu0 %v1577_v53  ;;  %v1080_v53 = vunpack.c.l.s4 %v1614_v52 }
 0x1e2   :  { %1522 = vmatprep.subr.bf16.mxu1 %v1521_v56  ;;  %v855_v56 = vld [vmem:[%s2805_s10 + $0x118] sm:$0xff] }
 0x1e3   :  { %v1579_v58 = vpack.c.bf16 %v855_v56, %v852_v55  ;;  %v925_v56 = vrot.slane %v916_v51, %v1762_v39 }
 0x1e5   :  { %1524 = vmatpush1.bf16.msra.mxu1 %v1523_v62  ;;  %v909_v62 = vld [vmem:[%s2805_s10 + $0x2c8] sm:$0xff]  ;;  %1580 = vmatpush3.bf16.msra.mxu0 %v1579_v58 }
 0x1e6   :  { %1526 = vmatprep.subr.bf16.mxu1 %v1525_v63  ;;  %v1549_v63 = vpack.c.bf16 %v908_v59, %v905_v57  ;;  %v1581_v0 = vpack.c.bf16 %v909_v62, %v906_v61  ;;  %v1081_v57 = vunpack.c.0.s8 %v1080_v53  ;;  %v929_v61 = vrot.slane %v916_v51, %v2127_v40 }
 0x1e8   :  { %1582 = vmatprep.subr.bf16.mxu0 %v1581_v0 }
 0x1e9   :  { %1528 = vmatpush1.bf16.msra.mxu1 %v1527_v4  ;;  %v1551_v4 = vpack.c.bf16 %v907_v2, %v904_v1  ;;  %v1084_v2 = vsub.s32 %v1081_v57, %v1747_v32 }
 0x1ea   :  { %1530 = vmatprep.subr.bf16.mxu1 %v1529_v5  ;;  %v861_v5 = vld [vmem:[%s2805_s10 + $0x148] sm:$0xff] }
 0x1eb   :  { %v1583_v8 = vpack.c.bf16 %v861_v5, %v858_v3 }
 0x1ed   :  { %1532 = vmatpush1.bf16.msra.mxu1 %v1531_v44  ;;  %v912_v44 = vld [vmem:[%s2805_s10 + $0x2e0] sm:$0xff]  ;;  %1584 = vmatpush3.bf16.msra.mxu0 %v1583_v8 }
 0x1ee   :  { %1534 = vmatprep.subr.bf16.mxu1 %v1533_v10  ;;  %v915_v10 = vld [vmem:[%s2805_s10 + $0x2f8] sm:$0xff] }
 0x1ef   :  { %v1585_v12 = vpack.c.bf16 %v915_v10, %v912_v44  ;;  %v1074_v44 = vld [vmem:[%s2809_s2] sm:$0x7] }
 0x1f1   :  { %1536 = vmatpush1.bf16.msra.mxu1 %v1535_v14  ;;  %v864_v14 = vld [vmem:[%s2805_s10 + $0x160] sm:$0xff]  ;;  %1586 = vmatprep.subr.bf16.mxu0 %v1585_v12 }
 0x1f2   :  { %1538 = vmatprep.subr.bf16.mxu1 %v1537_v20  ;;  %v1587_v17 = vpack.c.bf16 %v867_v15, %v864_v14 }
 0x1f4   :  { %1588 = vmatpush3.bf16.msra.mxu0 %v1587_v17 }
 0x1f5   :  { %1540 = vmatpush1.bf16.msra.mxu1 %v1539_v26  ;;  %v649_v26 = vrot.slane %v629_v24, %v1928_v60 }
 0x1f6   :  { %1542 = vmatprep.subr.bf16.mxu1 %v1541_v34 }
 0x1f9   :  { %1544 = vmatpush1.bf16.msra.mxu1 %v1543_v41 }
 0x1fa   :  { %1546 = vmatprep.subr.bf16.mxu1 %v1545_v49 }
 0x1fd   :  { %1548 = vmatpush1.bf16.msra.mxu1 %v1547_v54  ;;  %v921_v54 = vrot.slane %v916_v51, %v1928_v60 }
 0x1fe   :  { %1550 = vmatprep.subr.bf16.mxu1 %v1549_v63 }
 0x201   :  { %1552 = vmatpush1.bf16.msra.mxu1 %v1551_v4 }
 0x202   :  { %1554 = vmatprep.subr.bf16.mxu1 %v1553_v9 }
 0x205   :  { %1556 = vmatpush1.bf16.msra.mxu1 %v1555_v16 }
 0x251   :  { %v1207_v18 = vpop.f32.mrb[0].mxu1 }
 0x252   :  { %v1208_v20 = vpop.f32.mrb[1].mxu1 }
 0x253   :  { %v1209_v21 = vadd.f32 %v1208_v20, %v1207_v18 }
 0x255   :  { %v2766_v22 = vadd.f32 %v1209_v21, %v483_v19  ;;  %v1143_v21 = vld [vmem:[%s2810_s3] sm:$0x1] }
 0x257   :  { %v1131_v23 = vsel %vm1130_vm5, %v2766_v22, -inf }
 0x258   :  { %1132 = vmax.xlane.f32.xlu0 %v1131_v23 }
 0x29b   :  { %v803_v28 = vpop.f32.mrb[2].mxu1 }
 0x29c   :  { %v1591_v29 = vadd.f32 %v803_v28, %v649_v26  ;;  %v805_v30 = vpop.f32.mrb[3].mxu1 }
 0x29d   :  { %v1592_v31 = vadd.f32 %v805_v30, %v653_v27 }
 0x29e   :  { %v810_v33 = vmin.f32 %v1591_v29, 0.0  ;;  %vm808_vm7 = vcmp.gt.f32.partialorder %v1591_v29, 0.0 }
 0x29f   :  { %v811_v34 = vmin.f32 %v1592_v31, 0.0  ;;  %vm809_vm6 = vcmp.gt.f32.partialorder %v1592_v31, 0.0 }
 0x2a0   :  { %v812_v35 = vmul.f32 1.442695, %v810_v33 }
 0x2a1   :  { %v814_v36 = vmul.f32 1.442695, %v811_v34 }
 0x2a2   :  { %1605 = vpow2.f32 %v812_v35 }
 0x2a3   :  { %1607 = vpow2.f32 %v814_v36 }
 0x2ac   :  { %v1606_v37 = vpop.eup %1605 }
 0x2ad   :  { %v1608_v38 = vpop.eup %1607  ;;  %v1173_v41 = vadd.f32 -1.0, %v1606_v37 }
 0x2ae   :  { %v1174_v42 = vadd.f32 -1.0, %v1608_v38 }
 0x2af   :  { %v818_v45 = vsel %vm808_vm7, %v1591_v29, %v1173_v41 }
 0x2b0   :  { %v819_v43 = vsel %vm809_vm6, %v1592_v31, %v1174_v42 }
 0x2b1   :  { %997 = vmatprep.mubr.f32.mxu1 %v819_v43  ;;  %1068 = vmatprep.mubr.f32.mxu0 %v819_v43 }
 0x2b2   :  { %998 = vmatmul.mubr.f32.vlgmr.msra.gmra.mrb[4].mxu1 %v818_v45  ;;  %1069 = vmatmul.mubr.f32.vlgmr.msra.gmra.mrb[2].mxu0 %v818_v45 }
 0x2e5   :  { %v1133_v46 = vpop.xlane.xlu0 %1132 }
 0x2e6   :  { %v1134_v47 = vsub.f32 %v2766_v22, %v1133_v46 }
 0x2e8   :  { %v1135_v48 = vmul.f32 1.442695, %v1134_v47 }
 0x2ea   :  { %1609 = vpow2.f32 %v1135_v48 }
 0x2f4   :  { %v1610_v49 = vpop.eup %1609 }
 0x2f5   :  { %v1137_v50 = vsel %vm1130_vm5, %v1610_v49, 0.0 }
 0x2f6   :  { %1138 = vadd.xlane.f32.xlu0 %v1137_v50 }
 0x383   :  { %v1139_v55 = vpop.xlane.xlu0 %1138 }
 0x384   :  { %1611 = vlog2.f32 %v1139_v55 }
 0x385   :  { %v999_v58 = vpop.f32.mrb[4].mxu1  ;;  %v1242_v59 = vpop.f32.mrb[2].mxu0 }
 0x386   :  { %v1000_v62 = vadd.f32 %v999_v58, %v921_v54  ;;  %v1001_v63 = vpop.f32.mrb[5].mxu1  ;;  %v1243_v0 = vpop.f32.mrb[3].mxu0 }
 0x387   :  { %v1002_v1 = vadd.f32 %v1001_v63, %v925_v56  ;;  %v1244_v3 = vadd.f32 %v1243_v0, %v1242_v59 }
 0x389   :  { %v1078_v4 = vcombine.low %v1000_v62, %v1002_v1  ;;  %v1071_v5 = vadd.f32 %v1244_v3, %v929_v61 }
 0x38b   :  { %v1085_v6 = vrot.slane %v1078_v4, %v1084_v2  ;;  %v1092_v7 = vrot.slane %v1071_v5, %v1084_v2 }
 0x38d   :  { %v1093_v8 = vcombine.low %v1085_v6, %v1092_v7 }
 0x38e   :  { %v1612_v9 = vpop.eup %1611 }
 0x38f   :  { %v1141_v10 = vmul.f32 0.6931472, %v1612_v9  ;;  %v1100_v11 = vrot.slane %v1093_v8, %v1084_v2 }
 0x391   :  { %v1102_v12 = vsub.f32 %v1074_v44, %v1100_v11  ;;  %v1142_v13 = vadd.f32 %v1141_v10, %v1133_v46 }
 0x393   :  { %v1103_v14 = vmul.f32 %v1102_v12, %v1102_v12  ;;  %v1144_v19 = vsub.f32 %v1142_v13, %v2766_v22 }
 0x395   :  { %v1108_v15 = vrot.slane %v1103_v14, %v1928_v60  ;;  %v1112_v32 = vrot.slane %v1103_v14, %v1762_v39  ;;  %v1116_v16 = vrot.slane %v1103_v14, %v2127_v40  ;;  %v1145_v26 = vmul.f32 %v1144_v19, %v1143_v21 }
 0x396   :  { %v1153_v40 = vand.u32 127, %v188_v25 }
 0x397   :  { %v1121_v17 = vsel %vm1120_vm8, %v1108_v15, 0.0  ;;  %v1122_v18 = vsel %vm1120_vm8, %v1112_v32, 0.0  ;;  %v1125_v23 = vsel %vm1124_vm9, %v1116_v16, 0.0  ;;  %v1146_v60 = vsel %vm1130_vm5, %v1145_v26, 0.0 }
 0x398   :  { %v1123_v20 = vadd.f32 %v1122_v18, %v1121_v17  ;;  %vm1154_vm10 = vcmp.eq.s32.totalorder %v1153_v40, 0  ;;  %vm1156_vm11 = vcmp.eq.s32.totalorder %v1153_v40, 1  ;;  %vm1159_vm12 = vcmp.eq.s32.totalorder %v1153_v40, 2 }
 0x39a   :  { %v1126_v24 = vadd.f32 %v1125_v23, %v1123_v20 }
 0x39c   :  { %1127 = vadd.xlane.f32.xlu1 %v1126_v24 }
 0x3a0   :  { %1147 = vadd.xlane.f32.xlu1 %v1146_v60 }
 0x429   :  { %v1128_v39 = vpop.xlane.xlu1 %1127 }
 0x42a   :  { %v1129_v27 = vmul.f32 0.0034722222, %v1128_v39 }
 0x42c   :  { %v1150_v29 = vmul.f32 0.2, %v1129_v27  ;;  %v1155_v31 = vsel %vm1154_vm10, %v1129_v27, 0.0 }
 0x42d   :  { %v1148_v28 = vpop.xlane.xlu1 %1147 }
 0x42e   :  { %v1149_v30 = vmul.f32 0.8, %v1148_v28  ;;  %v1160_v35 = vsel %vm1159_vm12, %v1148_v28, 0.0 }
 0x430   :  { %v1151_v22 = vadd.f32 %v1150_v29, %v1149_v30 }
 0x432   :  { %v1157_v33 = vsel %vm1156_vm11, %v1151_v22, 0.0 }
 0x433   :  { %v1158_v34 = vadd.f32 %v1157_v33, %v1155_v31 }
 0x435   :  { %v1161_v36 = vadd.f32 %v1160_v35, %v1158_v34 }
 0x437   :  { %1162 = vst [vmem:[%s2811_s12] sm:$0x1] %v1161_v36 }

</bundles_post_ra>
